<compile_context>
chip_gen: v5e
topology: v5e:2x2
jax: 0.10.0
libtpu: 0.0.40
codegen_flags: <defaults>
</compile_context>

<pallas_src>
import functools

import jax
import jax.numpy as jnp
from jax import lax
from jax.experimental import pallas as pl
from jax.experimental.pallas import tpu as pltpu

_VMEM_LIMIT = 32 * 1024 * 1024  # explicit scoped-VMEM cap, safe on v5e/v6e/v7x


# ----------------------------- activations (in-kernel) -----------------------------

def _hardswish(x):
    return x * jnp.clip(x + 3.0, 0.0, 6.0) * (1.0 / 6.0)


def _hardsigmoid(x):
    return jnp.clip(x + 3.0, 0.0, 6.0) * (1.0 / 6.0)


def _relu(x):
    return jnp.maximum(x, 0.0)


# --------------------- pass 1: fused expand + depthwise (+ SE sums) -----------------

def _make_front_kernel(*, H, W, Cin, hid, k, stride, pad, act, with_expand, with_se):
    Hp, Wp = H + 2 * pad, W + 2 * pad
    Hout = (H + 2 * pad - k) // stride + 1
    Wout = (W + 2 * pad - k) // stride + 1

    def kernel(*refs):
        i = 0
        x_ref = refs[i]; i += 1
        if with_expand:
            we_ref = refs[i]; i += 1
            be_ref = refs[i]; i += 1
        wd_ref = refs[i]; i += 1
        bd_ref = refs[i]; i += 1
        h_ref = refs[i]; i += 1
        sum_ref = refs[i] if with_se else None

        xp = x_ref[0]                                   # (Hp, Wp, Cin) f32, zero halo
        if with_expand:
            # 1x1 expand as Cin broadcast-FMAs over the hid lane dim (VPU). Cin is the
            # narrow dim of this block; this avoids an in-kernel (Hp,Wp,C)<->(Hp*Wp,C)
            # relayout. TODO(synk): at large Cin route the expand through an MXU matmul.
            e = jnp.zeros((Hp, Wp, hid), jnp.float32)
            for c in range(Cin):
                e = e + xp[:, :, c:c + 1] * we_ref[c:c + 1, :]
            hpad = act(e + be_ref[...])
            # The zero halo was contaminated by the folded BN bias + activation; mask it
            # back to the zeros the depthwise padding expects.
            row_idx = lax.broadcasted_iota(jnp.int32, (Hp, Wp, hid), 0)
            col_idx = lax.broadcasted_iota(jnp.int32, (Hp, Wp, hid), 1)
            interior = ((row_idx >= pad) & (row_idx < pad + H) &
                        (col_idx >= pad) & (col_idx < pad + W))
            hpad = jnp.where(interior, hpad, 0.0)
        else:
            hpad = xp                                   # inp == hiddendim: expand skipped

        # depthwise KxK conv (BN scale folded into the taps) + bias + activation
        acc = jnp.zeros((Hout, Wout, hid), jnp.float32)
        for kh in range(k):
            for kw in range(k):
                if stride == 1:
                    win = hpad[kh:kh + Hout, kw:kw + Wout, :]
                else:
                    win = hpad[kh:kh + (Hout - 1) * stride + 1:stride,
                               kw:kw + (Wout - 1) * stride + 1:stride, :]
                t = kh * k + kw
                acc = acc + win * wd_ref[t:t + 1, :]
        y = act(acc + bd_ref[...])                      # (Hout, Wout, hid) f32

        h_ref[0] = y.astype(jnp.bfloat16)               # hid tensor -> HBM once, in bf16
        if with_se:
            sum_ref[...] = jnp.sum(y, axis=(0, 1), keepdims=True)   # (1, 1, hid)

    return kernel, Hout, Wout


def _front(x_nhwc, p, *, k, stride, act, with_expand, with_se):
    B, H, W, Cin = x_nhwc.shape
    hid = p["w_depth_folded"].shape[1]
    pad = (k - 1) // 2
    # pad only the narrow Cin-channel input (the wide hid tensor is never padded in HBM)
    xpad = jnp.pad(x_nhwc, ((0, 0), (pad, pad), (pad, pad), (0, 0)))
    Hp, Wp = H + 2 * pad, W + 2 * pad

    kernel, Hout, Wout = _make_front_kernel(
        H=H, W=W, Cin=Cin, hid=hid, k=k, stride=stride, pad=pad, act=act,
        with_expand=with_expand, with_se=with_se)

    args = [xpad]
    in_specs = [pl.BlockSpec((1, Hp, Wp, Cin), lambda b: (b, 0, 0, 0))]
    if with_expand:
        args += [p["w_expand_folded"], p["b_expand"]]
        in_specs += [pl.BlockSpec((Cin, hid), lambda b: (0, 0)),
                     pl.BlockSpec((1, hid), lambda b: (0, 0))]
    args += [p["w_depth_folded"], p["b_depth"]]
    in_specs += [pl.BlockSpec((k * k, hid), lambda b: (0, 0)),
                 pl.BlockSpec((1, hid), lambda b: (0, 0))]

    out_shape = [jax.ShapeDtypeStruct((B, Hout, Wout, hid), jnp.bfloat16)]
    out_specs = [pl.BlockSpec((1, Hout, Wout, hid), lambda b: (b, 0, 0, 0))]
    if with_se:
        out_shape.append(jax.ShapeDtypeStruct((B, 1, hid), jnp.float32))
        out_specs.append(pl.BlockSpec((1, 1, hid), lambda b: (b, 0, 0)))

    outs = pl.pallas_call(
        kernel,
        out_shape=tuple(out_shape),
        grid=(B,),
        in_specs=in_specs,
        out_specs=tuple(out_specs),
        compiler_params=pltpu.CompilerParams(
            dimension_semantics=("parallel",),
            vmem_limit_bytes=_VMEM_LIMIT),
    )(*args)
    if with_se:
        hidden, sums = outs
    else:
        hidden, sums = outs[0], None
    return hidden, sums, Hout, Wout


# ------- pass 2: SE (fused) + project 1x1 + BN + residual, lane-dense NCHW slab -------

def _row_tile(Ho, Wo):
    # Smallest divisor of Ho whose (rows * Wo) tile is a multiple of 128 lanes
    # (lane-dense stores + maximal grid parallelism); fall back to the whole image.
    cands = [d for d in range(1, Ho + 1) if Ho % d == 0 and (d * Wo) % 128 == 0]
    return min(cands) if cands else Ho


def _make_proj_kernel(*, with_se, with_res, inv_hw):
    def kernel(*refs):
        i = 0
        h_ref = refs[i]; i += 1
        if with_se:
            sum_ref = refs[i]; i += 1
            w1_ref = refs[i]; i += 1
            b1_ref = refs[i]; i += 1
            w2_ref = refs[i]; i += 1
            b2_ref = refs[i]; i += 1
        wp_ref = refs[i]; i += 1
        bp_ref = refs[i]; i += 1
        if with_res:
            r_ref = refs[i]; i += 1
        o_ref = refs[i]

        if with_se:
            # squeeze-excite on the pooled sums (tiny FCs), fused in-kernel, then the
            # per-batch channel scale is folded into the (oup, hid) project weight.
            z = sum_ref[0] * inv_hw                         # global average pool, (1, hid)
            z = jnp.dot(z, w1_ref[...], preferred_element_type=jnp.float32) + b1_ref[...]
            z = jnp.maximum(z, 0.0)
            z = jnp.dot(z, w2_ref[...], preferred_element_type=jnp.float32) + b2_ref[...]
            scale = _hardsigmoid(z)                         # (1, hid)
            w = (wp_ref[...].astype(jnp.float32) * scale).astype(jnp.bfloat16)
        else:
            w = wp_ref[...]                                 # (oup, hid) bf16

        h = h_ref[0]                                        # (N, hid) bf16
        y = jnp.dot(w, h.T, preferred_element_type=jnp.float32)   # MXU, (oup, N)
        y = y + bp_ref[...]                                 # folded BN bias
        if with_res:
            y = y + r_ref[0]
        o_ref[0] = y                                        # lane-dense NCHW slab

    return kernel


def _project(hidden, sums, p, residual, Ho, Wo, *, with_se):
    B = hidden.shape[0]
    hid = hidden.shape[-1]
    wpT = p["w_projT_folded"]
    bp = p["b_proj"]
    oup = wpT.shape[0]
    h3 = hidden.reshape(B, Ho * Wo, hid)                    # XLA-level reshape, free
    TH = _row_tile(Ho, Wo)
    R = Ho // TH
    N = TH * Wo
    with_res = residual is not None

    args = [h3]
    in_specs = [pl.BlockSpec((1, N, hid), lambda b, r: (b, r, 0))]
    if with_se:
        hd = p["se_w1"].shape[1]
        args += [sums, p["se_w1"], p["se_b1"], p["se_w2"], p["se_b2"]]
        in_specs += [pl.BlockSpec((1, 1, hid), lambda b, r: (b, 0, 0)),
                     pl.BlockSpec((hid, hd), lambda b, r: (0, 0)),
                     pl.BlockSpec((1, hd), lambda b, r: (0, 0)),
                     pl.BlockSpec((hd, hid), lambda b, r: (0, 0)),
                     pl.BlockSpec((1, hid), lambda b, r: (0, 0))]
    args += [wpT, bp]
    in_specs += [pl.BlockSpec((oup, hid), lambda b, r: (0, 0)),
                 pl.BlockSpec((oup, 1), lambda b, r: (0, 0))]
    if with_res:
        args.append(residual)
        in_specs.append(pl.BlockSpec((1, oup, N), lambda b, r: (b, 0, r)))

    out = pl.pallas_call(
        _make_proj_kernel(with_se=with_se, with_res=with_res,
                          inv_hw=1.0 / float(Ho * Wo)),
        out_shape=jax.ShapeDtypeStruct((B, oup, Ho * Wo), jnp.float32),
        grid=(B, R),
        in_specs=in_specs,
        out_specs=pl.BlockSpec((1, oup, N), lambda b, r: (b, 0, r)),
        compiler_params=pltpu.CompilerParams(
            dimension_semantics=("parallel", "parallel"),
            vmem_limit_bytes=_VMEM_LIMIT),
    )(*args)
    return out.reshape(B, oup, Ho, Wo)                      # already NCHW; free reshape


# ----------------------------------- parameters -------------------------------------

def _bn_scale_bias(key, c, eps=1e-5):
    k1, k2, k3, k4 = jax.random.split(key, 4)
    gamma = 1.0 + 0.1 * jax.random.normal(k1, (c,), jnp.float32)
    beta = 0.1 * jax.random.normal(k2, (c,), jnp.float32)
    mean = 0.1 * jax.random.normal(k3, (c,), jnp.float32)
    var = jnp.abs(jax.random.normal(k4, (c,), jnp.float32)) + 0.5
    scale = gamma / jnp.sqrt(var + eps)
    bias = beta - mean * scale
    return scale, bias


def init_params(key, inp, hiddendim, oup, kernel_size, se):
    keys = jax.random.split(key, 10)
    p = {}
    # Conv2d(inp, hid, 1) weight -> matmul weight [inp, hid]; BN scale folded in.
    w_expand = 0.1 * jax.random.normal(keys[0], (inp, hiddendim), jnp.float32)
    s_e, b_e = _bn_scale_bias(keys[1], hiddendim)
    p["w_expand_folded"] = w_expand * s_e[None, :]          # f32 (VPU path)
    p["b_expand"] = b_e.reshape(1, hiddendim)
    # depthwise Conv2d(hid, hid, K, groups=hid) weight -> [K*K, hid]; BN scale folded.
    w_depth = 0.1 * jax.random.normal(
        keys[2], (kernel_size * kernel_size, hiddendim), jnp.float32)
    s_d, b_d = _bn_scale_bias(keys[3], hiddendim)
    p["w_depth_folded"] = w_depth * s_d[None, :]
    p["b_depth"] = b_d.reshape(1, hiddendim)
    if se:
        hd = hiddendim // 4
        p["se_w1"] = 0.1 * jax.random.normal(keys[4], (hiddendim, hd), jnp.float32)
        p["se_b1"] = (0.1 * jax.random.normal(keys[5], (hd,), jnp.float32)).reshape(1, hd)
        p["se_w2"] = 0.1 * jax.random.normal(keys[6], (hd, hiddendim), jnp.float32)
        p["se_b2"] = (0.1 * jax.random.normal(keys[7], (hiddendim,), jnp.float32)
                      ).reshape(1, hiddendim)
    # Conv2d(hid, oup, 1) weight -> [hid, oup]; BN scale folded, stored transposed+bf16.
    w_proj = 0.1 * jax.random.normal(keys[8], (hiddendim, oup), jnp.float32)
    s_p, b_p = _bn_scale_bias(keys[9], oup)
    p["w_projT_folded"] = (w_proj * s_p[None, :]).T.astype(jnp.bfloat16)   # (oup, hid)
    p["b_proj"] = b_p.reshape(oup, 1)
    return p


# ----------------------------------- forward pass ------------------------------------

def inverted_residual_block(x_nchw, p, *, kernel_size, stride, se, swish):
    act = _hardswish if swish else _relu
    B, Cin, H, W = x_nchw.shape
    hid = p["w_depth_folded"].shape[1]
    oup = p["w_projT_folded"].shape[0]
    with_expand = (Cin != hid)

    x_nhwc = jnp.transpose(x_nchw, (0, 2, 3, 1)).astype(jnp.float32)  # narrow Cin tensor

    hidden, sums, Ho, Wo = _front(x_nhwc, p, k=kernel_size, stride=stride,
                                  act=act, with_expand=with_expand, with_se=se)

    residual = None
    if Cin == oup and stride == 1:
        residual = x_nchw.reshape(B, Cin, H * W).astype(jnp.float32)

    return _project(hidden, sums, p, residual, Ho, Wo, with_se=se)


# --------------------------------------- main ----------------------------------------

if __name__ == "__main__":
    key = jax.random.PRNGKey(0)
    kx, kp = jax.random.split(key)

    # config: inp=4, hiddendim=16, oup=4, kernel_size=3, stride=1, se=True, swish=True
    B, Cin, H, W = 2, 4, 16, 16
    hiddendim, oup, ksize, stride = 16, 4, 3, 1
    se, swish = True, True

    x = jax.random.normal(kx, (B, Cin, H, W), jnp.float32)
    params = init_params(kp, Cin, hiddendim, oup, ksize, se)

    fwd = jax.jit(functools.partial(inverted_residual_block, kernel_size=ksize,
                                    stride=stride, se=se, swish=swish))
    out = fwd(x, params)
    out = jax.block_until_ready(out)
    assert out.shape == (B, oup, H, W), out.shape
    assert bool(jnp.all(jnp.isfinite(out)))
    print("KERNEL_OK")
</pallas_src>

<mosaic_0001>
module attributes {stable_mosaic.version = 11 : i64} {
  func.func @kernel(%arg0: i32, %arg1: memref<1x18x18x4xf32, #tpu.memory_space<vmem>>, %arg2: memref<4x16xf32, #tpu.memory_space<vmem>>, %arg3: memref<1x16xf32, #tpu.memory_space<vmem>>, %arg4: memref<9x16xf32, #tpu.memory_space<vmem>>, %arg5: memref<1x16xf32, #tpu.memory_space<vmem>>, %arg6: memref<1x16x16x16xbf16, #tpu.memory_space<vmem>>, %arg7: memref<1x1x16xf32, #tpu.memory_space<vmem>>) attributes {dimension_semantics = [#tpu.dimension_semantics<parallel>], iteration_bounds = array<i64: 2>, scalar_prefetch = 0 : i64, scratch_operands = 0 : i64, tpu.core_type = #tpu.core_type<tc>, window_params = [{transform_indices = @transform_0, window_bounds = array<i64: 1, 18, 18, 4>}, {pipeline_mode = #tpu.pipeline_mode<synchronous>, transform_indices = @transform_1, window_bounds = array<i64: 4, 16>}, {pipeline_mode = #tpu.pipeline_mode<synchronous>, transform_indices = @transform_2, window_bounds = array<i64: 1, 16>}, {pipeline_mode = #tpu.pipeline_mode<synchronous>, transform_indices = @transform_3, window_bounds = array<i64: 9, 16>}, {pipeline_mode = #tpu.pipeline_mode<synchronous>, transform_indices = @transform_4, window_bounds = array<i64: 1, 16>}, {transform_indices = @transform_5, window_bounds = array<i64: 1, 16, 16, 16>}, {transform_indices = @transform_6, window_bounds = array<i64: 1, 1, 16>}]} {
    %c0 = arith.constant 0 : index
    %c0_0 = arith.constant 0 : index
    %c0_1 = arith.constant 0 : index
    %c0_2 = arith.constant 0 : index
    %0 = vector.load %arg1[%c0, %c0_0, %c0_1, %c0_2] : memref<1x18x18x4xf32, #tpu.memory_space<vmem>>, vector<1x18x18x4xf32>
    %1 = vector.shape_cast %0 : vector<1x18x18x4xf32> to vector<18x18x4xf32>
    %cst = arith.constant 0.000000e+00 : f32
    %2 = vector.broadcast %cst : f32 to vector<18x18x16xf32>
    %3 = vector.extract_strided_slice %1 {offsets = [0, 0, 0], sizes = [18, 18, 1], strides = [1, 1, 1]} : vector<18x18x4xf32> to vector<18x18x1xf32>
    %c0_3 = arith.constant 0 : index
    %c0_4 = arith.constant 0 : index
    %4 = vector.load %arg2[%c0_3, %c0_4] : memref<4x16xf32, #tpu.memory_space<vmem>>, vector<1x16xf32>
    %5 = vector.shape_cast %4 : vector<1x16xf32> to vector<1x1x16xf32>
    %6 = vector.broadcast %3 : vector<18x18x1xf32> to vector<18x18x16xf32>
    %7 = vector.broadcast %5 : vector<1x1x16xf32> to vector<18x18x16xf32>
    %8 = arith.mulf %6, %7 : vector<18x18x16xf32>
    %9 = arith.addf %2, %8 : vector<18x18x16xf32>
    %10 = vector.extract_strided_slice %1 {offsets = [0, 0, 1], sizes = [18, 18, 1], strides = [1, 1, 1]} : vector<18x18x4xf32> to vector<18x18x1xf32>
    %c1 = arith.constant 1 : index
    %c0_5 = arith.constant 0 : index
    %11 = vector.load %arg2[%c1, %c0_5] : memref<4x16xf32, #tpu.memory_space<vmem>>, vector<1x16xf32>
    %12 = vector.shape_cast %11 : vector<1x16xf32> to vector<1x1x16xf32>
    %13 = vector.broadcast %10 : vector<18x18x1xf32> to vector<18x18x16xf32>
    %14 = vector.broadcast %12 : vector<1x1x16xf32> to vector<18x18x16xf32>
    %15 = arith.mulf %13, %14 : vector<18x18x16xf32>
    %16 = arith.addf %9, %15 : vector<18x18x16xf32>
    %17 = vector.extract_strided_slice %1 {offsets = [0, 0, 2], sizes = [18, 18, 1], strides = [1, 1, 1]} : vector<18x18x4xf32> to vector<18x18x1xf32>
    %c2 = arith.constant 2 : index
    %c0_6 = arith.constant 0 : index
    %18 = vector.load %arg2[%c2, %c0_6] : memref<4x16xf32, #tpu.memory_space<vmem>>, vector<1x16xf32>
    %19 = vector.shape_cast %18 : vector<1x16xf32> to vector<1x1x16xf32>
    %20 = vector.broadcast %17 : vector<18x18x1xf32> to vector<18x18x16xf32>
    %21 = vector.broadcast %19 : vector<1x1x16xf32> to vector<18x18x16xf32>
    %22 = arith.mulf %20, %21 : vector<18x18x16xf32>
    %23 = arith.addf %16, %22 : vector<18x18x16xf32>
    %24 = vector.extract_strided_slice %1 {offsets = [0, 0, 3], sizes = [18, 18, 1], strides = [1, 1, 1]} : vector<18x18x4xf32> to vector<18x18x1xf32>
    %c3 = arith.constant 3 : index
    %c0_7 = arith.constant 0 : index
    %25 = vector.load %arg2[%c3, %c0_7] : memref<4x16xf32, #tpu.memory_space<vmem>>, vector<1x16xf32>
    %26 = vector.shape_cast %25 : vector<1x16xf32> to vector<1x1x16xf32>
    %27 = vector.broadcast %24 : vector<18x18x1xf32> to vector<18x18x16xf32>
    %28 = vector.broadcast %26 : vector<1x1x16xf32> to vector<18x18x16xf32>
    %29 = arith.mulf %27, %28 : vector<18x18x16xf32>
    %30 = arith.addf %23, %29 : vector<18x18x16xf32>
    %c0_8 = arith.constant 0 : index
    %c0_9 = arith.constant 0 : index
    %31 = vector.load %arg3[%c0_8, %c0_9] : memref<1x16xf32, #tpu.memory_space<vmem>>, vector<1x16xf32>
    %32 = vector.shape_cast %31 : vector<1x16xf32> to vector<1x1x16xf32>
    %33 = vector.broadcast %32 : vector<1x1x16xf32> to vector<18x18x16xf32>
    %34 = arith.addf %30, %33 : vector<18x18x16xf32>
    %cst_10 = arith.constant 3.000000e+00 : f32
    %35 = vector.broadcast %cst_10 : f32 to vector<18x18x16xf32>
    %36 = arith.addf %34, %35 : vector<18x18x16xf32>
    %cst_11 = arith.constant 0.000000e+00 : f32
    %cst_12 = arith.constant 6.000000e+00 : f32
    %37 = vector.broadcast %cst_11 : f32 to vector<18x18x16xf32>
    %38 = arith.maximumf %37, %36 : vector<18x18x16xf32>
    %39 = vector.broadcast %cst_12 : f32 to vector<18x18x16xf32>
    %40 = arith.minimumf %39, %38 : vector<18x18x16xf32>
    %41 = arith.mulf %34, %40 : vector<18x18x16xf32>
    %cst_13 = arith.constant 0.166666672 : f32
    %42 = vector.broadcast %cst_13 : f32 to vector<18x18x16xf32>
    %43 = arith.mulf %41, %42 : vector<18x18x16xf32>
    %44 = tpu.iota {dimensions = array<i32: 0>} : vector<18x18x16xi32>
    %45 = tpu.iota {dimensions = array<i32: 1>} : vector<18x18x16xi32>
    %c1_i32 = arith.constant 1 : i32
    %46 = vector.broadcast %c1_i32 : i32 to vector<18x18x16xi32>
    %47 = arith.cmpi sge, %44, %46 : vector<18x18x16xi32>
    %c17_i32 = arith.constant 17 : i32
    %48 = vector.broadcast %c17_i32 : i32 to vector<18x18x16xi32>
    %49 = arith.cmpi slt, %44, %48 : vector<18x18x16xi32>
    %50 = arith.andi %47, %49 : vector<18x18x16xi1>
    %c1_i32_14 = arith.constant 1 : i32
    %51 = vector.broadcast %c1_i32_14 : i32 to vector<18x18x16xi32>
    %52 = arith.cmpi sge, %45, %51 : vector<18x18x16xi32>
    %53 = arith.andi %50, %52 : vector<18x18x16xi1>
    %c17_i32_15 = arith.constant 17 : i32
    %54 = vector.broadcast %c17_i32_15 : i32 to vector<18x18x16xi32>
    %55 = arith.cmpi slt, %45, %54 : vector<18x18x16xi32>
    %56 = arith.andi %53, %55 : vector<18x18x16xi1>
    %cst_16 = arith.constant 0.000000e+00 : f32
    %57 = vector.broadcast %cst_16 : f32 to vector<18x18x16xf32>
    %58 = arith.select %56, %43, %57 : vector<18x18x16xi1>, vector<18x18x16xf32>
    %cst_17 = arith.constant 0.000000e+00 : f32
    %59 = vector.broadcast %cst_17 : f32 to vector<16x16x16xf32>
    %60 = vector.extract_strided_slice %58 {offsets = [0, 0, 0], sizes = [16, 16, 16], strides = [1, 1, 1]} : vector<18x18x16xf32> to vector<16x16x16xf32>
    %c0_18 = arith.constant 0 : index
    %c0_19 = arith.constant 0 : index
    %61 = vector.load %arg4[%c0_18, %c0_19] : memref<9x16xf32, #tpu.memory_space<vmem>>, vector<1x16xf32>
    %62 = vector.shape_cast %61 : vector<1x16xf32> to vector<1x1x16xf32>
    %63 = vector.broadcast %62 : vector<1x1x16xf32> to vector<16x16x16xf32>
    %64 = arith.mulf %60, %63 : vector<16x16x16xf32>
    %65 = arith.addf %59, %64 : vector<16x16x16xf32>
    %66 = vector.extract_strided_slice %58 {offsets = [0, 1, 0], sizes = [16, 16, 16], strides = [1, 1, 1]} : vector<18x18x16xf32> to vector<16x16x16xf32>
    %c1_20 = arith.constant 1 : index
    %c0_21 = arith.constant 0 : index
    %67 = vector.load %arg4[%c1_20, %c0_21] : memref<9x16xf32, #tpu.memory_space<vmem>>, vector<1x16xf32>
    %68 = vector.shape_cast %67 : vector<1x16xf32> to vector<1x1x16xf32>
    %69 = vector.broadcast %68 : vector<1x1x16xf32> to vector<16x16x16xf32>
    %70 = arith.mulf %66, %69 : vector<16x16x16xf32>
    %71 = arith.addf %65, %70 : vector<16x16x16xf32>
    %72 = vector.extract_strided_slice %58 {offsets = [0, 2, 0], sizes = [16, 16, 16], strides = [1, 1, 1]} : vector<18x18x16xf32> to vector<16x16x16xf32>
    %c2_22 = arith.constant 2 : index
    %c0_23 = arith.constant 0 : index
    %73 = vector.load %arg4[%c2_22, %c0_23] : memref<9x16xf32, #tpu.memory_space<vmem>>, vector<1x16xf32>
    %74 = vector.shape_cast %73 : vector<1x16xf32> to vector<1x1x16xf32>
    %75 = vector.broadcast %74 : vector<1x1x16xf32> to vector<16x16x16xf32>
    %76 = arith.mulf %72, %75 : vector<16x16x16xf32>
    %77 = arith.addf %71, %76 : vector<16x16x16xf32>
    %78 = vector.extract_strided_slice %58 {offsets = [1, 0, 0], sizes = [16, 16, 16], strides = [1, 1, 1]} : vector<18x18x16xf32> to vector<16x16x16xf32>
    %c3_24 = arith.constant 3 : index
    %c0_25 = arith.constant 0 : index
    %79 = vector.load %arg4[%c3_24, %c0_25] : memref<9x16xf32, #tpu.memory_space<vmem>>, vector<1x16xf32>
    %80 = vector.shape_cast %79 : vector<1x16xf32> to vector<1x1x16xf32>
    %81 = vector.broadcast %80 : vector<1x1x16xf32> to vector<16x16x16xf32>
    %82 = arith.mulf %78, %81 : vector<16x16x16xf32>
    %83 = arith.addf %77, %82 : vector<16x16x16xf32>
    %84 = vector.extract_strided_slice %58 {offsets = [1, 1, 0], sizes = [16, 16, 16], strides = [1, 1, 1]} : vector<18x18x16xf32> to vector<16x16x16xf32>
    %c4 = arith.constant 4 : index
    %c0_26 = arith.constant 0 : index
    %85 = vector.load %arg4[%c4, %c0_26] : memref<9x16xf32, #tpu.memory_space<vmem>>, vector<1x16xf32>
    %86 = vector.shape_cast %85 : vector<1x16xf32> to vector<1x1x16xf32>
    %87 = vector.broadcast %86 : vector<1x1x16xf32> to vector<16x16x16xf32>
    %88 = arith.mulf %84, %87 : vector<16x16x16xf32>
    %89 = arith.addf %83, %88 : vector<16x16x16xf32>
    %90 = vector.extract_strided_slice %58 {offsets = [1, 2, 0], sizes = [16, 16, 16], strides = [1, 1, 1]} : vector<18x18x16xf32> to vector<16x16x16xf32>
    %c5 = arith.constant 5 : index
    %c0_27 = arith.constant 0 : index
    %91 = vector.load %arg4[%c5, %c0_27] : memref<9x16xf32, #tpu.memory_space<vmem>>, vector<1x16xf32>
    %92 = vector.shape_cast %91 : vector<1x16xf32> to vector<1x1x16xf32>
    %93 = vector.broadcast %92 : vector<1x1x16xf32> to vector<16x16x16xf32>
    %94 = arith.mulf %90, %93 : vector<16x16x16xf32>
    %95 = arith.addf %89, %94 : vector<16x16x16xf32>
    %96 = vector.extract_strided_slice %58 {offsets = [2, 0, 0], sizes = [16, 16, 16], strides = [1, 1, 1]} : vector<18x18x16xf32> to vector<16x16x16xf32>
    %c6 = arith.constant 6 : index
    %c0_28 = arith.constant 0 : index
    %97 = vector.load %arg4[%c6, %c0_28] : memref<9x16xf32, #tpu.memory_space<vmem>>, vector<1x16xf32>
    %98 = vector.shape_cast %97 : vector<1x16xf32> to vector<1x1x16xf32>
    %99 = vector.broadcast %98 : vector<1x1x16xf32> to vector<16x16x16xf32>
    %100 = arith.mulf %96, %99 : vector<16x16x16xf32>
    %101 = arith.addf %95, %100 : vector<16x16x16xf32>
    %102 = vector.extract_strided_slice %58 {offsets = [2, 1, 0], sizes = [16, 16, 16], strides = [1, 1, 1]} : vector<18x18x16xf32> to vector<16x16x16xf32>
    %c7 = arith.constant 7 : index
    %c0_29 = arith.constant 0 : index
    %103 = vector.load %arg4[%c7, %c0_29] : memref<9x16xf32, #tpu.memory_space<vmem>>, vector<1x16xf32>
    %104 = vector.shape_cast %103 : vector<1x16xf32> to vector<1x1x16xf32>
    %105 = vector.broadcast %104 : vector<1x1x16xf32> to vector<16x16x16xf32>
    %106 = arith.mulf %102, %105 : vector<16x16x16xf32>
    %107 = arith.addf %101, %106 : vector<16x16x16xf32>
    %108 = vector.extract_strided_slice %58 {offsets = [2, 2, 0], sizes = [16, 16, 16], strides = [1, 1, 1]} : vector<18x18x16xf32> to vector<16x16x16xf32>
    %c8 = arith.constant 8 : index
    %c0_30 = arith.constant 0 : index
    %109 = vector.load %arg4[%c8, %c0_30] : memref<9x16xf32, #tpu.memory_space<vmem>>, vector<1x16xf32>
    %110 = vector.shape_cast %109 : vector<1x16xf32> to vector<1x1x16xf32>
    %111 = vector.broadcast %110 : vector<1x1x16xf32> to vector<16x16x16xf32>
    %112 = arith.mulf %108, %111 : vector<16x16x16xf32>
    %113 = arith.addf %107, %112 : vector<16x16x16xf32>
    %c0_31 = arith.constant 0 : index
    %c0_32 = arith.constant 0 : index
    %114 = vector.load %arg5[%c0_31, %c0_32] : memref<1x16xf32, #tpu.memory_space<vmem>>, vector<1x16xf32>
    %115 = vector.shape_cast %114 : vector<1x16xf32> to vector<1x1x16xf32>
    %116 = vector.broadcast %115 : vector<1x1x16xf32> to vector<16x16x16xf32>
    %117 = arith.addf %113, %116 : vector<16x16x16xf32>
    %cst_33 = arith.constant 3.000000e+00 : f32
    %118 = vector.broadcast %cst_33 : f32 to vector<16x16x16xf32>
    %119 = arith.addf %117, %118 : vector<16x16x16xf32>
    %cst_34 = arith.constant 0.000000e+00 : f32
    %cst_35 = arith.constant 6.000000e+00 : f32
    %120 = vector.broadcast %cst_34 : f32 to vector<16x16x16xf32>
    %121 = arith.maximumf %120, %119 : vector<16x16x16xf32>
    %122 = vector.broadcast %cst_35 : f32 to vector<16x16x16xf32>
    %123 = arith.minimumf %122, %121 : vector<16x16x16xf32>
    %124 = arith.mulf %117, %123 : vector<16x16x16xf32>
    %cst_36 = arith.constant 0.166666672 : f32
    %125 = vector.broadcast %cst_36 : f32 to vector<16x16x16xf32>
    %126 = arith.mulf %124, %125 : vector<16x16x16xf32>
    %127 = arith.truncf %126 : vector<16x16x16xf32> to vector<16x16x16xbf16>
    %c0_37 = arith.constant 0 : index
    %c0_38 = arith.constant 0 : index
    %c0_39 = arith.constant 0 : index
    %c0_40 = arith.constant 0 : index
    %128 = vector.load %arg6[%c0_37, %c0_38, %c0_39, %c0_40] : memref<1x16x16x16xbf16, #tpu.memory_space<vmem>>, vector<1x16x16x16xbf16>
    %129 = vector.shape_cast %128 : vector<1x16x16x16xbf16> to vector<16x16x16xbf16>
    %130 = vector.shape_cast %127 : vector<16x16x16xbf16> to vector<1x16x16x16xbf16>
    tpu.vector_store %arg6[%c0_37, %c0_38, %c0_39, %c0_40], %130 {strides = array<i32>} : memref<1x16x16x16xbf16, #tpu.memory_space<vmem>>, vector<1x16x16x16xbf16>,
    %cst_41 = arith.constant dense<0.000000e+00> : vector<16xf32>
    %131 = vector.multi_reduction <add>, %126, %cst_41 [0, 1] : vector<16x16x16xf32> to vector<16xf32>
    %132 = vector.shape_cast %131 : vector<16xf32> to vector<1x1x16xf32>
    %c0_42 = arith.constant 0 : index
    %c0_43 = arith.constant 0 : index
    %c0_44 = arith.constant 0 : index
    %133 = vector.load %arg7[%c0_42, %c0_43, %c0_44] : memref<1x1x16xf32, #tpu.memory_space<vmem>>, vector<1x1x16xf32>
    tpu.vector_store %arg7[%c0_42, %c0_43, %c0_44], %132 {strides = array<i32>} : memref<1x1x16xf32, #tpu.memory_space<vmem>>, vector<1x1x16xf32>,
    return
  }
  func.func @transform_0(%arg0: i32) -> (i32, i32, i32, i32) {
    %c0_i32 = arith.constant 0 : i32
    %c0_i32_0 = arith.constant 0 : i32
    %c0_i32_1 = arith.constant 0 : i32
    %c0_i32_2 = arith.constant 0 : i32
    return %arg0, %c0_i32, %c0_i32_0, %c0_i32_1 : i32, i32, i32, i32
  }
  func.func @transform_1(%arg0: i32) -> (i32, i32) {
    %c0_i32 = arith.constant 0 : i32
    %c0_i32_0 = arith.constant 0 : i32
    %c0_i32_1 = arith.constant 0 : i32
    return %c0_i32, %c0_i32_0 : i32, i32
  }
  func.func @transform_2(%arg0: i32) -> (i32, i32) {
    %c0_i32 = arith.constant 0 : i32
    %c0_i32_0 = arith.constant 0 : i32
    %c0_i32_1 = arith.constant 0 : i32
    return %c0_i32, %c0_i32_0 : i32, i32
  }
  func.func @transform_3(%arg0: i32) -> (i32, i32) {
    %c0_i32 = arith.constant 0 : i32
    %c0_i32_0 = arith.constant 0 : i32
    %c0_i32_1 = arith.constant 0 : i32
    return %c0_i32, %c0_i32_0 : i32, i32
  }
  func.func @transform_4(%arg0: i32) -> (i32, i32) {
    %c0_i32 = arith.constant 0 : i32
    %c0_i32_0 = arith.constant 0 : i32
    %c0_i32_1 = arith.constant 0 : i32
    return %c0_i32, %c0_i32_0 : i32, i32
  }
  func.func @transform_5(%arg0: i32) -> (i32, i32, i32, i32) {
    %c0_i32 = arith.constant 0 : i32
    %c0_i32_0 = arith.constant 0 : i32
    %c0_i32_1 = arith.constant 0 : i32
    %c0_i32_2 = arith.constant 0 : i32
    return %arg0, %c0_i32, %c0_i32_0, %c0_i32_1 : i32, i32, i32, i32
  }
  func.func @transform_6(%arg0: i32) -> (i32, i32, i32) {
    %c0_i32 = arith.constant 0 : i32
    %c0_i32_0 = arith.constant 0 : i32
    %c0_i32_1 = arith.constant 0 : i32
    return %arg0, %c0_i32, %c0_i32_0 : i32, i32, i32
  }
}

module attributes {stable_mosaic.version = 11 : i64} {
  func.func @kernel(%arg0: i32, %arg1: i32, %arg2: memref<1x128x16xbf16, #tpu.memory_space<vmem>>, %arg3: memref<1x1x16xf32, #tpu.memory_space<vmem>>, %arg4: memref<16x4xf32, #tpu.memory_space<vmem>>, %arg5: memref<1x4xf32, #tpu.memory_space<vmem>>, %arg6: memref<4x16xf32, #tpu.memory_space<vmem>>, %arg7: memref<1x16xf32, #tpu.memory_space<vmem>>, %arg8: memref<4x16xbf16, #tpu.memory_space<vmem>>, %arg9: memref<4x1xf32, #tpu.memory_space<vmem>>, %arg10: memref<1x4x128xf32, #tpu.memory_space<vmem>>, %arg11: memref<1x4x128xf32, #tpu.memory_space<vmem>>) attributes {dimension_semantics = [#tpu.dimension_semantics<parallel>, #tpu.dimension_semantics<parallel>], iteration_bounds = array<i64: 2, 2>, scalar_prefetch = 0 : i64, scratch_operands = 0 : i64, tpu.core_type = #tpu.core_type<tc>, window_params = [{transform_indices = @transform_0, window_bounds = array<i64: 1, 128, 16>}, {transform_indices = @transform_1, window_bounds = array<i64: 1, 1, 16>}, {pipeline_mode = #tpu.pipeline_mode<synchronous>, transform_indices = @transform_2, window_bounds = array<i64: 16, 4>}, {pipeline_mode = #tpu.pipeline_mode<synchronous>, transform_indices = @transform_3, window_bounds = array<i64: 1, 4>}, {pipeline_mode = #tpu.pipeline_mode<synchronous>, transform_indices = @transform_4, window_bounds = array<i64: 4, 16>}, {pipeline_mode = #tpu.pipeline_mode<synchronous>, transform_indices = @transform_5, window_bounds = array<i64: 1, 16>}, {pipeline_mode = #tpu.pipeline_mode<synchronous>, transform_indices = @transform_6, window_bounds = array<i64: 4, 16>}, {pipeline_mode = #tpu.pipeline_mode<synchronous>, transform_indices = @transform_7, window_bounds = array<i64: 4, 1>}, {transform_indices = @transform_8, window_bounds = array<i64: 1, 4, 128>}, {transform_indices = @transform_9, window_bounds = array<i64: 1, 4, 128>}]} {
    %c0 = arith.constant 0 : index
    %c0_0 = arith.constant 0 : index
    %c0_1 = arith.constant 0 : index
    %0 = vector.load %arg3[%c0, %c0_0, %c0_1] : memref<1x1x16xf32, #tpu.memory_space<vmem>>, vector<1x1x16xf32>
    %1 = vector.shape_cast %0 : vector<1x1x16xf32> to vector<1x16xf32>
    %cst = arith.constant 3.906250e-03 : f32
    %2 = vector.broadcast %cst : f32 to vector<1x16xf32>
    %3 = arith.mulf %1, %2 : vector<1x16xf32>
    %c0_2 = arith.constant 0 : index
    %c0_3 = arith.constant 0 : index
    %4 = vector.load %arg4[%c0_2, %c0_3] : memref<16x4xf32, #tpu.memory_space<vmem>>, vector<16x4xf32>
    %cst_4 = arith.constant dense<0.000000e+00> : vector<1x4xf32>
    %5 = tpu.matmul %3, %4, %cst_4 {dimension_numbers = #tpu.dot_dimension_numbers<[1], [0], [0], [1], [0, 0, 1, 1], [], []>} : vector<1x16xf32>, vector<16x4xf32>, vector<1x4xf32> -> vector<1x4xf32>
    %c0_5 = arith.constant 0 : index
    %c0_6 = arith.constant 0 : index
    %6 = vector.load %arg5[%c0_5, %c0_6] : memref<1x4xf32, #tpu.memory_space<vmem>>, vector<1x4xf32>
    %7 = arith.addf %5, %6 : vector<1x4xf32>
    %cst_7 = arith.constant 0.000000e+00 : f32
    %8 = vector.broadcast %cst_7 : f32 to vector<1x4xf32>
    %9 = arith.maximumf %7, %8 : vector<1x4xf32>
    %c0_8 = arith.constant 0 : index
    %c0_9 = arith.constant 0 : index
    %10 = vector.load %arg6[%c0_8, %c0_9] : memref<4x16xf32, #tpu.memory_space<vmem>>, vector<4x16xf32>
    %cst_10 = arith.constant dense<0.000000e+00> : vector<1x16xf32>
    %11 = tpu.matmul %9, %10, %cst_10 {dimension_numbers = #tpu.dot_dimension_numbers<[1], [0], [0], [1], [0, 0, 1, 1], [], []>} : vector<1x4xf32>, vector<4x16xf32>, vector<1x16xf32> -> vector<1x16xf32>
    %c0_11 = arith.constant 0 : index
    %c0_12 = arith.constant 0 : index
    %12 = vector.load %arg7[%c0_11, %c0_12] : memref<1x16xf32, #tpu.memory_space<vmem>>, vector<1x16xf32>
    %13 = arith.addf %11, %12 : vector<1x16xf32>
    %cst_13 = arith.constant 3.000000e+00 : f32
    %14 = vector.broadcast %cst_13 : f32 to vector<1x16xf32>
    %15 = arith.addf %13, %14 : vector<1x16xf32>
    %cst_14 = arith.constant 0.000000e+00 : f32
    %cst_15 = arith.constant 6.000000e+00 : f32
    %16 = vector.broadcast %cst_14 : f32 to vector<1x16xf32>
    %17 = arith.maximumf %16, %15 : vector<1x16xf32>
    %18 = vector.broadcast %cst_15 : f32 to vector<1x16xf32>
    %19 = arith.minimumf %18, %17 : vector<1x16xf32>
    %cst_16 = arith.constant 0.166666672 : f32
    %20 = vector.broadcast %cst_16 : f32 to vector<1x16xf32>
    %21 = arith.mulf %19, %20 : vector<1x16xf32>
    %c0_17 = arith.constant 0 : index
    %c0_18 = arith.constant 0 : index
    %22 = vector.load %arg8[%c0_17, %c0_18] : memref<4x16xbf16, #tpu.memory_space<vmem>>, vector<4x16xbf16>
    %23 = arith.extf %22 : vector<4x16xbf16> to vector<4x16xf32>
    %24 = vector.broadcast %21 : vector<1x16xf32> to vector<4x16xf32>
    %25 = arith.mulf %23, %24 : vector<4x16xf32>
    %26 = arith.truncf %25 : vector<4x16xf32> to vector<4x16xbf16>
    %c0_19 = arith.constant 0 : index
    %c0_20 = arith.constant 0 : index
    %c0_21 = arith.constant 0 : index
    %27 = vector.load %arg2[%c0_19, %c0_20, %c0_21] : memref<1x128x16xbf16, #tpu.memory_space<vmem>>, vector<1x128x16xbf16>
    %28 = vector.shape_cast %27 : vector<1x128x16xbf16> to vector<128x16xbf16>
    %29 = tpu.transpose %28, [1, 0] : vector<128x16xbf16> -> vector<16x128xbf16>
    %cst_22 = arith.constant dense<0.000000e+00> : vector<4x128xf32>
    %30 = tpu.matmul %26, %29, %cst_22 {dimension_numbers = #tpu.dot_dimension_numbers<[1], [0], [0], [1], [0, 0, 1, 1], [], []>} : vector<4x16xbf16>, vector<16x128xbf16>, vector<4x128xf32> -> vector<4x128xf32>
    %c0_23 = arith.constant 0 : index
    %c0_24 = arith.constant 0 : index
    %31 = vector.load %arg9[%c0_23, %c0_24] : memref<4x1xf32, #tpu.memory_space<vmem>>, vector<4x1xf32>
    %32 = vector.broadcast %31 : vector<4x1xf32> to vector<4x128xf32>
    %33 = arith.addf %30, %32 : vector<4x128xf32>
    %c0_25 = arith.constant 0 : index
    %c0_26 = arith.constant 0 : index
    %c0_27 = arith.constant 0 : index
    %34 = vector.load %arg10[%c0_25, %c0_26, %c0_27] : memref<1x4x128xf32, #tpu.memory_space<vmem>>, vector<1x4x128xf32>
    %35 = vector.shape_cast %34 : vector<1x4x128xf32> to vector<4x128xf32>
    %36 = arith.addf %33, %35 : vector<4x128xf32>
    %c0_28 = arith.constant 0 : index
    %c0_29 = arith.constant 0 : index
    %c0_30 = arith.constant 0 : index
    %37 = vector.load %arg11[%c0_28, %c0_29, %c0_30] : memref<1x4x128xf32, #tpu.memory_space<vmem>>, vector<1x4x128xf32>
    %38 = vector.shape_cast %37 : vector<1x4x128xf32> to vector<4x128xf32>
    %39 = vector.shape_cast %36 : vector<4x128xf32> to vector<1x4x128xf32>
    tpu.vector_store %arg11[%c0_28, %c0_29, %c0_30], %39 {strides = array<i32>} : memref<1x4x128xf32, #tpu.memory_space<vmem>>, vector<1x4x128xf32>,
    return
  }
  func.func @transform_0(%arg0: i32, %arg1: i32) -> (i32, i32, i32) {
    %c0_i32 = arith.constant 0 : i32
    %c0_i32_0 = arith.constant 0 : i32
    return %arg0, %arg1, %c0_i32 : i32, i32, i32
  }
  func.func @transform_1(%arg0: i32, %arg1: i32) -> (i32, i32, i32) {
    %c0_i32 = arith.constant 0 : i32
    %c0_i32_0 = arith.constant 0 : i32
    %c0_i32_1 = arith.constant 0 : i32
    return %arg0, %c0_i32, %c0_i32_0 : i32, i32, i32
  }
  func.func @transform_2(%arg0: i32, %arg1: i32) -> (i32, i32) {
    %c0_i32 = arith.constant 0 : i32
    %c0_i32_0 = arith.constant 0 : i32
    %c0_i32_1 = arith.constant 0 : i32
    return %c0_i32, %c0_i32_0 : i32, i32
  }
  func.func @transform_3(%arg0: i32, %arg1: i32) -> (i32, i32) {
    %c0_i32 = arith.constant 0 : i32
    %c0_i32_0 = arith.constant 0 : i32
    %c0_i32_1 = arith.constant 0 : i32
    return %c0_i32, %c0_i32_0 : i32, i32
  }
  func.func @transform_4(%arg0: i32, %arg1: i32) -> (i32, i32) {
    %c0_i32 = arith.constant 0 : i32
    %c0_i32_0 = arith.constant 0 : i32
    %c0_i32_1 = arith.constant 0 : i32
    return %c0_i32, %c0_i32_0 : i32, i32
  }
  func.func @transform_5(%arg0: i32, %arg1: i32) -> (i32, i32) {
    %c0_i32 = arith.constant 0 : i32
    %c0_i32_0 = arith.constant 0 : i32
    %c0_i32_1 = arith.constant 0 : i32
    return %c0_i32, %c0_i32_0 : i32, i32
  }
  func.func @transform_6(%arg0: i32, %arg1: i32) -> (i32, i32) {
    %c0_i32 = arith.constant 0 : i32
    %c0_i32_0 = arith.constant 0 : i32
    %c0_i32_1 = arith.constant 0 : i32
    return %c0_i32, %c0_i32_0 : i32, i32
  }
  func.func @transform_7(%arg0: i32, %arg1: i32) -> (i32, i32) {
    %c0_i32 = arith.constant 0 : i32
    %c0_i32_0 = arith.constant 0 : i32
    %c0_i32_1 = arith.constant 0 : i32
    return %c0_i32, %c0_i32_0 : i32, i32
  }
  func.func @transform_8(%arg0: i32, %arg1: i32) -> (i32, i32, i32) {
    %c0_i32 = arith.constant 0 : i32
    %c0_i32_0 = arith.constant 0 : i32
    return %arg0, %c0_i32, %arg1 : i32, i32, i32
  }
  func.func @transform_9(%arg0: i32, %arg1: i32) -> (i32, i32, i32) {
    %c0_i32 = arith.constant 0 : i32
    %c0_i32_0 = arith.constant 0 : i32
    return %arg0, %c0_i32, %arg1 : i32, i32, i32
  }
}

</mosaic_0001>

<bundles_post_ra>
// kernel: inverted_residual_block.3
= control target key start
LH: loop header
LB: loop body
LE: loop exit
PB: predicated region body
PF: predicated region fallthrough
CT: control target
= control target key end

     0   :  { %s892_s30 = smov 0   ;;  %s894_s10 = smov 0   ;;  %s1000_s0 = inlined_call_operand.vmem [shape: bf16[2,256,16], index: 0, kind: input, shape index: {}]   ;;  %s1001_s1 = inlined_call_operand.vmem [shape: f32[2,1,16], index: 1, kind: input, shape index: {}]   ;;  %s1002_s2 = inlined_call_operand.vmem [shape: f32[16,4], index: 2, kind: input, shape index: {}]   ;;  %s1003_s3 = inlined_call_operand.vmem [shape: f32[1,4], index: 3, kind: input, shape index: {}]   ;;  %s1004_s4 = inlined_call_operand.vmem [shape: f32[4,16], index: 4, kind: input, shape index: {}]   ;;  %s1005_s5 = inlined_call_operand.vmem [shape: f32[1,16], index: 5, kind: input, shape index: {}]   ;;  %s1006_s6 = inlined_call_operand.vmem [shape: bf16[4,16], index: 6, kind: input, shape index: {}]   ;;  %s1007_s7 = inlined_call_operand.vmem [shape: f32[4,1], index: 7, kind: input, shape index: {}]   ;;  %s1008_s8 = inlined_call_operand.vmem [shape: f32[2,4,256], index: 8, kind: input, shape index: {}]   ;;  %s1009_s9 = inlined_call_operand.vmem [shape: f32[2,4,256], index: 9, kind: output, shape index: {}]  }
   0x1   :  { %s896_s11 = smov 0   ;;  %s898_s12 = smov 0  }
   0x2   :  { %s900_s13 = smov 0  }
   0x3 LB: > { %s28_s14 = sadd.s32 1, %s831_s11  ;;  %s31_s15 = sadd.s32 1, %s835_s12  ;;  %s839_s13 = sphi %s900_s13, %s19_s13   ;;  %s835_s12 = sphi %s898_s12, %s1013_s12   ;;  %s831_s11 = sphi %s896_s11, %s1012_s11   ;;  %s827_s10 = sphi %s894_s10, %s1011_s10   ;;  %s823_s30 = sphi %s892_s30, %s1010_s30  }
   0x4   : > { %p29_p0 = scmp.ge.s32.totalorder %s28_s14, 2  ;;  %p705_p1 = scmp.ge.s32.totalorder %s839_s13, 1 }
   0x5   : > { %p331_p2 = scmp.lt.s32.totalorder %s839_s13, 5 }
   0x6   : > { %s1015_s14 = smov (%p29_p0, %s28_s14), 0  ;;  %s1017_s15 = smov (!%p29_p0, %s31_s15), %s835_s12 }
   0x7   : > { %p332_p3 = pnand %p705_p1, %p331_p2  ;;  %p33_p4 = scmp.ge.s32.totalorder %s1017_s15, 2 }
   0x8   : > { %p386_p5 = scmp.lt.s32.totalorder (!%p332_p3), %s827_s10, 1  ;;  %s706_s23 = sshll.u32 (!%p332_p3), %s823_s30, 4 }
   0x9   : > { %s1019_s15 = smov (%p33_p4, %s1017_s15), 0  ;;  %335 = sbr.rel (%p332_p3) target bundleno = 431 (0x1af), region = 56 }
   0xa   : > { %p388_p6 = scmp.lt.s32.totalorder (!%p332_p3), %s706_s23, 31  ;;  %p400_p7 = scmp.lt.s32.totalorder (!%p332_p3), %s823_s30, 1 }
   0xe   : > { %v417_v0 = vld [vmem:[%s1002_s2 + $0x8] sm:$0xff]  ;;  %v416_v1 = vld [vmem:[%s1002_s2] sm:$0xff]  ;;  %s1021_s10 = smov (!%p386_p5, %s827_s10), 1  ;;  %vm419_vm0 = vcmask 130048   ;;  %s1023_s23 = smov (!%p388_p6, %s706_s23), 31  ;;  %vm450_vm1 = vcmask 1043456  }
   0xf   : > { %437 = vmatpush.msra.mxu0 %v417_v0  ;;  %s397_s22 = scalar_lea.vmem %s1001_s1, %s1021_s10  ;;  %s707_s24 = sshll.u32 %s1021_s10, 5  ;;  %v444_v4 = vld [vmem:[%s1004_s4] sm:$0xf]  ;;  %vm446_vm2 = vcmask 31744   ;;  %v841_v26 = vmov 0  }
  0x10   : > { %v414_v2 = vld [vmem:[%s397_s22] sm:$0x1]  ;;  %s391_s25 = sadd.s32 %s707_s24, %s1023_s23  ;;  %714 = vmatpush.msk.msra.mxu1 %vm450_vm1, %v444_v4  ;;  %800 = vset.pattern.permute.xlu0 %v841_v26  ;;  %s1025_s30 = smov (!%p400_p7, %s823_s30), 1 }
  0x11   : > { %438 = vmatpush.msra.mxu0 %v416_v1  ;;  %v415_v3 = vmul.f32 0.00390625, %v414_v2  ;;  %s708_s26 = sshll.u32 %s391_s25, 2  ;;  %v418_v13 = vld [vmem:[%s1003_s3] sm:$0x1] }
  0x12   : > { %s942_s29 = scalar_lea.vmem %s1000_s0, %s708_s26  ;;  %v499_v25 = vld [vmem:[%s1007_s7] sm:$0xf]  ;;  %s709_s26 = sshll.u32 %s1021_s10, 1 }
  0x13   : > { %713 = vmatmul.msk.f32.vlgmr.msra.gmra.mxu0 %vm419_vm0, %v415_v3  ;;  %v758_v5 = vld [vmem:[%s942_s29 + $0x38] sm:$0xff]  ;;  %v757_v7 = vld [vmem:[%s942_s29 + $0x30] sm:$0xff]  ;;  %v756_v9 = vld [vmem:[%s942_s29 + $0x28] sm:$0xff]  ;;  %502 = vperm.xlu0 %800, %v499_v25   ;;  %s403_s27 = sadd.s32 %s709_s26, %s1025_s30 }
  0x14   : > { %v570_v6 = vsel %vm419_vm0, %v758_v5, 0  ;;  %v567_v8 = vsel %vm419_vm0, %v757_v7, 0  ;;  %v564_v10 = vsel %vm419_vm0, %v756_v9, 0  ;;  %v755_v11 = vld [vmem:[%s942_s29 + $0x20] sm:$0xff]  ;;  %v754_v16 = vld [vmem:[%s942_s29 + $0x18] sm:$0xff]  ;;  %v753_v19 = vld [vmem:[%s942_s29 + $0x10] sm:$0xff] }
  0x15   : > { %572 = vmatpush.bf16.xpose.msra.mxu2 %v570_v6  ;;  %v561_v12 = vsel %vm419_vm0, %v755_v11, 0  ;;  %v558_v18 = vsel %vm419_vm0, %v754_v16, 0  ;;  %v555_v20 = vsel %vm419_vm0, %v753_v19, 0  ;;  %v752_v21 = vld [vmem:[%s942_s29 + $0x8] sm:$0xff]  ;;  %v751_v23 = vld [vmem:[%s942_s29] sm:$0xff]  ;;  %s710_s28 = sshll.u32 %s403_s27, 2 }
  0x16   : > { %v552_v22 = vsel %vm419_vm0, %v752_v21, 0  ;;  %v549_v24 = vsel %vm419_vm0, %v751_v23, 0  ;;  %v445_v27 = vld [vmem:[%s1005_s5] sm:$0x1]  ;;  %s405_s17 = scalar_lea.vmem %s1008_s8, %s710_s28  ;;  %s413_s20 = scalar_lea.vmem %s1009_s9, %s710_s28 }
  0x17   : > { %v478_v32 = vld [vmem:[%s1006_s6] sm:$0x3] }
  0x18   : > { %v479_v35 = vunpack.c.l.bf16 %v478_v32  ;;  %v585_v41 = vld [vmem:[%s405_s17] sm:$0xf] }
  0x1d   : > { %573 = vmatpush.bf16.xpose.msra.mxu2 %v567_v8 }
  0x25   : > { %574 = vmatpush.bf16.xpose.msra.mxu2 %v564_v10 }
  0x2d   : > { %575 = vmatpush.bf16.xpose.msra.mxu2 %v561_v12 }
  0x35   : > { %576 = vmatpush.bf16.xpose.msra.mxu2 %v558_v18 }
  0x3d   : > { %577 = vmatpush.bf16.xpose.msra.mxu2 %v555_v20 }
  0x45   : > { %578 = vmatpush.bf16.xpose.msra.mxu2 %v552_v22 }
  0x4d   : > { %579 = vmatpush.bf16.xpose.msra.mxu2 %v549_v24 }
  0x85   : > { %v503_v39 = vpop.permute.xlu0 %502 }
  0x90   : > { %v440_v14 = vpop.f32.mrf.mxu0 }
  0x91   : > { %v441_v15 = vadd.f32 %v440_v14, %v418_v13 }
  0x93   : > { %v443_v17 = vmax.f32 %v441_v15, 0.0 }
  0x95   : > { %715 = vmatmul.msk.f32.vlgmr.msra.gmra.mxu1 %vm446_vm2, %v443_v17 }
 0x112   : > { %v471_v28 = vpop.f32.mrf.mxu1 }
 0x113   : > { %v472_v29 = vadd.f32 %v471_v28, %v445_v27 }
 0x115   : > { %v474_v30 = vadd.f32 3.0, %v472_v29 }
 0x117   : > { %v475_v31 = vmax.f32 %v474_v30, 0.0 }
 0x119   : > { %v476_v33 = vmin.f32 %v475_v31, 6.0 }
 0x11b   : > { %v477_v34 = vmul.f32 0.16666667, %v476_v33 }
 0x11d   : > { %v480_v36 = vperm.slane %v477_v34, 0 }
 0x11f   : > { %v481_v37 = vmul.f32 %v480_v36, %v479_v35 }
 0x121   : > { %v482_v38 = vpack.c.bf16 %v481_v37, %v481_v37 }
 0x123   : > { %748 = vmatmul.msk.bf16.vlgmr.msra.gmra.mxu2 %vm419_vm0, %v482_v38 }
 0x1a6   : > { %v581_v40 = vpop.f32.mrf.mxu2 }
 0x1a7   : > { %v582_v42 = vadd.f32 %v581_v40, %v503_v39 }
 0x1a9   : > { %v586_v43 = vadd.f32 %v585_v41, %v582_v42 }
 0x1ab   : > { %587 = vst [vmem:[%s413_s20] sm:$0xf] %v586_v43 }
 0x1ae   : > { %v583_v44 = vpop.f32.mrf.mxu2 }
 0x1af PF: > { %s19_s13 = sadd.s32 1, %s839_s13   ;;  %s1010_s30 = smov %s831_s11 }
 0x1b0   : > { %p16_p8 = scmp.ge.s32.totalorder %s19_s13, 6   ;;  %s1011_s10 = smov %s835_s12 }
 0x1b1   : > { %s1012_s11 = smov %s1015_s14  ;;  %s1013_s12 = smov %s1019_s15 }
 0x1b2   :  { %18 = sbr.rel (!%p16_p8) target bundleno = 3 (0x3), region = 92 }

// kernel: inverted_residual_block.2
= control target key start
LH: loop header
LB: loop body
LE: loop exit
PB: predicated region body
PF: predicated region fallthrough
CT: control target
= control target key end

     0   :  { %s4291_s21 = smov 0   ;;  %s7818_s0 = inlined_call_operand.vmem [shape: f32[2,18,18,4], index: 0, kind: input, shape index: {}]   ;;  %s7819_s1 = inlined_call_operand.vmem [shape: f32[4,16], index: 1, kind: input, shape index: {}]   ;;  %s7820_s2 = inlined_call_operand.vmem [shape: f32[1,16], index: 2, kind: input, shape index: {}]   ;;  %s7821_s3 = inlined_call_operand.vmem [shape: f32[9,16], index: 3, kind: input, shape index: {}]   ;;  %s7822_s4 = inlined_call_operand.vmem [shape: f32[1,16], index: 4, kind: input, shape index: {}]   ;;  %s7823_s5 = inlined_call_operand.vmem [shape: bf16[2,16,16,16], index: 5, kind: output, shape index: {0}]   ;;  %s7824_s6 = inlined_call_operand.vmem [shape: f32[2,1,16], index: 6, kind: output, shape index: {1}]  }
   0x1 LB: > { %s4142_s22 = sadd.s32 4294967295, %s4250_s21   ;;  %p4146_p0 = scmp.ge.s32.totalorder %s4250_s21, 1  ;;  %s4250_s21 = sphi %s4291_s21, %s17_s21  }
   0x2   : > { %p215_p1 = scmp.lt.s32.totalorder %s4250_s21, 3 }
   0x4   : > { %p216_p2 = pnand %p4146_p0, %p215_p1 }
   0x6   : > { %219 = sbr.rel (%p216_p2) target bundleno = 1011 (0x3f3), region = 40 }
   0xb   : > { %p248_p3 = scmp.lt.s32.totalorder %s4142_s22, 1  ;;  %v4252_v0 = vmov 0   ;;  %v4253_v58 = vmov 1   ;;  %vm2241_vm2 = vcmask 1046528   ;;  %vm2484_vm3 = vcmask 1045504  }
   0xc   : > { %4168 = vset.pattern.permute.xlu2 %v4252_v0  ;;  %4167 = vset.pattern.permute.xlu1 %v4252_v0  ;;  %vm3990_vm4 = vcmask 130048   ;;  %vm3957_vm5 = vcmask 125952   ;;  %vm4060_vm6 = vcmask 122880  }
   0xd   : > { %4166 = vset.pattern.permute.xlu0 %v4252_v0  ;;  %s8671_s22 = smov (!%p248_p3, %s4142_s22), 1 }
   0xe   : > { %s4153_s23 = smul.u32 432, %s8671_s22  ;;  %s4152_s11 = sshll.u32 %s8671_s22, 7 }
   0xf   : > { %s5757_s14 = scalar_lea.vmem %s7823_s5, %s4152_s11 }
  0x10   : > { %s4305_s26 = scalar_lea.vmem %s7818_s0, %s4153_s23  ;;  %s260_s23 = scalar_lea.vmem %s7824_s6, %s8671_s22 }
  0x11   : > { %v4308_v1 = vld [vmem:[%s4305_s26 + $0x38] sm:$0xff]  ;;  %v4311_v2 = vld [vmem:[%s4305_s26 + $0x28] sm:$0x3]  ;;  %v4320_v4 = vld [vmem:[%s4305_s26 + $0x40] sm:$0x3] }
  0x12   : > { %7969 = vst [vmem:[#allocation2_spill] sm:$0xff] %v4308_v1  ;;  %v4314_v3 = vld [vmem:[%s4305_s26 + $0x18] sm:$0xff]  ;;  %353 = vperm.xlu2 %4168, %v4308_v1   ;;  %343 = vperm.xlu1 %4167, %v4311_v2   ;;  %v4323_v5 = vld [vmem:[%s4305_s26 + $0x30] sm:$0xff]  ;;  %v4326_v6 = vld [vmem:[%s4305_s26 + $0x20] sm:$0xff] }
  0x13   : > { %7970 = vst [vmem:[#allocation3_spill] sm:$0xff] %v4311_v2  ;;  %333 = vperm.xlu0 %4166, %v4314_v3   ;;  %v4332_v7 = vld [vmem:[%s4305_s26 + $0x58] sm:$0x3]  ;;  %v4335_v8 = vld [vmem:[%s4305_s26 + $0x50] sm:$0xff]  ;;  %v4338_v9 = vld [vmem:[%s4305_s26 + $0x48] sm:$0xff] }
  0x14   : > { %7971 = vst [vmem:[#allocation4_spill] sm:$0xff] %v4335_v8  ;;  %v4344_v10 = vld [vmem:[%s4305_s26 + $0x70] sm:$0x3]  ;;  %v4347_v11 = vld [vmem:[%s4305_s26 + $0x68] sm:$0xff]  ;;  %v4350_v12 = vld [vmem:[%s4305_s26 + $0x60] sm:$0xff] }
  0x15   : > { %7972 = vst [vmem:[#allocation5_spill] sm:$0xff] %v4347_v11  ;;  %v4356_v13 = vld [vmem:[%s4305_s26 + $0x88] sm:$0x3]  ;;  %v4359_v14 = vld [vmem:[%s4305_s26 + $0x80] sm:$0xff]  ;;  %v4362_v15 = vld [vmem:[%s4305_s26 + $0x78] sm:$0xff] }
  0x16   : > { %7973 = vst [vmem:[#allocation6_spill] sm:$0xff] %v4359_v14  ;;  %v4368_v16 = vld [vmem:[%s4305_s26 + $0xa0] sm:$0x3]  ;;  %v4371_v17 = vld [vmem:[%s4305_s26 + $0x98] sm:$0xff]  ;;  %v4374_v18 = vld [vmem:[%s4305_s26 + $0x90] sm:$0xff] }
  0x17   : > { %7974 = vst [vmem:[#allocation7_spill] sm:$0xff] %v4371_v17  ;;  %v4380_v19 = vld [vmem:[%s4305_s26 + $0xb8] sm:$0x3]  ;;  %v4383_v20 = vld [vmem:[%s4305_s26 + $0xb0] sm:$0xff]  ;;  %v4386_v21 = vld [vmem:[%s4305_s26 + $0xa8] sm:$0xff] }
  0x18   : > { %7975 = vst [vmem:[#allocation8_spill] sm:$0xff] %v4383_v20  ;;  %v4392_v22 = vld [vmem:[%s4305_s26 + $0xd0] sm:$0x3]  ;;  %v4395_v23 = vld [vmem:[%s4305_s26 + $0xc8] sm:$0xff]  ;;  %v4398_v24 = vld [vmem:[%s4305_s26 + $0xc0] sm:$0xff] }
  0x19   : > { %7976 = vst [vmem:[#allocation9_spill] sm:$0xff] %v4392_v22  ;;  %v4404_v25 = vld [vmem:[%s4305_s26 + $0xe8] sm:$0x3]  ;;  %v4407_v26 = vld [vmem:[%s4305_s26 + $0xe0] sm:$0xff]  ;;  %v4410_v27 = vld [vmem:[%s4305_s26 + $0xd8] sm:$0xff] }
  0x1a   : > { %358 = vperm.xlu2 %4168, %v4320_v4   ;;  %348 = vperm.xlu1 %4167, %v4323_v5   ;;  %7977 = vst [vmem:[#allocation10_spill] sm:$0xff] %v4395_v23  ;;  %v4416_v28 = vld [vmem:[%s4305_s26 + $0x100] sm:$0x3]  ;;  %v4419_v29 = vld [vmem:[%s4305_s26 + $0xf8] sm:$0xff]  ;;  %v4422_v30 = vld [vmem:[%s4305_s26 + $0xf0] sm:$0xff] }
  0x1b   : > { %338 = vperm.xlu0 %4166, %v4326_v6   ;;  %7978 = vst [vmem:[#allocation11_spill] sm:$0xff] %v4404_v25  ;;  %v4428_v31 = vld [vmem:[%s4305_s26 + $0x118] sm:$0x3]  ;;  %v4431_v32 = vld [vmem:[%s4305_s26 + $0x110] sm:$0xff]  ;;  %v4434_v33 = vld [vmem:[%s4305_s26 + $0x108] sm:$0xff] }
  0x1c   : > { %7979 = vst [vmem:[#allocation12_spill] sm:$0xff] %v4407_v26  ;;  %v4440_v34 = vld [vmem:[%s4305_s26 + $0x130] sm:$0x3]  ;;  %v4443_v35 = vld [vmem:[%s4305_s26 + $0x128] sm:$0xff]  ;;  %v4446_v36 = vld [vmem:[%s4305_s26 + $0x120] sm:$0xff] }
  0x1d   : > { %7980 = vst [vmem:[#allocation13_spill] sm:$0xff] %v4422_v30  ;;  %v4454_v38 = vld [vmem:[%s4305_s26 + $0x148] sm:$0x3]  ;;  %v4457_v39 = vld [vmem:[%s4305_s26 + $0x140] sm:$0xff]  ;;  %v4460_v40 = vld [vmem:[%s4305_s26 + $0x138] sm:$0xff] }
  0x1e   : > { %7981 = vst [vmem:[#allocation14_spill] sm:$0xff] %v4434_v33  ;;  %v4468_v42 = vld [vmem:[%s4305_s26 + $0x160] sm:$0x3]  ;;  %v4471_v43 = vld [vmem:[%s4305_s26 + $0x158] sm:$0xff]  ;;  %v4474_v44 = vld [vmem:[%s4305_s26 + $0x150] sm:$0xff] }
  0x1f   : > { %7982 = vst [vmem:[#allocation15_spill] sm:$0xff] %v4446_v36  ;;  %v4482_v46 = vld [vmem:[%s4305_s26 + $0x178] sm:$0x3]  ;;  %v4485_v47 = vld [vmem:[%s4305_s26 + $0x170] sm:$0xff]  ;;  %v4488_v48 = vld [vmem:[%s4305_s26 + $0x168] sm:$0xff] }
  0x20   : > { %7985 = vst [vmem:[#allocation18_spill] sm:$0xff] %v4482_v46  ;;  %v4500_v52 = vld [vmem:[%s4305_s26 + $0x190] sm:$0x3]  ;;  %v4503_v53 = vld [vmem:[%s4305_s26 + $0x188] sm:$0xff]  ;;  %v4506_v54 = vld [vmem:[%s4305_s26 + $0x180] sm:$0xff] }
  0x21   : > { %7988 = vst [vmem:[#allocation21_spill] sm:$0xff] %v4500_v52 }
  0x22   : > { %373 = vperm.xlu2 %4168, %v4332_v7   ;;  %368 = vperm.xlu1 %4167, %v4335_v8  }
  0x23   : > { %363 = vperm.xlu0 %4166, %v4338_v9  }
  0x2a   : > { %388 = vperm.xlu2 %4168, %v4344_v10   ;;  %383 = vperm.xlu1 %4167, %v4347_v11  }
  0x2b   : > { %378 = vperm.xlu0 %4166, %v4350_v12  }
  0x32   : > { %403 = vperm.xlu2 %4168, %v4356_v13   ;;  %398 = vperm.xlu1 %4167, %v4359_v14  }
  0x33   : > { %393 = vperm.xlu0 %4166, %v4362_v15  }
  0x3a   : > { %418 = vperm.xlu2 %4168, %v4368_v16   ;;  %413 = vperm.xlu1 %4167, %v4371_v17  }
  0x3b   : > { %408 = vperm.xlu0 %4166, %v4374_v18  }
  0x42   : > { %433 = vperm.xlu2 %4168, %v4380_v19   ;;  %428 = vperm.xlu1 %4167, %v4383_v20  }
  0x43   : > { %423 = vperm.xlu0 %4166, %v4386_v21  }
  0x4a   : > { %448 = vperm.xlu2 %4168, %v4392_v22   ;;  %443 = vperm.xlu1 %4167, %v4395_v23  }
  0x4b   : > { %438 = vperm.xlu0 %4166, %v4398_v24  }
  0x52   : > { %463 = vperm.xlu2 %4168, %v4404_v25   ;;  %458 = vperm.xlu1 %4167, %v4407_v26  }
  0x53   : > { %453 = vperm.xlu0 %4166, %v4410_v27  }
  0x5a   : > { %478 = vperm.xlu2 %4168, %v4416_v28   ;;  %473 = vperm.xlu1 %4167, %v4419_v29  }
  0x5b   : > { %468 = vperm.xlu0 %4166, %v4422_v30  }
  0x62   : > { %493 = vperm.xlu2 %4168, %v4428_v31   ;;  %488 = vperm.xlu1 %4167, %v4431_v32  }
  0x63   : > { %483 = vperm.xlu0 %4166, %v4434_v33  }
  0x6a   : > { %508 = vperm.xlu2 %4168, %v4440_v34   ;;  %503 = vperm.xlu1 %4167, %v4443_v35  }
  0x6b   : > { %498 = vperm.xlu0 %4166, %v4446_v36  }
  0x6c   : > { %v4451_v37 = vpop.permute.xlu2 %353 }
  0x72   : > { %523 = vperm.xlu2 %4168, %v4454_v38   ;;  %518 = vperm.xlu1 %4167, %v4457_v39  }
  0x73   : > { %513 = vperm.xlu0 %4166, %v4460_v40  }
  0x74   : > { %v4465_v41 = vpop.permute.xlu2 %358 }
  0x75   : > { %7983 = vst [vmem:[#allocation16_spill] sm:$0xff] %v4465_v41 }
  0x7a   : > { %538 = vperm.xlu2 %4168, %v4468_v42   ;;  %533 = vperm.xlu1 %4167, %v4471_v43  }
  0x7b   : > { %528 = vperm.xlu0 %4166, %v4474_v44  }
  0x7c   : > { %v4479_v45 = vpop.permute.xlu2 %373 }
  0x7d   : > { %7984 = vst [vmem:[#allocation17_spill] sm:$0xff] %v4479_v45 }
  0x82   : > { %553 = vperm.xlu2 %4168, %v4482_v46   ;;  %548 = vperm.xlu1 %4167, %v4485_v47  }
  0x83   : > { %543 = vperm.xlu0 %4166, %v4488_v48  }
  0x84   : > { %v4493_v49 = vpop.permute.xlu2 %388  ;;  %v4495_v50 = vpop.permute.xlu1 %343 }
  0x85   : > { %7986 = vst [vmem:[#allocation19_spill] sm:$0xff] %v4493_v49  ;;  %v4497_v51 = vpop.permute.xlu0 %333 }
  0x86   : > { %7987 = vst [vmem:[#allocation20_spill] sm:$0xff] %v4495_v50 }
  0x8a   : > { %568 = vperm.xlu2 %4168, %v4500_v52   ;;  %563 = vperm.xlu1 %4167, %v4503_v53  }
  0x8b   : > { %558 = vperm.xlu0 %4166, %v4506_v54  }
  0x8c   : > { %v4511_v55 = vpop.permute.xlu2 %403  ;;  %v4513_v56 = vpop.permute.xlu1 %348 }
  0x8d   : > { %7989 = vst [vmem:[#allocation22_spill] sm:$0xff] %v4511_v55  ;;  %v4515_v57 = vpop.permute.xlu0 %338 }
  0x8e   : > { %7990 = vst [vmem:[#allocation23_spill] sm:$0xff] %v4513_v56 }
  0x92   : > { %4171 = vset.pattern.permute.xlu2 %v4253_v58  ;;  %4170 = vset.pattern.permute.xlu1 %v4253_v58 }
  0x93   : > { %4169 = vset.pattern.permute.xlu0 %v4253_v58  ;;  %717 = vperm.xlu2 %4171, %v4311_v2  }
  0x94   : > { %713 = vperm.xlu1 %4170, %v4326_v6   ;;  %709 = vperm.xlu0 %4169, %v4314_v3   ;;  %v4520_v59 = vpop.permute.xlu2 %418  ;;  %v4522_v60 = vpop.permute.xlu1 %368 }
  0x95   : > { %7991 = vst [vmem:[#allocation24_spill] sm:$0xff] %v4520_v59  ;;  %v4524_v61 = vpop.permute.xlu0 %363 }
  0x96   : > { %7992 = vst [vmem:[#allocation25_spill] sm:$0xff] %v4522_v60 }
  0x9b   : > { %725 = vperm.xlu2 %4171, %v4308_v1  }
  0x9c   : > { %721 = vperm.xlu1 %4170, %v4323_v5   ;;  %729 = vperm.xlu0 %4169, %v4320_v4   ;;  %v4529_v62 = vpop.permute.xlu2 %433  ;;  %v4531_v63 = vpop.permute.xlu1 %383 }
  0x9d   : > { %7993 = vst [vmem:[#allocation26_spill] sm:$0xff] %v4529_v62  ;;  %v4533_v0 = vpop.permute.xlu0 %378 }
  0x9e   : > { %7994 = vst [vmem:[#allocation27_spill] sm:$0xff] %v4531_v63 }
  0x9f   : > { %7995 = vst [vmem:[#allocation28_spill] sm:$0xff] %v4533_v0  ;;  %v4254_v0 = vmov 2  }
  0xa3   : > { %737 = vperm.xlu2 %4171, %v4335_v8  }
  0xa4   : > { %733 = vperm.xlu1 %4170, %v4338_v9   ;;  %741 = vperm.xlu0 %4169, %v4332_v7   ;;  %v4538_v58 = vpop.permute.xlu2 %448  ;;  %v4540_v59 = vpop.permute.xlu1 %398 }
  0xa5   : > { %7996 = vst [vmem:[#allocation29_spill] sm:$0xff] %v4538_v58  ;;  %v4542_v55 = vpop.permute.xlu0 %393 }
  0xa6   : > { %7997 = vst [vmem:[#allocation30_spill] sm:$0xff] %v4540_v59 }
  0xa7   : > { %7998 = vst [vmem:[#allocation31_spill] sm:$0xff] %v4542_v55 }
  0xab   : > { %749 = vperm.xlu2 %4171, %v4347_v11  }
  0xac   : > { %745 = vperm.xlu1 %4170, %v4350_v12   ;;  %753 = vperm.xlu0 %4169, %v4344_v10   ;;  %v4547_v62 = vpop.permute.xlu2 %463  ;;  %v4549_v49 = vpop.permute.xlu1 %413 }
  0xad   : > { %7999 = vst [vmem:[#allocation32_spill] sm:$0xff] %v4547_v62  ;;  %v4551_v45 = vpop.permute.xlu0 %408 }
  0xae   : > { %8000 = vst [vmem:[#allocation33_spill] sm:$0xff] %v4549_v49 }
  0xaf   : > { %8001 = vst [vmem:[#allocation34_spill] sm:$0xff] %v4551_v45 }
  0xb3   : > { %761 = vperm.xlu2 %4171, %v4359_v14  }
  0xb4   : > { %757 = vperm.xlu1 %4170, %v4362_v15   ;;  %765 = vperm.xlu0 %4169, %v4356_v13   ;;  %v4556_v58 = vpop.permute.xlu2 %478  ;;  %v4558_v59 = vpop.permute.xlu1 %428 }
  0xb5   : > { %8002 = vst [vmem:[#allocation35_spill] sm:$0xff] %v4556_v58  ;;  %v4560_v63 = vpop.permute.xlu0 %423 }
  0xb6   : > { %8003 = vst [vmem:[#allocation36_spill] sm:$0xff] %v4558_v59 }
  0xb7   : > { %8004 = vst [vmem:[#allocation37_spill] sm:$0xff] %v4560_v63 }
  0xbb   : > { %773 = vperm.xlu2 %4171, %v4371_v17  }
  0xbc   : > { %769 = vperm.xlu1 %4170, %v4374_v18   ;;  %777 = vperm.xlu0 %4169, %v4368_v16   ;;  %v4565_v62 = vpop.permute.xlu2 %493  ;;  %v4567_v49 = vpop.permute.xlu1 %443 }
  0xbd   : > { %8005 = vst [vmem:[#allocation38_spill] sm:$0xff] %v4565_v62  ;;  %v4569_v45 = vpop.permute.xlu0 %438 }
  0xbe   : > { %8006 = vst [vmem:[#allocation39_spill] sm:$0xff] %v4567_v49 }
  0xbf   : > { %8007 = vst [vmem:[#allocation40_spill] sm:$0xff] %v4569_v45 }
  0xc3   : > { %785 = vperm.xlu2 %4171, %v4383_v20  }
  0xc4   : > { %781 = vperm.xlu1 %4170, %v4386_v21   ;;  %789 = vperm.xlu0 %4169, %v4380_v19   ;;  %v4574_v58 = vpop.permute.xlu2 %508  ;;  %v4576_v59 = vpop.permute.xlu1 %458 }
  0xc5   : > { %8008 = vst [vmem:[#allocation41_spill] sm:$0xff] %v4574_v58  ;;  %v4578_v63 = vpop.permute.xlu0 %453 }
  0xc6   : > { %8009 = vst [vmem:[#allocation42_spill] sm:$0xff] %v4576_v59 }
  0xc7   : > { %8010 = vst [vmem:[#allocation43_spill] sm:$0xff] %v4578_v63 }
  0xcb   : > { %797 = vperm.xlu2 %4171, %v4395_v23  }
  0xcc   : > { %793 = vperm.xlu1 %4170, %v4398_v24   ;;  %801 = vperm.xlu0 %4169, %v4392_v22   ;;  %v4583_v62 = vpop.permute.xlu2 %523  ;;  %v4585_v49 = vpop.permute.xlu1 %473 }
  0xcd   : > { %8011 = vst [vmem:[#allocation44_spill] sm:$0xff] %v4583_v62  ;;  %v4587_v45 = vpop.permute.xlu0 %468 }
  0xce   : > { %8012 = vst [vmem:[#allocation45_spill] sm:$0xff] %v4585_v49 }
  0xcf   : > { %8013 = vst [vmem:[#allocation46_spill] sm:$0xff] %v4587_v45 }
  0xd3   : > { %809 = vperm.xlu2 %4171, %v4407_v26  }
  0xd4   : > { %805 = vperm.xlu1 %4170, %v4410_v27   ;;  %813 = vperm.xlu0 %4169, %v4404_v25   ;;  %v4592_v58 = vpop.permute.xlu2 %538  ;;  %v4594_v59 = vpop.permute.xlu1 %488 }
  0xd5   : > { %8014 = vst [vmem:[#allocation47_spill] sm:$0xff] %v4592_v58  ;;  %v4596_v63 = vpop.permute.xlu0 %483 }
  0xd6   : > { %8015 = vst [vmem:[#allocation48_spill] sm:$0xff] %v4594_v59 }
  0xd7   : > { %8016 = vst [vmem:[#allocation49_spill] sm:$0xff] %v4596_v63 }
  0xdb   : > { %821 = vperm.xlu2 %4171, %v4419_v29  }
  0xdc   : > { %817 = vperm.xlu1 %4170, %v4422_v30   ;;  %825 = vperm.xlu0 %4169, %v4416_v28   ;;  %v4601_v62 = vpop.permute.xlu2 %553  ;;  %v4603_v49 = vpop.permute.xlu1 %503 }
  0xdd   : > { %8017 = vst [vmem:[#allocation50_spill] sm:$0xff] %v4601_v62  ;;  %v4605_v45 = vpop.permute.xlu0 %498 }
  0xde   : > { %8018 = vst [vmem:[#allocation51_spill] sm:$0xff] %v4603_v49 }
  0xdf   : > { %8019 = vst [vmem:[#allocation52_spill] sm:$0xff] %v4605_v45 }
  0xe3   : > { %833 = vperm.xlu2 %4171, %v4431_v32  }
  0xe4   : > { %829 = vperm.xlu1 %4170, %v4434_v33   ;;  %837 = vperm.xlu0 %4169, %v4428_v31   ;;  %v4610_v58 = vpop.permute.xlu2 %568  ;;  %v4612_v59 = vpop.permute.xlu1 %518 }
  0xe5   : > { %8020 = vst [vmem:[#allocation53_spill] sm:$0xff] %v4610_v58  ;;  %v4614_v63 = vpop.permute.xlu0 %513 }
  0xe6   : > { %8021 = vst [vmem:[#allocation54_spill] sm:$0xff] %v4612_v59 }
  0xe7   : > { %8022 = vst [vmem:[#allocation55_spill] sm:$0xff] %v4614_v63 }
  0xeb   : > { %845 = vperm.xlu2 %4171, %v4443_v35  }
  0xec   : > { %841 = vperm.xlu1 %4170, %v4446_v36   ;;  %849 = vperm.xlu0 %4169, %v4440_v34   ;;  %v4619_v62 = vpop.permute.xlu1 %533 }
  0xed   : > { %8023 = vst [vmem:[#allocation56_spill] sm:$0xff] %v4619_v62  ;;  %v4621_v49 = vpop.permute.xlu0 %528  ;;  %v4623_v45 = vpop.permute.xlu2 %717 }
  0xf3   : > { %857 = vperm.xlu2 %4171, %v4457_v39  }
  0xf4   : > { %853 = vperm.xlu1 %4170, %v4460_v40   ;;  %861 = vperm.xlu0 %4169, %v4454_v38   ;;  %v4628_v58 = vpop.permute.xlu1 %548 }
  0xf5   : > { %8024 = vst [vmem:[#allocation57_spill] sm:$0xff] %v4628_v58  ;;  %v4630_v59 = vpop.permute.xlu0 %543  ;;  %v4632_v63 = vpop.permute.xlu2 %725 }
  0xfb   : > { %869 = vperm.xlu2 %4171, %v4471_v43  }
  0xfc   : > { %865 = vperm.xlu1 %4170, %v4474_v44   ;;  %873 = vperm.xlu0 %4169, %v4468_v42   ;;  %v4637_v62 = vpop.permute.xlu1 %563 }
  0xfd   : > { %8025 = vst [vmem:[#allocation58_spill] sm:$0xff] %v4637_v62  ;;  %v4639_v41 = vpop.permute.xlu0 %558  ;;  %v4641_v60 = vpop.permute.xlu2 %737 }
  0xfe   : > { %8026 = vst [vmem:[#allocation59_spill] sm:$0xff] %v4641_v60 }
 0x103   : > { %881 = vperm.xlu2 %4171, %v4485_v47  }
 0x104   : > { %877 = vperm.xlu1 %4170, %v4488_v48   ;;  %885 = vperm.xlu0 %4169, %v4482_v46  }
 0x105   : > { %v4646_v58 = vpop.permute.xlu2 %749 }
 0x106   : > { %8027 = vst [vmem:[#allocation60_spill] sm:$0xff] %v4646_v58  ;;  %v4648_v55 = vpop.permute.xlu1 %713  ;;  %v4650_v56 = vpop.permute.xlu0 %709 }
 0x10b   : > { %893 = vperm.xlu2 %4171, %v4503_v53  }
 0x10c   : > { %889 = vperm.xlu1 %4170, %v4506_v54   ;;  %897 = vperm.xlu0 %4169, %v4500_v52  }
 0x10d   : > { %v4655_v62 = vpop.permute.xlu2 %761 }
 0x10e   : > { %8028 = vst [vmem:[#allocation61_spill] sm:$0xff] %v4655_v62  ;;  %v4657_v60 = vpop.permute.xlu1 %721  ;;  %v4659_v50 = vpop.permute.xlu0 %729 }
 0x10f   : > { %8029 = vst [vmem:[#allocation62_spill] sm:$0xff] %v4659_v50 }
 0x113   : > { %4173 = vset.pattern.permute.xlu2 %v4254_v0 }
 0x114   : > { %4172 = vset.pattern.permute.xlu1 %v4254_v0  ;;  %4174 = vset.pattern.permute.xlu0 %v4254_v0 }
 0x115   : > { %1039 = vperm.xlu2 %4173, %v4326_v6   ;;  %1035 = vperm.xlu1 %4172, %v4314_v3   ;;  %v4663_v58 = vpop.permute.xlu2 %773 }
 0x116   : > { %8030 = vst [vmem:[#allocation63_spill] sm:$0xff] %v4663_v58  ;;  %1043 = vperm.xlu0 %4174, %v4311_v2   ;;  %v4666_v46 = vpop.permute.xlu1 %733  ;;  %v4668_v52 = vpop.permute.xlu0 %741 }
 0x11d   : > { %1051 = vperm.xlu2 %4173, %v4308_v1   ;;  %1047 = vperm.xlu1 %4172, %v4323_v5   ;;  %v4672_v62 = vpop.permute.xlu2 %785 }
 0x11e   : > { %8031 = vst [vmem:[#allocation64_spill] sm:$0xff] %v4672_v62  ;;  %1063 = vperm.xlu0 %4174, %v4335_v8   ;;  %v4675_v0 = vpop.permute.xlu1 %745  ;;  %v4677_v50 = vpop.permute.xlu0 %753 }
 0x11f   : > { %8032 = vst [vmem:[#allocation65_spill] sm:$0xff] %v4677_v50 }
 0x125   : > { %1059 = vperm.xlu2 %4173, %v4338_v9   ;;  %1055 = vperm.xlu1 %4172, %v4320_v4   ;;  %v4681_v58 = vpop.permute.xlu2 %797 }
 0x126   : > { %8033 = vst [vmem:[#allocation66_spill] sm:$0xff] %v4681_v58  ;;  %1075 = vperm.xlu0 %4174, %v4347_v11   ;;  %v4684_v2 = vpop.permute.xlu1 %757  ;;  %v4686_v1 = vpop.permute.xlu0 %765 }
 0x127   : > { %8034 = vst [vmem:[#allocation67_spill] sm:$0xff] %v4686_v1 }
 0x12d   : > { %1071 = vperm.xlu2 %4173, %v4350_v12   ;;  %1067 = vperm.xlu1 %4172, %v4332_v7   ;;  %v4690_v8 = vpop.permute.xlu2 %809 }
 0x12e   : > { %8035 = vst [vmem:[#allocation68_spill] sm:$0xff] %v4690_v8  ;;  %1087 = vperm.xlu0 %4174, %v4359_v14   ;;  %v4693_v62 = vpop.permute.xlu1 %769  ;;  %v4695_v50 = vpop.permute.xlu0 %777 }
 0x12f   : > { %8036 = vst [vmem:[#allocation69_spill] sm:$0xff] %v4695_v50 }
 0x135   : > { %1083 = vperm.xlu2 %4173, %v4362_v15   ;;  %1079 = vperm.xlu1 %4172, %v4344_v10   ;;  %v4699_v11 = vpop.permute.xlu2 %821 }
 0x136   : > { %8037 = vst [vmem:[#allocation70_spill] sm:$0xff] %v4699_v11  ;;  %1099 = vperm.xlu0 %4174, %v4371_v17   ;;  %v4702_v58 = vpop.permute.xlu1 %781  ;;  %v4704_v1 = vpop.permute.xlu0 %789 }
 0x137   : > { %8038 = vst [vmem:[#allocation71_spill] sm:$0xff] %v4704_v1 }
 0x13d   : > { %1095 = vperm.xlu2 %4173, %v4374_v18   ;;  %1091 = vperm.xlu1 %4172, %v4356_v13   ;;  %v4708_v14 = vpop.permute.xlu2 %833 }
 0x13e   : > { %8039 = vst [vmem:[#allocation72_spill] sm:$0xff] %v4708_v14  ;;  %1111 = vperm.xlu0 %4174, %v4383_v20   ;;  %v4711_v8 = vpop.permute.xlu1 %793  ;;  %v4713_v50 = vpop.permute.xlu0 %801 }
 0x13f   : > { %8040 = vst [vmem:[#allocation73_spill] sm:$0xff] %v4713_v50 }
 0x145   : > { %1107 = vperm.xlu2 %4173, %v4386_v21   ;;  %1103 = vperm.xlu1 %4172, %v4368_v16   ;;  %v4717_v17 = vpop.permute.xlu2 %845 }
 0x146   : > { %8041 = vst [vmem:[#allocation74_spill] sm:$0xff] %v4717_v17  ;;  %1123 = vperm.xlu0 %4174, %v4395_v23   ;;  %v4720_v11 = vpop.permute.xlu1 %805  ;;  %v4722_v1 = vpop.permute.xlu0 %813 }
 0x147   : > { %8042 = vst [vmem:[#allocation75_spill] sm:$0xff] %v4722_v1 }
 0x14d   : > { %1119 = vperm.xlu2 %4173, %v4398_v24   ;;  %1115 = vperm.xlu1 %4172, %v4380_v19   ;;  %v4726_v20 = vpop.permute.xlu2 %857 }
 0x14e   : > { %8043 = vst [vmem:[#allocation76_spill] sm:$0xff] %v4726_v20  ;;  %1135 = vperm.xlu0 %4174, %v4407_v26   ;;  %v4729_v14 = vpop.permute.xlu1 %817  ;;  %v4731_v50 = vpop.permute.xlu0 %825 }
 0x14f   : > { %8044 = vst [vmem:[#allocation77_spill] sm:$0xff] %v4731_v50 }
 0x155   : > { %1131 = vperm.xlu2 %4173, %v4410_v27   ;;  %1127 = vperm.xlu1 %4172, %v4392_v22   ;;  %v4735_v23 = vpop.permute.xlu2 %869 }
 0x156   : > { %8045 = vst [vmem:[#allocation78_spill] sm:$0xff] %v4735_v23  ;;  %1147 = vperm.xlu0 %4174, %v4419_v29   ;;  %v4738_v17 = vpop.permute.xlu1 %829  ;;  %v4740_v1 = vpop.permute.xlu0 %837 }
 0x157   : > { %8046 = vst [vmem:[#allocation79_spill] sm:$0xff] %v4740_v1 }
 0x15d   : > { %1143 = vperm.xlu2 %4173, %v4422_v30   ;;  %1139 = vperm.xlu1 %4172, %v4404_v25   ;;  %v4744_v26 = vpop.permute.xlu2 %881 }
 0x15e   : > { %8047 = vst [vmem:[#allocation80_spill] sm:$0xff] %v4744_v26  ;;  %1159 = vperm.xlu0 %4174, %v4431_v32   ;;  %v4747_v20 = vpop.permute.xlu1 %841  ;;  %v4749_v50 = vpop.permute.xlu0 %849  ;;  %v4763_v32 = vld [vmem:[%s7819_s1 + $0x1] ss:$0 sm:$0xff]  ;;  %v4768_v26 = vld [vmem:[%s7819_s1] ss:$0 sm:$0xff] }
 0x15f   : > { %8048 = vst [vmem:[#allocation81_spill] sm:$0xff] %v4749_v50 }
 0x165   : > { %1155 = vperm.xlu2 %4173, %v4434_v33   ;;  %1151 = vperm.xlu1 %4172, %v4416_v28   ;;  %v4753_v29 = vpop.permute.xlu2 %893  ;;  %v917_v28 = vmul.f32 %v4763_v32, %v4648_v55  ;;  %v629_v55 = vmul.f32 %v4768_v26, %v4621_v49 }
 0x166   : > { %8049 = vst [vmem:[#allocation82_spill] sm:$0xff] %v4753_v29  ;;  %1171 = vperm.xlu0 %4174, %v4443_v35   ;;  %v4756_v23 = vpop.permute.xlu1 %853  ;;  %v4758_v1 = vpop.permute.xlu0 %861  ;;  %v4775_v35 = vld [vmem:[%s7819_s1 + $0x2] ss:$0 sm:$0xff]  ;;  %v591_v29 = vmul.f32 %v4768_v26, %v4515_v57  ;;  %v920_v57 = vmul.f32 %v4763_v32, %v4632_v63 }
 0x167   : > { %8050 = vst [vmem:[#allocation83_spill] sm:$0xff] %v4758_v1 }
 0x168   : > { %v971_v22 = vadd.f32 %v917_v28, %v591_v29 }
 0x16d   : > { %1167 = vperm.xlu2 %4173, %v4446_v36   ;;  %1163 = vperm.xlu1 %4172, %v4428_v31  }
 0x16e   : > { %1183 = vperm.xlu0 %4174, %v4457_v39   ;;  %v866_v1 = vpop.permute.xlu1 %865  ;;  %v4782_v50 = vpop.permute.xlu0 %873  ;;  %v594_v39 = vmul.f32 %v4768_v26, %v4451_v37  ;;  %v922_v37 = vmul.f32 %v4763_v32, %v4666_v46 }
 0x16f   : > { %v955_v25 = vmul.f32 %v4763_v32, %v866_v1  ;;  %v1040_v33 = vpop.permute.xlu2 %1039 }
 0x170   : > { %v1243_v30 = vmul.f32 %v4775_v35, %v1040_v33  ;;  %v974_v33 = vadd.f32 %v920_v57, %v594_v39 }
 0x171   : > { %v4788_v36 = vadd.f32 %v955_v25, %v629_v55  ;;  %v632_v25 = vmul.f32 %v4768_v26, %v4630_v59  ;;  %v635_v55 = vmul.f32 %v4768_v26, %v4639_v41  ;;  %v590_v41 = vmul.f32 %v4768_v26, %v4497_v51 }
 0x172   : > { %v4790_v31 = vadd.f32 %v1243_v30, %v971_v22 }
 0x175   : > { %1179 = vperm.xlu2 %4173, %v4460_v40   ;;  %1175 = vperm.xlu1 %4172, %v4440_v34  }
 0x176   : > { %1195 = vperm.xlu0 %4174, %v4471_v43   ;;  %v878_v1 = vpop.permute.xlu1 %877  ;;  %v4799_v49 = vpop.permute.xlu0 %885  ;;  %v596_v43 = vmul.f32 %v4768_v26, %v4524_v61  ;;  %v916_v61 = vmul.f32 %v4763_v32, %v4650_v56 }
 0x177   : > { %v958_v22 = vmul.f32 %v4763_v32, %v878_v1  ;;  %v1052_v30 = vpop.permute.xlu2 %1051 }
 0x178   : > { %v1246_v63 = vmul.f32 %v4775_v35, %v1052_v30  ;;  %v976_v1 = vadd.f32 %v922_v37, %v596_v43  ;;  %v970_v37 = vadd.f32 %v916_v61, %v590_v41 }
 0x179   : > { %v4805_v29 = vadd.f32 %v958_v22, %v632_v25  ;;  %v918_v25 = vmul.f32 %v4763_v32, %v4623_v45  ;;  %v8051_v22 = vld [vmem:[#allocation28_spill] sm:$0xff] }
 0x17a   : > { %v4807_v34 = vadd.f32 %v1246_v63, %v974_v33  ;;  %v599_v30 = vmul.f32 %v4768_v26, %v8051_v22  ;;  %v8052_v33 = vld [vmem:[#allocation20_spill] sm:$0xff]  ;;  %v8056_v22 = vld [vmem:[#allocation31_spill] sm:$0xff] }
 0x17b   : > { %v592_v56 = vmul.f32 %v4768_v26, %v8052_v33  ;;  %v4255_v33 = vmov 3  }
 0x17d   : > { %1191 = vperm.xlu2 %4173, %v4474_v44   ;;  %1187 = vperm.xlu1 %4172, %v4454_v38  }
 0x17e   : > { %1207 = vperm.xlu0 %4174, %v4485_v47   ;;  %v890_v59 = vpop.permute.xlu1 %889  ;;  %v4816_v28 = vpop.permute.xlu0 %897  ;;  %v925_v47 = vmul.f32 %v4763_v32, %v4675_v0 }
 0x17f   : > { %v961_v57 = vmul.f32 %v4763_v32, %v890_v59  ;;  %v1060_v39 = vpop.permute.xlu2 %1059  ;;  %v972_v59 = vadd.f32 %v918_v25, %v592_v56  ;;  %v8055_v25 = vld [vmem:[#allocation23_spill] sm:$0xff]  ;;  %v8057_v56 = vld [vmem:[#allocation25_spill] sm:$0xff] }
 0x180   : > { %v1248_v46 = vmul.f32 %v4775_v35, %v1060_v39  ;;  %v979_v43 = vadd.f32 %v925_v47, %v599_v30  ;;  %v919_v39 = vmul.f32 %v4763_v32, %v4657_v60  ;;  %v8054_v47 = vld [vmem:[#allocation18_spill] sm:$0xff]  ;;  %v593_v41 = vmul.f32 %v4768_v26, %v8055_v25 }
 0x181   : > { %v4822_v44 = vadd.f32 %v961_v57, %v635_v55  ;;  %v602_v30 = vmul.f32 %v4768_v26, %v8056_v22  ;;  %v597_v60 = vmul.f32 %v4768_v26, %v8057_v56 }
 0x182   : > { %v4824_v38 = vadd.f32 %v1248_v46, %v976_v1  ;;  %v928_v1 = vmul.f32 %v4763_v32, %v4684_v2  ;;  %v8053_v46 = vld [vmem:[#allocation59_spill] sm:$0xff] }
 0x183   : > { %v923_v61 = vmul.f32 %v4763_v32, %v8053_v46 }
 0x185   : > { %1203 = vperm.xlu2 %4173, %v4488_v48   ;;  %1199 = vperm.xlu1 %4172, %v4468_v42  }
 0x186   : > { %1219 = vperm.xlu0 %4174, %v4503_v53  }
 0x187   : > { %v1072_v63 = vpop.permute.xlu2 %1071  ;;  %v1036_v0 = vpop.permute.xlu1 %1035 }
 0x188   : > { %v1251_v45 = vmul.f32 %v4775_v35, %v1072_v63  ;;  %v1242_v48 = vmul.f32 %v4775_v35, %v1036_v0  ;;  %v1044_v42 = vpop.permute.xlu0 %1043  ;;  %v973_v0 = vadd.f32 %v919_v39, %v593_v41  ;;  %v931_v39 = vmul.f32 %v4763_v32, %v4693_v62  ;;  %v8060_v41 = vld [vmem:[#allocation21_spill] sm:$0xff] }
 0x189   : > { %v1244_v51 = vmul.f32 %v4775_v35, %v1044_v42 }
 0x18a   : > { %v4844_v55 = vadd.f32 %v1251_v45, %v979_v43  ;;  %v4846_v57 = vadd.f32 %v1242_v48, %v970_v37  ;;  %v982_v37 = vadd.f32 %v928_v1, %v602_v30  ;;  %v977_v48 = vadd.f32 %v923_v61, %v597_v60  ;;  %v8059_v1 = vld [vmem:[#allocation60_spill] sm:$0xff]  ;;  %v8062_v30 = vld [vmem:[#allocation34_spill] sm:$0xff]  ;;  %v8063_v60 = vld [vmem:[#allocation27_spill] sm:$0xff] }
 0x18b   : > { %v4848_v53 = vadd.f32 %v1244_v51, %v972_v59  ;;  %v926_v25 = vmul.f32 %v4763_v32, %v8059_v1  ;;  %v8061_v61 = vld [vmem:[#allocation16_spill] sm:$0xff]  ;;  %v605_v56 = vmul.f32 %v4768_v26, %v8062_v30 }
 0x18c   : > { %v595_v22 = vmul.f32 %v4768_v26, %v8061_v61  ;;  %v8066_v61 = vld [vmem:[#allocation17_spill] sm:$0xff] }
 0x18d   : > { %1215 = vperm.xlu2 %4173, %v4506_v54   ;;  %1211 = vperm.xlu1 %4172, %v8054_v47   ;;  %v8058_v47 = vld [vmem:[#allocation62_spill] sm:$0xff] }
 0x18e   : > { %4176 = vset.pattern.permute.xlu0 %v4255_v33 }
 0x18f   : > { %1365 = vperm.xlu0 %4176, %v4326_v6   ;;  %v1084_v2 = vpop.permute.xlu2 %1083  ;;  %v1048_v63 = vpop.permute.xlu1 %1047  ;;  %v921_v6 = vmul.f32 %v4763_v32, %v8058_v47 }
 0x190   : > { %v1254_v54 = vmul.f32 %v4775_v35, %v1084_v2  ;;  %v1245_v43 = vmul.f32 %v4775_v35, %v1048_v63  ;;  %v1064_v45 = vpop.permute.xlu0 %1063  ;;  %v600_v2 = vmul.f32 %v4768_v26, %v8063_v60  ;;  %v8069_v60 = vld [vmem:[#allocation30_spill] sm:$0xff] }
 0x191   : > { %v1249_v42 = vmul.f32 %v4775_v35, %v1064_v45 }
 0x192   : > { %v4868_v59 = vadd.f32 %v1254_v54, %v982_v37  ;;  %v4870_v51 = vadd.f32 %v1245_v43, %v973_v0  ;;  %v975_v0 = vadd.f32 %v921_v6, %v595_v22  ;;  %v985_v37 = vadd.f32 %v931_v39, %v605_v56  ;;  %v8065_v39 = vld [vmem:[#allocation61_spill] sm:$0xff]  ;;  %v8068_v56 = vld [vmem:[#allocation3_spill] sm:$0xff] }
 0x193   : > { %v4872_v46 = vadd.f32 %v1249_v42, %v977_v48  ;;  %v980_v48 = vadd.f32 %v926_v25, %v600_v2  ;;  %v934_v6 = vmul.f32 %v4763_v32, %v4702_v58  ;;  %v598_v25 = vmul.f32 %v4768_v26, %v8066_v61  ;;  %v8067_v22 = vld [vmem:[#allocation37_spill] sm:$0xff]  ;;  %v8074_v61 = vld [vmem:[#allocation19_spill] sm:$0xff] }
 0x194   : > { %v608_v30 = vmul.f32 %v4768_v26, %v8067_v22 }
 0x195   : > { %4175 = vset.pattern.permute.xlu2 %v4255_v33  ;;  %1223 = vperm.xlu1 %4172, %v8060_v41   ;;  %v929_v41 = vmul.f32 %v4763_v32, %v8065_v39 }
 0x196   : > { %1361 = vperm.xlu2 %4175, %v4314_v3  }
 0x197   : > { %1385 = vperm.xlu0 %4176, %v4338_v9   ;;  %v1096_v62 = vpop.permute.xlu2 %1095  ;;  %v1056_v63 = vpop.permute.xlu1 %1055  ;;  %v924_v9 = vmul.f32 %v4763_v32, %v4668_v52  ;;  %v603_v52 = vmul.f32 %v4768_v26, %v8069_v60 }
 0x198   : > { %v1257_v54 = vmul.f32 %v4775_v35, %v1096_v62  ;;  %v1247_v43 = vmul.f32 %v4775_v35, %v1056_v63  ;;  %v1076_v45 = vpop.permute.xlu0 %1075  ;;  %v988_v63 = vadd.f32 %v934_v6, %v608_v30  ;;  %v8073_v6 = vld [vmem:[#allocation63_spill] sm:$0xff]  ;;  %v8076_v30 = vld [vmem:[#allocation2_spill] sm:$0xff] }
 0x199   : > { %v1252_v42 = vmul.f32 %v4775_v35, %v1076_v45  ;;  %v978_v62 = vadd.f32 %v924_v9, %v598_v25  ;;  %v937_v9 = vmul.f32 %v4763_v32, %v4711_v8  ;;  %v932_v39 = vmul.f32 %v4763_v32, %v8073_v6  ;;  %v8075_v25 = vld [vmem:[#allocation40_spill] sm:$0xff] }
 0x19a   : > { %v4892_v47 = vadd.f32 %v1257_v54, %v985_v37  ;;  %v4894_v3 = vadd.f32 %v1247_v43, %v975_v0  ;;  %v983_v54 = vadd.f32 %v929_v41, %v603_v52  ;;  %v601_v41 = vmul.f32 %v4768_v26, %v8074_v61  ;;  %v8082_v61 = vld [vmem:[#allocation22_spill] sm:$0xff] }
 0x19b   : > { %v4896_v1 = vadd.f32 %v1252_v42, %v980_v48  ;;  %v8072_v42 = vld [vmem:[#allocation65_spill] sm:$0xff]  ;;  %v611_v22 = vmul.f32 %v4768_v26, %v8075_v25 }
 0x19d   : > { %8064 = vst [vmem:[#allocation28_spill] sm:$0xff] %v4896_v1  ;;  %4177 = vset.pattern.permute.xlu1 %v4255_v33 }
 0x19e   : > { %1373 = vperm.xlu2 %4175, %v4323_v5   ;;  %1369 = vperm.xlu1 %4177, %v8068_v56   ;;  %v8077_v56 = vld [vmem:[#allocation33_spill] sm:$0xff] }
 0x19f   : > { %1397 = vperm.xlu0 %4176, %v4350_v12   ;;  %v1108_v58 = vpop.permute.xlu2 %1107  ;;  %v1068_v2 = vpop.permute.xlu1 %1067  ;;  %v927_v12 = vmul.f32 %v4763_v32, %v8072_v42  ;;  %v606_v60 = vmul.f32 %v4768_v26, %v8077_v56  ;;  %v8080_v42 = vld [vmem:[#allocation67_spill] sm:$0xff] }
 0x1a0   : > { %v1260_v33 = vmul.f32 %v4775_v35, %v1108_v58  ;;  %v1250_v0 = vmul.f32 %v4775_v35, %v1068_v2  ;;  %v1088_v37 = vpop.permute.xlu0 %1087  ;;  %v991_v2 = vadd.f32 %v937_v9, %v611_v22  ;;  %v8081_v9 = vld [vmem:[#allocation64_spill] sm:$0xff] }
 0x1a1   : > { %v1255_v43 = vmul.f32 %v4775_v35, %v1088_v37  ;;  %v981_v58 = vadd.f32 %v927_v12, %v601_v41  ;;  %v940_v12 = vmul.f32 %v4763_v32, %v4720_v11  ;;  %v935_v6 = vmul.f32 %v4763_v32, %v8081_v9  ;;  %v8083_v41 = vld [vmem:[#allocation43_spill] sm:$0xff]  ;;  %v8084_v22 = vld [vmem:[#allocation4_spill] sm:$0xff] }
 0x1a2   : > { %v4916_v5 = vadd.f32 %v1260_v33, %v988_v63  ;;  %v4918_v45 = vadd.f32 %v1250_v0, %v978_v62  ;;  %v986_v0 = vadd.f32 %v932_v39, %v606_v60  ;;  %v604_v39 = vmul.f32 %v4768_v26, %v8082_v61  ;;  %v8090_v61 = vld [vmem:[#allocation24_spill] sm:$0xff] }
 0x1a3   : > { %v4920_v48 = vadd.f32 %v1255_v43, %v983_v54  ;;  %v614_v25 = vmul.f32 %v4768_v26, %v8083_v41 }
 0x1a4   : > { %8070 = vst [vmem:[#allocation20_spill] sm:$0xff] %v4916_v5 }
 0x1a5   : > { %8071 = vst [vmem:[#allocation59_spill] sm:$0xff] %v4920_v48 }
 0x1a6   : > { %1381 = vperm.xlu2 %4175, %v4320_v4   ;;  %1377 = vperm.xlu1 %4177, %v8076_v30   ;;  %v8085_v30 = vld [vmem:[#allocation36_spill] sm:$0xff] }
 0x1a7   : > { %1409 = vperm.xlu0 %4176, %v4362_v15   ;;  %v1120_v52 = vpop.permute.xlu2 %1119  ;;  %v1080_v8 = vpop.permute.xlu1 %1079  ;;  %v930_v15 = vmul.f32 %v4763_v32, %v8080_v42  ;;  %v609_v56 = vmul.f32 %v4768_v26, %v8085_v30  ;;  %v8088_v42 = vld [vmem:[#allocation69_spill] sm:$0xff] }
 0x1a8   : > { %v1263_v62 = vmul.f32 %v4775_v35, %v1120_v52  ;;  %v1253_v63 = vmul.f32 %v4775_v35, %v1080_v8  ;;  %v1100_v33 = vpop.permute.xlu0 %1099  ;;  %v994_v8 = vadd.f32 %v940_v12, %v614_v25  ;;  %v8089_v12 = vld [vmem:[#allocation66_spill] sm:$0xff]  ;;  %v8092_v25 = vld [vmem:[#allocation5_spill] sm:$0xff] }
 0x1a9   : > { %v1258_v37 = vmul.f32 %v4775_v35, %v1100_v33  ;;  %v984_v52 = vadd.f32 %v930_v15, %v604_v39  ;;  %v943_v15 = vmul.f32 %v4763_v32, %v4729_v14  ;;  %v938_v9 = vmul.f32 %v4763_v32, %v8089_v12  ;;  %v8091_v39 = vld [vmem:[#allocation46_spill] sm:$0xff] }
 0x1aa   : > { %v4940_v4 = vadd.f32 %v1263_v62, %v991_v2  ;;  %v4942_v54 = vadd.f32 %v1253_v63, %v981_v58  ;;  %v989_v63 = vadd.f32 %v935_v6, %v609_v56  ;;  %v607_v6 = vmul.f32 %v4768_v26, %v8090_v61  ;;  %v8098_v61 = vld [vmem:[#allocation26_spill] sm:$0xff] }
 0x1ab   : > { %v4944_v43 = vadd.f32 %v1258_v37, %v986_v0  ;;  %v617_v41 = vmul.f32 %v4768_v26, %v8091_v39 }
 0x1ac   : > { %8078 = vst [vmem:[#allocation18_spill] sm:$0xff] %v4940_v4 }
 0x1ad   : > { %8079 = vst [vmem:[#allocation23_spill] sm:$0xff] %v4944_v43 }
 0x1ae   : > { %1393 = vperm.xlu2 %4175, %v4332_v7   ;;  %1389 = vperm.xlu1 %4177, %v8084_v22   ;;  %v8093_v22 = vld [vmem:[#allocation39_spill] sm:$0xff] }
 0x1af   : > { %1421 = vperm.xlu0 %4176, %v4374_v18   ;;  %v1132_v60 = vpop.permute.xlu2 %1131  ;;  %v1092_v11 = vpop.permute.xlu1 %1091  ;;  %v933_v18 = vmul.f32 %v4763_v32, %v8088_v42  ;;  %v612_v30 = vmul.f32 %v4768_v26, %v8093_v22  ;;  %v8096_v42 = vld [vmem:[#allocation71_spill] sm:$0xff] }
 0x1b0   : > { %v1266_v58 = vmul.f32 %v4775_v35, %v1132_v60  ;;  %v1256_v2 = vmul.f32 %v4775_v35, %v1092_v11  ;;  %v1112_v62 = vpop.permute.xlu0 %1111  ;;  %v997_v11 = vadd.f32 %v943_v15, %v617_v41  ;;  %v8097_v15 = vld [vmem:[#allocation68_spill] sm:$0xff]  ;;  %v8100_v41 = vld [vmem:[#allocation6_spill] sm:$0xff] }
 0x1b1   : > { %v1261_v33 = vmul.f32 %v4775_v35, %v1112_v62  ;;  %v987_v60 = vadd.f32 %v933_v18, %v607_v6  ;;  %v946_v18 = vmul.f32 %v4763_v32, %v4738_v17  ;;  %v941_v12 = vmul.f32 %v4763_v32, %v8097_v15  ;;  %v8099_v6 = vld [vmem:[#allocation49_spill] sm:$0xff] }
 0x1b2   : > { %v4964_v7 = vadd.f32 %v1266_v58, %v994_v8  ;;  %v4966_v0 = vadd.f32 %v1256_v2, %v984_v52  ;;  %v992_v2 = vadd.f32 %v938_v9, %v612_v30  ;;  %v610_v9 = vmul.f32 %v4768_v26, %v8098_v61  ;;  %v8107_v61 = vld [vmem:[#allocation29_spill] sm:$0xff] }
 0x1b3   : > { %v4968_v37 = vadd.f32 %v1261_v33, %v989_v63  ;;  %v620_v39 = vmul.f32 %v4768_v26, %v8099_v6 }
 0x1b4   : > { %8086 = vst [vmem:[#allocation31_spill] sm:$0xff] %v4964_v7 }
 0x1b5   : > { %8087 = vst [vmem:[#allocation25_spill] sm:$0xff] %v4968_v37 }
 0x1b6   : > { %1405 = vperm.xlu2 %4175, %v4344_v10   ;;  %1401 = vperm.xlu1 %4177, %v8092_v25   ;;  %v8101_v25 = vld [vmem:[#allocation42_spill] sm:$0xff] }
 0x1b7   : > { %1433 = vperm.xlu0 %4176, %v4386_v21   ;;  %v1144_v56 = vpop.permute.xlu2 %1143  ;;  %v1104_v14 = vpop.permute.xlu1 %1103  ;;  %v936_v21 = vmul.f32 %v4763_v32, %v8096_v42  ;;  %v615_v22 = vmul.f32 %v4768_v26, %v8101_v25  ;;  %v8105_v42 = vld [vmem:[#allocation73_spill] sm:$0xff] }
 0x1b8   : > { %v1269_v52 = vmul.f32 %v4775_v35, %v1144_v56  ;;  %v1259_v8 = vmul.f32 %v4775_v35, %v1104_v14  ;;  %v1124_v58 = vpop.permute.xlu0 %1123  ;;  %v1000_v14 = vadd.f32 %v946_v18, %v620_v39  ;;  %v8106_v18 = vld [vmem:[#allocation70_spill] sm:$0xff]  ;;  %v8109_v39 = vld [vmem:[#allocation7_spill] sm:$0xff] }
 0x1b9   : > { %v1264_v62 = vmul.f32 %v4775_v35, %v1124_v58  ;;  %v990_v56 = vadd.f32 %v936_v21, %v610_v9  ;;  %v949_v21 = vmul.f32 %v4763_v32, %v4747_v20  ;;  %v944_v15 = vmul.f32 %v4763_v32, %v8106_v18  ;;  %v8108_v9 = vld [vmem:[#allocation52_spill] sm:$0xff] }
 0x1ba   : > { %v4988_v10 = vadd.f32 %v1269_v52, %v997_v11  ;;  %v4990_v63 = vadd.f32 %v1259_v8, %v987_v60  ;;  %v995_v8 = vadd.f32 %v941_v12, %v615_v22  ;;  %v613_v12 = vmul.f32 %v4768_v26, %v8107_v61  ;;  %v8116_v61 = vld [vmem:[#allocation32_spill] sm:$0xff] }
 0x1bb   : > { %v4992_v33 = vadd.f32 %v1264_v62, %v992_v2  ;;  %v623_v6 = vmul.f32 %v4768_v26, %v8108_v9 }
 0x1bc   : > { %8094 = vst [vmem:[#allocation62_spill] sm:$0xff] %v4988_v10 }
 0x1bd   : > { %8095 = vst [vmem:[#allocation60_spill] sm:$0xff] %v4992_v33 }
 0x1be   : > { %1417 = vperm.xlu2 %4175, %v4356_v13   ;;  %1413 = vperm.xlu1 %4177, %v8100_v41   ;;  %v8110_v41 = vld [vmem:[#allocation45_spill] sm:$0xff] }
 0x1bf   : > { %1445 = vperm.xlu0 %4176, %v4398_v24   ;;  %v1156_v30 = vpop.permute.xlu2 %1155  ;;  %v1116_v17 = vpop.permute.xlu1 %1115  ;;  %v939_v24 = vmul.f32 %v4763_v32, %v8105_v42  ;;  %v618_v25 = vmul.f32 %v4768_v26, %v8110_v41  ;;  %v8114_v42 = vld [vmem:[#allocation75_spill] sm:$0xff] }
 0x1c0   : > { %v1272_v60 = vmul.f32 %v4775_v35, %v1156_v30  ;;  %v1262_v11 = vmul.f32 %v4775_v35, %v1116_v17  ;;  %v1136_v52 = vpop.permute.xlu0 %1135  ;;  %v1003_v17 = vadd.f32 %v949_v21, %v623_v6  ;;  %v8115_v21 = vld [vmem:[#allocation72_spill] sm:$0xff] }
 0x1c1   : > { %v1267_v58 = vmul.f32 %v4775_v35, %v1136_v52  ;;  %v993_v30 = vadd.f32 %v939_v24, %v613_v12  ;;  %v952_v24 = vmul.f32 %v4763_v32, %v4756_v23  ;;  %v947_v18 = vmul.f32 %v4763_v32, %v8115_v21  ;;  %v8117_v12 = vld [vmem:[#allocation55_spill] sm:$0xff]  ;;  %v8118_v6 = vld [vmem:[#allocation8_spill] sm:$0xff]  ;;  %v8124_v21 = vld [vmem:[#allocation77_spill] sm:$0xff] }
 0x1c2   : > { %v5012_v13 = vadd.f32 %v1272_v60, %v1000_v14  ;;  %v5014_v2 = vadd.f32 %v1262_v11, %v990_v56  ;;  %v998_v11 = vadd.f32 %v944_v15, %v618_v25  ;;  %v616_v15 = vmul.f32 %v4768_v26, %v8116_v61  ;;  %v8120_v25 = vld [vmem:[#allocation13_spill] sm:$0xff] }
 0x1c3   : > { %v5016_v62 = vadd.f32 %v1267_v58, %v995_v8  ;;  %v626_v9 = vmul.f32 %v4768_v26, %v8117_v12  ;;  %v945_v61 = vmul.f32 %v4763_v32, %v8124_v21  ;;  %v8125_v12 = vld [vmem:[#allocation74_spill] sm:$0xff] }
 0x1c4   : > { %8102 = vst [vmem:[#allocation21_spill] sm:$0xff] %v5012_v13 }
 0x1c5   : > { %8103 = vst [vmem:[#allocation16_spill] sm:$0xff] %v5014_v2 }
 0x1c6   : > { %8104 = vst [vmem:[#allocation34_spill] sm:$0xff] %v5016_v62  ;;  %1429 = vperm.xlu2 %4175, %v4368_v16   ;;  %1425 = vperm.xlu1 %4177, %v8109_v39   ;;  %v8119_v39 = vld [vmem:[#allocation48_spill] sm:$0xff] }
 0x1c7   : > { %1457 = vperm.xlu0 %4176, %v4410_v27   ;;  %v1168_v22 = vpop.permute.xlu2 %1167  ;;  %v1128_v20 = vpop.permute.xlu1 %1127  ;;  %v942_v27 = vmul.f32 %v4763_v32, %v8114_v42  ;;  %v621_v41 = vmul.f32 %v4768_v26, %v8119_v39 }
 0x1c8   : > { %v1275_v56 = vmul.f32 %v4775_v35, %v1168_v22  ;;  %v1265_v14 = vmul.f32 %v4775_v35, %v1128_v20  ;;  %v1148_v60 = vpop.permute.xlu0 %1147 }
 0x1c9   : > { %v1270_v52 = vmul.f32 %v4775_v35, %v1148_v60  ;;  %v996_v20 = vadd.f32 %v942_v27, %v616_v15  ;;  %v1001_v60 = vadd.f32 %v947_v18, %v621_v41  ;;  %v950_v27 = vmul.f32 %v4763_v32, %v8125_v12  ;;  %v8128_v18 = vld [vmem:[#allocation10_spill] sm:$0xff]  ;;  %v8134_v12 = vld [vmem:[#allocation79_spill] sm:$0xff] }
 0x1ca   : > { %v5036_v16 = vadd.f32 %v1275_v56, %v1003_v17  ;;  %v5038_v8 = vadd.f32 %v1265_v14, %v993_v30  ;;  %v1006_v30 = vadd.f32 %v952_v24, %v626_v9  ;;  %v8126_v24 = vld [vmem:[#allocation35_spill] sm:$0xff]  ;;  %v8127_v9 = vld [vmem:[#allocation9_spill] sm:$0xff]  ;;  %v8130_v41 = vld [vmem:[#allocation14_spill] sm:$0xff] }
 0x1cb   : > { %v5040_v58 = vadd.f32 %v1270_v52, %v998_v11  ;;  %v619_v15 = vmul.f32 %v4768_v26, %v8126_v24  ;;  %v948_v24 = vmul.f32 %v4763_v32, %v8134_v12 }
 0x1cc   : > { %8111 = vst [vmem:[#allocation27_spill] sm:$0xff] %v5036_v16 }
 0x1cd   : > { %8112 = vst [vmem:[#allocation61_spill] sm:$0xff] %v5038_v8 }
 0x1ce   : > { %8113 = vst [vmem:[#allocation17_spill] sm:$0xff] %v5040_v58  ;;  %1441 = vperm.xlu2 %4175, %v4380_v19   ;;  %1437 = vperm.xlu1 %4177, %v8118_v6   ;;  %v8129_v6 = vld [vmem:[#allocation51_spill] sm:$0xff] }
 0x1cf   : > { %1469 = vperm.xlu0 %4176, %v8120_v25   ;;  %v1180_v22 = vpop.permute.xlu2 %1179  ;;  %v1140_v23 = vpop.permute.xlu1 %1139  ;;  %v624_v39 = vmul.f32 %v4768_v26, %v8129_v6  ;;  %v8137_v6 = vld [vmem:[#allocation11_spill] sm:$0xff] }
 0x1d0   : > { %v1278_v17 = vmul.f32 %v4775_v35, %v1180_v22  ;;  %v1268_v56 = vmul.f32 %v4775_v35, %v1140_v23  ;;  %v1160_v14 = vpop.permute.xlu0 %1159  ;;  %v999_v23 = vadd.f32 %v945_v61, %v619_v15  ;;  %v8136_v15 = vld [vmem:[#allocation38_spill] sm:$0xff] }
 0x1d1   : > { %v1273_v11 = vmul.f32 %v4775_v35, %v1160_v14 }
 0x1d2   : > { %v5060_v19 = vadd.f32 %v1278_v17, %v1006_v30  ;;  %v5062_v52 = vadd.f32 %v1268_v56, %v996_v20  ;;  %v1004_v56 = vadd.f32 %v950_v27, %v624_v39  ;;  %v8138_v27 = vld [vmem:[#allocation12_spill] sm:$0xff]  ;;  %v8139_v39 = vld [vmem:[#allocation54_spill] sm:$0xff] }
 0x1d3   : > { %v5064_v42 = vadd.f32 %v1273_v11, %v1001_v60 }
 0x1d4   : > { %8121 = vst [vmem:[#allocation37_spill] sm:$0xff] %v5060_v19  ;;  %v4206_v19 = vld [vmem:[%s4305_s26 + $0x178] sm:$0x3] }
 0x1d5   : > { %8122 = vst [vmem:[#allocation3_spill] sm:$0xff] %v5062_v52 }
 0x1d6   : > { %8123 = vst [vmem:[#allocation30_spill] sm:$0xff] %v5064_v42  ;;  %1453 = vperm.xlu2 %4175, %v8127_v9   ;;  %1449 = vperm.xlu1 %4177, %v8128_v18   ;;  %v8135_v9 = vld [vmem:[#allocation76_spill] sm:$0xff]  ;;  %v622_v18 = vmul.f32 %v4768_v26, %v8136_v15 }
 0x1d7   : > { %1481 = vperm.xlu0 %4176, %v8130_v41   ;;  %v1192_v25 = vpop.permute.xlu2 %1191  ;;  %v1152_v22 = vpop.permute.xlu1 %1151  ;;  %v953_v61 = vmul.f32 %v4763_v32, %v8135_v9  ;;  %v8140_v41 = vld [vmem:[#allocation15_spill] sm:$0xff] }
 0x1d8   : > { %v1281_v20 = vmul.f32 %v4775_v35, %v1192_v25  ;;  %v1271_v30 = vmul.f32 %v4775_v35, %v1152_v22  ;;  %v1172_v17 = vpop.permute.xlu0 %1171 }
 0x1d9   : > { %v1276_v14 = vmul.f32 %v4775_v35, %v1172_v17 }
 0x1da   : > { %v5081_v60 = vadd.f32 %v1281_v20, %v4788_v36  ;;  %v5083_v11 = vadd.f32 %v1271_v30, %v999_v23  ;;  %v627_v36 = vmul.f32 %v4768_v26, %v8139_v39  ;;  %v1002_v23 = vadd.f32 %v948_v24, %v622_v18  ;;  %v8145_v39 = vld [vmem:[#allocation78_spill] sm:$0xff]  ;;  %v8146_v18 = vld [vmem:[#allocation41_spill] sm:$0xff] }
 0x1db   : > { %v5085_v21 = vadd.f32 %v1276_v14, %v1004_v56  ;;  %v956_v24 = vmul.f32 %v4763_v32, %v8145_v39 }
 0x1dc   : > { %8131 = vst [vmem:[#allocation65_spill] sm:$0xff] %v5081_v60  ;;  %v1007_v56 = vadd.f32 %v953_v61, %v627_v36  ;;  %v4194_v61 = vld [vmem:[%s4305_s26 + $0xf8] sm:$0xff]  ;;  %v8147_v36 = vld [vmem:[#allocation56_spill] sm:$0xff] }
 0x1dd   : > { %8132 = vst [vmem:[#allocation63_spill] sm:$0xff] %v5083_v11 }
 0x1de   : > { %8133 = vst [vmem:[#allocation19_spill] sm:$0xff] %v5085_v21  ;;  %1465 = vperm.xlu2 %4175, %v8137_v6   ;;  %1461 = vperm.xlu1 %4177, %v8138_v27   ;;  %v8144_v6 = vld [vmem:[#allocation81_spill] sm:$0xff] }
 0x1df   : > { %1493 = vperm.xlu0 %4176, %v8140_v41   ;;  %v1204_v25 = vpop.permute.xlu2 %1203  ;;  %v1164_v22 = vpop.permute.xlu1 %1163  ;;  %v951_v27 = vmul.f32 %v4763_v32, %v8144_v6  ;;  %v625_v41 = vmul.f32 %v4768_v26, %v8146_v18 }
 0x1e0   : > { %v1284_v20 = vmul.f32 %v4775_v35, %v1204_v25  ;;  %v1274_v30 = vmul.f32 %v4775_v35, %v1164_v22  ;;  %v1184_v17 = vpop.permute.xlu0 %1183  ;;  %v4193_v25 = vld [vmem:[%s4305_s26 + $0x100] sm:$0x3] }
 0x1e1   : > { %v1279_v14 = vmul.f32 %v4775_v35, %v1184_v17 }
 0x1e2   : > { %v5102_v12 = vadd.f32 %v1284_v20, %v4805_v29  ;;  %v5104_v9 = vadd.f32 %v1274_v30, %v1002_v23  ;;  %v630_v29 = vmul.f32 %v4768_v26, %v8147_v36  ;;  %v1005_v20 = vadd.f32 %v951_v27, %v625_v41  ;;  %v8152_v27 = vld [vmem:[#allocation80_spill] sm:$0xff]  ;;  %v5136_v36 = vld [vmem:[%s7819_s1 + $0x3] ss:$0 sm:$0xff] }
 0x1e3   : > { %v5106_v15 = vadd.f32 %v1279_v14, %v1007_v56  ;;  %v959_v41 = vmul.f32 %v4763_v32, %v8152_v27 }
 0x1e4   : > { %8141 = vst [vmem:[#allocation40_spill] sm:$0xff] %v5102_v12  ;;  %v1010_v14 = vadd.f32 %v956_v24, %v630_v29  ;;  %v8153_v24 = vld [vmem:[#allocation44_spill] sm:$0xff] }
 0x1e5   : > { %8142 = vst [vmem:[#allocation2_spill] sm:$0xff] %v5104_v9  ;;  %v628_v29 = vmul.f32 %v4768_v26, %v8153_v24 }
 0x1e6   : > { %8143 = vst [vmem:[#allocation33_spill] sm:$0xff] %v5106_v15  ;;  %1477 = vperm.xlu2 %4175, %v4193_v25   ;;  %1473 = vperm.xlu1 %4177, %v4194_v61   ;;  %v8151_v25 = vld [vmem:[#allocation83_spill] sm:$0xff] }
 0x1e7   : > { %1505 = vperm.xlu0 %4176, %v4460_v40   ;;  %v1216_v22 = vpop.permute.xlu2 %1215  ;;  %v1176_v23 = vpop.permute.xlu1 %1175  ;;  %v954_v61 = vmul.f32 %v4763_v32, %v8151_v25 }
 0x1e8   : > { %v1287_v30 = vmul.f32 %v4775_v35, %v1216_v22  ;;  %v1277_v17 = vmul.f32 %v4775_v35, %v1176_v23  ;;  %v1196_v56 = vpop.permute.xlu0 %1195  ;;  %v4196_v22 = vld [vmem:[%s4305_s26 + $0x110] sm:$0xff]  ;;  %v8154_v23 = vld [vmem:[#allocation57_spill] sm:$0xff] }
 0x1e9   : > { %v1282_v6 = vmul.f32 %v4775_v35, %v1196_v56  ;;  %v1008_v56 = vadd.f32 %v954_v61, %v628_v29  ;;  %v957_v29 = vmul.f32 %v4763_v32, %v4782_v50 }
 0x1ea   : > { %v5123_v39 = vadd.f32 %v1287_v30, %v4822_v44  ;;  %v5125_v18 = vadd.f32 %v1277_v17, %v1005_v20  ;;  %v4195_v44 = vld [vmem:[%s4305_s26 + $0x118] sm:$0x3]  ;;  %v633_v20 = vmul.f32 %v4768_v26, %v8154_v23  ;;  %v4197_v30 = vld [vmem:[%s4305_s26 + $0x150] sm:$0xff] }
 0x1eb   : > { %v5127_v40 = vadd.f32 %v1282_v6, %v1010_v14 }
 0x1ec   : > { %8148 = vst [vmem:[#allocation67_spill] sm:$0xff] %v5123_v39  ;;  %v1013_v27 = vadd.f32 %v959_v41, %v633_v20  ;;  %v8157_v41 = vld [vmem:[#allocation82_spill] sm:$0xff]  ;;  %v4198_v39 = vld [vmem:[%s4305_s26 + $0x130] sm:$0x3] }
 0x1ed   : > { %8149 = vst [vmem:[#allocation64_spill] sm:$0xff] %v5125_v18  ;;  %v962_v20 = vmul.f32 %v4763_v32, %v8157_v41 }
 0x1ee   : > { %8150 = vst [vmem:[#allocation22_spill] sm:$0xff] %v5127_v40  ;;  %1489 = vperm.xlu2 %4175, %v4195_v44   ;;  %1485 = vperm.xlu1 %4177, %v4196_v22   ;;  %v5150_v44 = vld [vmem:[%s7820_s2] ss:$0 sm:$0xff] }
 0x1ef   : > { %1517 = vperm.xlu0 %4176, %v4197_v30   ;;  %v1188_v17 = vpop.permute.xlu1 %1187 }
 0x1f0   : > { %v1280_v14 = vmul.f32 %v4775_v35, %v1188_v17  ;;  %v1208_v6 = vpop.permute.xlu0 %1207  ;;  %v1362_v25 = vpop.permute.xlu2 %1361 }
 0x1f1   : > { %v1285_v24 = vmul.f32 %v4775_v35, %v1208_v6  ;;  %v1568_v22 = vmul.f32 %v5136_v36, %v1362_v25  ;;  %v8158_v6 = vld [vmem:[#allocation47_spill] sm:$0xff] }
 0x1f2   : > { %v5153_v23 = vadd.f32 %v1280_v14, %v1008_v56  ;;  %v631_v40 = vmul.f32 %v4768_v26, %v8158_v6  ;;  %v4199_v25 = vld [vmem:[%s4305_s26 + $0x128] sm:$0xff]  ;;  %v8159_v56 = vld [vmem:[#allocation58_spill] sm:$0xff] }
 0x1f3   : > { %v5155_v30 = vadd.f32 %v1285_v24, %v1013_v27  ;;  %v1622_v61 = vadd.f32 %v1568_v22, %v4846_v57  ;;  %v636_v14 = vmul.f32 %v4768_v26, %v8159_v56  ;;  %v4200_v57 = vld [vmem:[%s4305_s26 + $0x168] sm:$0xff] }
 0x1f4   : > { %8155 = vst [vmem:[#allocation43_spill] sm:$0xff] %v5153_v23  ;;  %v1011_v50 = vadd.f32 %v957_v29, %v631_v40  ;;  %v5181_v40 = vld [vmem:[%s7821_s3 + $0x1] ss:$0 sm:$0xff] }
 0x1f5   : > { %8156 = vst [vmem:[#allocation4_spill] sm:$0xff] %v5155_v30  ;;  %v1680_v17 = vadd.f32 %v5150_v44, %v1622_v61  ;;  %v1016_v30 = vadd.f32 %v962_v20, %v636_v14  ;;  %v960_v20 = vmul.f32 %v4763_v32, %v4799_v49  ;;  %v2001_v14 = vlaneseq }
 0x1f6   : > { %1501 = vperm.xlu2 %4175, %v4198_v39   ;;  %1497 = vperm.xlu1 %4177, %v4199_v25   ;;  %v2145_v49 = vmul.f32 0.0, %v5181_v40 }
 0x1f7   : > { %v1734_v27 = vadd.f32 3.0, %v1680_v17  ;;  %1529 = vperm.xlu0 %4176, %v4200_v57   ;;  %v1200_v24 = vpop.permute.xlu1 %1199 }
 0x1f8   : > { %v1283_v22 = vmul.f32 %v4775_v35, %v1200_v24  ;;  %v1220_v41 = vpop.permute.xlu0 %1219  ;;  %v1374_v61 = vpop.permute.xlu2 %1373  ;;  %v4201_v24 = vld [vmem:[%s4305_s26 + $0x148] sm:$0x3] }
 0x1f9   : > { %v1788_v6 = vmax.f32 %v1734_v27, 0.0  ;;  %v1288_v39 = vmul.f32 %v4775_v35, %v1220_v41  ;;  %v1571_v25 = vmul.f32 %v5136_v36, %v1374_v61  ;;  %v4203_v61 = vld [vmem:[%s4305_s26 + $0x180] sm:$0xff] }
 0x1fa   : > { %v5173_v15 = vadd.f32 %v1283_v22, %v1011_v50  ;;  %v4202_v50 = vld [vmem:[%s4305_s26 + $0x140] sm:$0xff] }
 0x1fb   : > { %v5175_v56 = vadd.f32 %v1288_v39, %v1016_v30  ;;  %v1625_v57 = vadd.f32 %v1571_v25, %v4870_v51  ;;  %v1842_v29 = vmin.f32 %v1788_v6, 6.0  ;;  %v8162_v30 = vld [vmem:[#allocation50_spill] sm:$0xff] }
 0x1fc   : > { %8160 = vst [vmem:[#allocation36_spill] sm:$0xff] %v5173_v15  ;;  %v634_v22 = vmul.f32 %v4768_v26, %v8162_v30  ;;  %v5193_v51 = vld [vmem:[%s7821_s3] ss:$0 sm:$0xff]  ;;  %v5200_v39 = vld [vmem:[%s7821_s3 + $0x2] ss:$0 sm:$0xff]  ;;  %v5203_v30 = vshrl.u32 %v2001_v14, 7 }
 0x1fd   : > { %8161 = vst [vmem:[#allocation69_spill] sm:$0xff] %v5175_v56  ;;  %v1683_v27 = vadd.f32 %v5150_v44, %v1625_v57  ;;  %v1896_v25 = vmul.f32 %v1842_v29, %v1680_v17  ;;  %v2079_v21 = vmul.f32 0.0, %v5193_v51  ;;  %v2242_v15 = vrot.slane %v2145_v49, 1  ;;  %v5221_v49 = vld [vmem:[%s7821_s3 + $0x3] ss:$0 sm:$0xff] }
 0x1fe   : > { %1513 = vperm.xlu2 %4175, %v4201_v24   ;;  %1509 = vperm.xlu1 %4177, %v4202_v50   ;;  %v1014_v50 = vadd.f32 %v960_v20, %v634_v22  ;;  %v2388_v17 = vmul.f32 0.0, %v5200_v39  ;;  %vm2005_vm0 = vcmp.ge.s32.totalorder %v5203_v30, 1 }
 0x1ff   : > { %v1737_v41 = vadd.f32 3.0, %v1683_v27  ;;  %1541 = vperm.xlu0 %4176, %v4203_v61   ;;  %v1212_v6 = vpop.permute.xlu1 %1211  ;;  %v1950_v29 = vmul.f32 0.16666667, %v1896_v25 }
 0x200   : > { %v1286_v57 = vmul.f32 %v4775_v35, %v1212_v6  ;;  %v1382_v24 = vpop.permute.xlu2 %1381 }
 0x201   : > { %v1791_v56 = vmax.f32 %v1737_v41, 0.0  ;;  %v1573_v61 = vmul.f32 %v5136_v36, %v1382_v24  ;;  %v1366_v12 = vpop.permute.xlu0 %1365  ;;  %v4204_v41 = vld [vmem:[%s4305_s26 + $0x160] sm:$0x3]  ;;  %v4205_v24 = vld [vmem:[%s4305_s26 + $0x158] sm:$0xff] }
 0x202   : > { %v5207_v42 = vadd.f32 %v1286_v57, %v1014_v50  ;;  %v1569_v20 = vmul.f32 %v5136_v36, %v1366_v12  ;;  %v2354_v57 = vadd.f32 %v2242_v15, %v2079_v21  ;;  %v2485_v12 = vrot.slane %v2388_v17, 2 }
 0x203   : > { %v1845_v60 = vmin.f32 %v1791_v56, 6.0  ;;  %v1627_v6 = vadd.f32 %v1573_v61, %v4894_v3  ;;  %v963_v56 = vmul.f32 %v4763_v32, %v4816_v28  ;;  %v8164_v28 = vld [vmem:[#allocation53_spill] sm:$0xff]  ;;  %v5239_v21 = vadd.s32 16, %v5203_v30 }
 0x204   : > { %8163 = vst [vmem:[#allocation66_spill] sm:$0xff] %v5207_v42  ;;  %v1623_v3 = vadd.f32 %v1569_v20, %v4790_v31  ;;  %v637_v61 = vmul.f32 %v4768_v26, %v8164_v28  ;;  %v5236_v31 = vld [vmem:[%s7821_s3 + $0x5] ss:$0 sm:$0xff]  ;;  %v5250_v28 = vadd.f32 %v2485_v12, %v2354_v57 }
 0x205   : > { %v1899_v14 = vmul.f32 %v1845_v60, %v1683_v27  ;;  %v1685_v22 = vadd.f32 %v5150_v44, %v1627_v6  ;;  %v5227_v60 = vld [vmem:[%s7821_s3 + $0x4] ss:$0 sm:$0xff]  ;;  %v2026_v27 = vsel %vm2005_vm0, %v1950_v29, 0.0  ;;  %vm2016_vm1 = vcmp.lt.s32.totalorder %v5239_v21, 17 }
 0x206   : > { %1525 = vperm.xlu2 %4175, %v4204_v41   ;;  %1521 = vperm.xlu1 %4177, %v4205_v24   ;;  %v1681_v15 = vadd.f32 %v5150_v44, %v1623_v3  ;;  %v1017_v20 = vadd.f32 %v963_v56, %v637_v61  ;;  %v5245_v41 = vmul.f32 %v5181_v40, %v2026_v27 }
 0x207   : > { %v1224_v25 = vpop.permute.xlu1 %1223  ;;  %v1739_v50 = vadd.f32 3.0, %v1685_v22  ;;  %v1953_v17 = vmul.f32 0.16666667, %v1899_v14  ;;  %v5248_v26 = vmul.f32 %v5200_v39, %v2026_v27  ;;  %v2631_v42 = vmul.f32 %v5221_v49, %v2026_v27 }
 0x208   : > { %v1394_v32 = vpop.permute.xlu2 %1393  ;;  %v1289_v6 = vmul.f32 %v4775_v35, %v1224_v25  ;;  %v5254_v14 = vmul.f32 %v5227_v60, %v2026_v27  ;;  %v5257_v3 = vmul.f32 %v5193_v51, %v2026_v27  ;;  %v5260_v56 = vmul.f32 %v5236_v31, %v2026_v27  ;;  %v5298_v27 = vld [vmem:[%s7821_s3 + $0x8] ss:$0 sm:$0xff] }
 0x209   : > { %v1576_v29 = vmul.f32 %v5136_v36, %v1394_v32  ;;  %v1386_v24 = vpop.permute.xlu0 %1385  ;;  %v1793_v35 = vmax.f32 %v1739_v50, 0.0  ;;  %v1735_v25 = vadd.f32 3.0, %v1681_v15  ;;  %v2029_v32 = vsel %vm2005_vm0, %v1953_v17, 0.0  ;;  %v4207_v50 = vld [vmem:[%s4305_s26 + $0x170] sm:$0xff] }
 0x20a   : > { %v5265_v12 = vadd.f32 %v1289_v6, %v1017_v20  ;;  %v1574_v16 = vmul.f32 %v5136_v36, %v1386_v24  ;;  %v5274_v62 = vadd.f32 %v2631_v42, %v5250_v28  ;;  %v5289_v42 = vmul.f32 %v5181_v40, %v2029_v32 }
 0x20b   : > { %v1847_v57 = vmin.f32 %v1793_v35, 6.0  ;;  %v1630_v61 = vadd.f32 %v1576_v29, %v4918_v45  ;;  %v1789_v23 = vmax.f32 %v1735_v25, 0.0  ;;  %v5280_v45 = vld [vmem:[%s7821_s3 + $0x7] ss:$0 sm:$0xff]  ;;  %v5286_v35 = vld [vmem:[%s7821_s3 + $0x6] ss:$0 sm:$0xff]  ;;  %v5301_v58 = vmul.f32 %v5200_v39, %v2029_v32 }
 0x20c   : > { %8165 = vst [vmem:[#allocation24_spill] sm:$0xff] %v5265_v12  ;;  %v1628_v25 = vadd.f32 %v1574_v16, %v4824_v38  ;;  %v5307_v38 = vmul.f32 %v5236_v31, %v2029_v32  ;;  %v5318_v18 = vmul.f32 %v5221_v49, %v2029_v32  ;;  %v5321_v13 = vmul.f32 %v5286_v35, %v2029_v32  ;;  %v4209_v12 = vld [vmem:[%s4305_s26 + $0x188] sm:$0xff] }
 0x20d   : > { %v1688_v6 = vadd.f32 %v5150_v44, %v1630_v61  ;;  %v1843_v24 = vmin.f32 %v1789_v23, 6.0  ;;  %v5304_v23 = vmul.f32 %v5227_v60, %v2029_v32  ;;  %v8177_v48 = vrot.slane %v5245_v41, 1 }
 0x20e   : > { %1537 = vperm.xlu2 %4175, %v4206_v19   ;;  %1533 = vperm.xlu1 %4177, %v4207_v50   ;;  %v1901_v19 = vmul.f32 %v1847_v57, %v1685_v22  ;;  %8166 = vst [vmem:[#allocation46_spill] sm:$0xff] %v5307_v38  ;;  %v1686_v17 = vadd.f32 %v5150_v44, %v1628_v25  ;;  %v8178_v2 = vrot.slane %v5248_v26, 2 }
 0x20f   : > { %v1742_v57 = vadd.f32 3.0, %v1688_v6  ;;  %v1897_v16 = vmul.f32 %v1843_v24, %v1681_v15 }
 0x210   : > { %v1406_v29 = vpop.permute.xlu2 %1405  ;;  %v1370_v20 = vpop.permute.xlu1 %1369  ;;  %v1955_v22 = vmul.f32 0.16666667, %v1901_v19  ;;  %v5310_v19 = vmul.f32 %v5193_v51, %v2029_v32 }
 0x211   : > { %v1579_v50 = vmul.f32 %v5136_v36, %v1406_v29  ;;  %v1570_v61 = vmul.f32 %v5136_v36, %v1370_v20  ;;  %v5313_v29 = vmul.f32 %v5280_v45, %v2029_v32  ;;  %v1796_v20 = vmax.f32 %v1742_v57, 0.0  ;;  %v1398_v24 = vpop.permute.xlu0 %1397  ;;  %v4208_v57 = vld [vmem:[%s4305_s26 + $0x190] sm:$0x3] }
 0x212   : > { %v2031_v33 = vsel %vm2016_vm1, %v1955_v22, 0.0  ;;  %v5326_v9 = vmul.f32 0.16666667, %v1897_v16  ;;  %v1577_v7 = vmul.f32 %v5136_v36, %v1398_v24 }
 0x213   : > { %8167 = vst [vmem:[#allocation5_spill] sm:$0xff] %v5313_v29  ;;  %v1633_v15 = vadd.f32 %v1579_v50, %v4942_v54  ;;  %v1850_v10 = vmin.f32 %v1796_v20, 6.0  ;;  %v1624_v25 = vadd.f32 %v1570_v61, %v4848_v53  ;;  %v5335_v50 = vmul.f32 %v5298_v27, %v2029_v32 }
 0x214   : > { %v1740_v20 = vadd.f32 3.0, %v1686_v17  ;;  %v5340_v53 = vmul.f32 %v5181_v40, %v2031_v33  ;;  %v5357_v24 = vmul.f32 %v5227_v60, %v2031_v33  ;;  %v5360_v11 = vmul.f32 %v5236_v31, %v2031_v33 }
 0x215   : > { %8168 = vst [vmem:[#allocation39_spill] sm:$0xff] %v5335_v50  ;;  %v1904_v16 = vmul.f32 %v1850_v10, %v1688_v6  ;;  %v1691_v61 = vadd.f32 %v5150_v44, %v1633_v15  ;;  %v1682_v22 = vadd.f32 %v5150_v44, %v1624_v25  ;;  %v5353_v10 = vmul.f32 %v5200_v39, %v5326_v9 }
 0x216   : > { %1549 = vperm.xlu2 %4175, %v4208_v57   ;;  %1545 = vperm.xlu1 %4177, %v4209_v12   ;;  %v5343_v12 = vmul.f32 %v5200_v39, %v2031_v33  ;;  %v5348_v57 = vmul.f32 %v5181_v40, %v5326_v9  ;;  %v1794_v54 = vmax.f32 %v1740_v20, 0.0  ;;  %8170 = vst [vmem:[#allocation68_spill] sm:$0xff] %v5360_v11 }
 0x217   : > { %v1958_v32 = vmul.f32 0.16666667, %v1904_v16  ;;  %v1745_v15 = vadd.f32 3.0, %v1691_v61  ;;  %v5363_v37 = vmul.f32 %v5280_v45, %v2031_v33  ;;  %v5366_v16 = vmul.f32 %v5298_v27, %v2031_v33 }
 0x218   : > { %8169 = vst [vmem:[#allocation71_spill] sm:$0xff] %v5343_v12  ;;  %v1848_v25 = vmin.f32 %v1794_v54, 6.0  ;;  %v5369_v20 = vadd.f32 %v1577_v7, %v4844_v55  ;;  %v7848_v52 = vrot.slane %v5348_v57, 1  ;;  %v7846_v4 = vrot.slane %v5353_v10, 2 }
 0x219   : > { %8171 = vst [vmem:[#allocation26_spill] sm:$0xff] %v5363_v37  ;;  %v2034_v6 = vsel %vm2016_vm1, %v1958_v32, 0.0  ;;  %v1799_v5 = vmax.f32 %v1745_v15, 0.0  ;;  %v1736_v1 = vadd.f32 3.0, %v1682_v22  ;;  %v2632_v55 = vmul.f32 %v5221_v49, %v5326_v9 }
 0x21a   : > { %8172 = vst [vmem:[#allocation49_spill] sm:$0xff] %v5366_v16  ;;  %v1902_v8 = vmul.f32 %v1848_v25, %v1686_v17  ;;  %v5383_v7 = vmul.f32 %v5227_v60, %v5326_v9  ;;  %v5386_v32 = vmul.f32 %v5181_v40, %v2034_v6  ;;  %v5389_v43 = vmul.f32 %v5200_v39, %v2034_v6 }
 0x21b   : > { %v1853_v15 = vmin.f32 %v1799_v5, 6.0  ;;  %v5392_v25 = vmul.f32 %v5227_v60, %v2034_v6  ;;  %v5395_v54 = vmul.f32 %v5236_v31, %v2034_v6  ;;  %v2249_v33 = vsel %vm2241_vm2, %v8177_v48, %v7848_v52 }
 0x21c   : > { %8173 = vst [vmem:[#allocation6_spill] sm:$0xff] %v5386_v32  ;;  %v1956_v17 = vmul.f32 0.16666667, %v1902_v8  ;;  %v2492_v11 = vsel %vm2484_vm3, %v8178_v2, %v7846_v4  ;;  %v5408_v5 = vmul.f32 %v5280_v45, %v2034_v6  ;;  %v1790_v12 = vmax.f32 %v1736_v1, 0.0 }
 0x21d   : > { %8174 = vst [vmem:[#allocation42_spill] sm:$0xff] %v5389_v43  ;;  %v1907_v8 = vmul.f32 %v1853_v15, %v1691_v61  ;;  %v2356_v50 = vadd.f32 %v2249_v33, %v5257_v3  ;;  %v5413_v38 = vmul.f32 %v5298_v27, %v2034_v6  ;;  %v7847_v41 = vrot.slane %v5383_v7, 1  ;;  %v1418_v3 = vpop.permute.xlu2 %1417  ;;  %v1410_v43 = vpop.permute.xlu0 %1409 }
 0x21e   : > { %8175 = vst [vmem:[#allocation73_spill] sm:$0xff] %v5392_v25  ;;  %v2032_v48 = vsel %vm2005_vm0, %v1956_v17, 0.0  ;;  %v5422_v61 = vmul.f32 %v5193_v51, %v5326_v9  ;;  %v2664_v1 = vadd.f32 %v2632_v55, %v5250_v28  ;;  %v1844_v26 = vmin.f32 %v1790_v12, 6.0 }
 0x21f   : > { %8176 = vst [vmem:[#allocation70_spill] sm:$0xff] %v5395_v54  ;;  %v1961_v15 = vmul.f32 0.16666667, %v1907_v8  ;;  %v5430_v29 = vmul.f32 %v5181_v40, %v2032_v48  ;;  %v5433_v2 = vmul.f32 %v5200_v39, %v2032_v48  ;;  %v5437_v28 = vmul.f32 %v5227_v60, %v2032_v48 }
 0x220   : > { %8179 = vst [vmem:[#allocation29_spill] sm:$0xff] %v5408_v5  ;;  %v2599_v55 = vadd.f32 %v2492_v11, %v2356_v50  ;;  %v8184_v33 = vrot.slane %v5254_v14, 1  ;;  %v5445_v17 = vmul.f32 %v5193_v51, %v2032_v48  ;;  %v5448_v6 = vmul.f32 %v5221_v49, %v2032_v48 }
 0x221   : > { %8180 = vst [vmem:[#allocation52_spill] sm:$0xff] %v5413_v38  ;;  %v5452_v12 = vsel %vm2016_vm1, %v1961_v15, 0.0  ;;  %v2940_v11 = vmul.f32 %v5236_v31, %v5326_v9  ;;  %v5457_v50 = vmul.f32 %v5236_v31, %v2032_v48  ;;  %v5460_v14 = vmul.f32 %v5286_v35, %v2032_v48 }
 0x222   : > { %8181 = vst [vmem:[#allocation7_spill] sm:$0xff] %v5430_v29  ;;  %v2795_v8 = vsel %vm2241_vm2, %v8184_v33, %v7847_v41  ;;  %v1898_v33 = vmul.f32 %v1844_v26, %v1682_v22  ;;  %v5463_v4 = vadd.f32 %v5318_v18, %v2599_v55  ;;  %v1378_v41 = vpop.permute.xlu1 %1377  ;;  %v5468_v15 = vmul.f32 %v5280_v45, %v2032_v48 }
 0x223   : > { %8182 = vst [vmem:[#allocation45_spill] sm:$0xff] %v5433_v2  ;;  %v5471_v9 = vmul.f32 %v5298_v27, %v2032_v48  ;;  %v5476_v22 = vmul.f32 %v5181_v40, %v5452_v12  ;;  %v2905_v26 = vadd.f32 %v2795_v8, %v5274_v62  ;;  %v5481_v55 = vmul.f32 %v5200_v39, %v5452_v12 }
 0x224   : > { %8183 = vst [vmem:[#allocation75_spill] sm:$0xff] %v5437_v28  ;;  %v1952_v18 = vmul.f32 0.16666667, %v1898_v33  ;;  %v3036_v54 = vrot.slane %v2940_v11, 2  ;;  %v1689_v52 = vadd.f32 %v5150_v44, %v5369_v20  ;;  %v1582_v48 = vmul.f32 %v5136_v36, %v1418_v3 }
 0x225   : > { %8185 = vst [vmem:[#allocation72_spill] sm:$0xff] %v5445_v17  ;;  %v5488_v38 = vmul.f32 %v5227_v60, %v5452_v12  ;;  %v1572_v33 = vmul.f32 %v5136_v36, %v1378_v41  ;;  %v1580_v62 = vmul.f32 %v5136_v36, %v1410_v43  ;;  %v8191_v3 = vrot.slane %v5260_v56, 2 }
 0x226   : > { %8186 = vst [vmem:[#allocation32_spill] sm:$0xff] %v5448_v6  ;;  %v2028_v5 = vsel %vm2016_vm1, %v1952_v18, 0.0  ;;  %v1743_v17 = vadd.f32 3.0, %v1689_v52  ;;  %v1636_v2 = vadd.f32 %v1582_v48, %v4966_v0  ;;  %v8192_v56 = vrot.slane %v5348_v57, 1 }
 0x227   : > { %8187 = vst [vmem:[#allocation55_spill] sm:$0xff] %v5460_v14  ;;  %v2150_v8 = vmul.f32 %v5181_v40, %v2028_v5  ;;  %v2393_v11 = vmul.f32 %v5200_v39, %v2028_v5  ;;  %v2699_v25 = vmul.f32 %v5227_v60, %v2028_v5  ;;  %v2941_v20 = vmul.f32 %v5236_v31, %v2028_v5  ;;  %v1430_v5 = vpop.permute.xlu2 %1429 }
 0x228   : > { %8188 = vst [vmem:[#allocation8_spill] sm:$0xff] %v5463_v4  ;;  %v3037_v28 = vsel %vm2484_vm3, %v8191_v3, %v3036_v54  ;;  %v1626_v18 = vadd.f32 %v1572_v33, %v4807_v34  ;;  %v1797_v6 = vmax.f32 %v1743_v17, 0.0  ;;  %v1694_v16 = vadd.f32 %v5150_v44, %v1636_v2 }
 0x229   : > { %8189 = vst [vmem:[#allocation48_spill] sm:$0xff] %v5481_v55  ;;  %v2250_v41 = vrot.slane %v2150_v8, 1  ;;  %v2493_v32 = vrot.slane %v2393_v11, 2  ;;  %v2796_v43 = vrot.slane %v2699_v25, 1  ;;  %v3038_v29 = vrot.slane %v2941_v20, 2  ;;  %v1422_v20 = vpop.permute.xlu0 %1421 }
 0x22a   : > { %8190 = vst [vmem:[#allocation13_spill] sm:$0xff] %v5488_v38  ;;  %v3147_v14 = vadd.f32 %v3037_v28, %v2905_v26  ;;  %v1684_v37 = vadd.f32 %v5150_v44, %v1626_v18  ;;  %v8193_v4 = vrot.slane %v5353_v10, 2  ;;  %v8194_v34 = vrot.slane %v5383_v7, 1  ;;  %v1390_v57 = vpop.permute.xlu1 %1389 }
 0x22b   : > { %v2251_v3 = vsel %vm2241_vm2, %v8192_v56, %v2250_v41  ;;  %v3039_v28 = vsel %vm2484_vm3, %v3036_v54, %v3038_v29  ;;  %v1851_v48 = vmin.f32 %v1797_v6, 6.0  ;;  %v1748_v33 = vadd.f32 3.0, %v1694_v16 }
 0x22c   : > { %v2494_v0 = vsel %vm2484_vm3, %v8193_v4, %v2493_v32  ;;  %v2797_v25 = vsel %vm2241_vm2, %v8194_v34, %v2796_v43  ;;  %v2357_v17 = vadd.f32 %v2251_v3, %v5422_v61  ;;  %v5517_v26 = vadd.f32 %v5321_v13, %v3147_v14 }
 0x22d   : > { %v2906_v2 = vadd.f32 %v2797_v25, %v2664_v1  ;;  %v1738_v8 = vadd.f32 3.0, %v1684_v37  ;;  %v1634_v10 = vadd.f32 %v1580_v62, %v4868_v59  ;;  %v1585_v4 = vmul.f32 %v5136_v36, %v1430_v5 }
 0x22e   : > { %v5523_v7 = vmul.f32 %v5236_v31, %v5452_v12  ;;  %v5525_v32 = vadd.f32 %v2494_v0, %v2357_v17  ;;  %v1905_v54 = vmul.f32 %v1851_v48, %v1689_v52  ;;  %v1802_v61 = vmax.f32 %v1748_v33, 0.0 }
 0x22f   : > { %v5527_v29 = vadd.f32 %v3039_v28, %v2906_v2  ;;  %v1792_v13 = vmax.f32 %v1738_v8, 0.0  ;;  %v5530_v1 = vadd.f32 %v5150_v44, %v1634_v10  ;;  %v1575_v6 = vmul.f32 %v5136_v36, %v1390_v57 }
 0x230   : > { %8195 = vst [vmem:[#allocation77_spill] sm:$0xff] %v5523_v7  ;;  %v5535_v59 = vmul.f32 %v5280_v45, %v5452_v12  ;;  %v5539_v14 = vmul.f32 %v5298_v27, %v5452_v12  ;;  %v1959_v62 = vmul.f32 0.16666667, %v1905_v54  ;;  %v1639_v11 = vadd.f32 %v1585_v4, %v4990_v63 }
 0x231   : > { %v1856_v43 = vmin.f32 %v1802_v61, 6.0  ;;  %v1846_v12 = vmin.f32 %v1792_v13, 6.0  ;;  %v1746_v63 = vadd.f32 3.0, %v5530_v1  ;;  %v1629_v34 = vadd.f32 %v1575_v6, %v4872_v46 }
 0x232   : > { %8196 = vst [vmem:[#allocation74_spill] sm:$0xff] %v5535_v59  ;;  %v2035_v3 = vsel %vm2005_vm0, %v1959_v62, 0.0  ;;  %v1583_v25 = vmul.f32 %v5136_v36, %v1422_v20  ;;  %v5557_v48 = vadd.f32 %v5150_v44, %v1639_v11  ;;  %v8206_v18 = vrot.slane %v5289_v42, 1 }
 0x233   : > { %8197 = vst [vmem:[#allocation35_spill] sm:$0xff] %v5539_v14  ;;  %v5560_v57 = vmul.f32 %v5181_v40, %v2035_v3  ;;  %v5563_v33 = vmul.f32 %v5200_v39, %v2035_v3  ;;  %v5566_v8 = vmul.f32 %v5227_v60, %v2035_v3  ;;  %v1910_v46 = vmul.f32 %v1856_v43, %v1694_v16 }
 0x234   : > { %v5569_v10 = vmul.f32 %v5236_v31, %v2035_v3  ;;  %v5572_v4 = vmul.f32 %v5280_v45, %v2035_v3  ;;  %v5575_v54 = vmul.f32 %v5298_v27, %v2035_v3  ;;  %v1900_v61 = vmul.f32 %v1846_v12, %v1684_v37 }
 0x235   : > { %8198 = vst [vmem:[#allocation9_spill] sm:$0xff] %v5566_v8  ;;  %v1964_v13 = vmul.f32 0.16666667, %v1910_v46  ;;  %v1800_v6 = vmax.f32 %v1746_v63, 0.0  ;;  %v5578_v62 = vadd.f32 %v5150_v44, %v1629_v34  ;;  %v1637_v11 = vadd.f32 %v1583_v25, %v4892_v47 }
 0x236   : > { %8199 = vst [vmem:[#allocation10_spill] sm:$0xff] %v5569_v10  ;;  %v5582_v20 = vmul.f32 %v5193_v51, %v2035_v3  ;;  %v5585_v16 = vmul.f32 %v5221_v49, %v2035_v3  ;;  %v1954_v43 = vmul.f32 0.16666667, %v1900_v61  ;;  %v1751_v28 = vadd.f32 3.0, %v5557_v48 }
 0x237   : > { %8200 = vst [vmem:[#allocation51_spill] sm:$0xff] %v5572_v4  ;;  %v5591_v12 = vmul.f32 %v5286_v35, %v2035_v3  ;;  %v2040_v63 = vsel %vm2016_vm1, %v1964_v13, 0.0  ;;  %v1854_v2 = vmin.f32 %v1800_v6, 6.0  ;;  %v5601_v17 = vadd.f32 3.0, %v5578_v62 }
 0x238   : > { %8201 = vst [vmem:[#allocation14_spill] sm:$0xff] %v5575_v54  ;;  %v2152_v61 = vmul.f32 %v5181_v40, %v1954_v43  ;;  %v5604_v3 = vadd.f32 %v5150_v44, %v1637_v11  ;;  %v5607_v0 = vmul.f32 %v5181_v40, %v2040_v63  ;;  %v5610_v13 = vmul.f32 %v5200_v39, %v2040_v63 }
 0x239   : > { %v5613_v34 = vmul.f32 %v5227_v60, %v2040_v63  ;;  %v1805_v25 = vmax.f32 %v1751_v28, 0.0  ;;  %v5616_v46 = vmul.f32 %v5236_v31, %v2040_v63  ;;  %v2084_v6 = vmul.f32 %v5193_v51, %v1954_v43 }
 0x23a   : > { %8202 = vst [vmem:[#allocation79_spill] sm:$0xff] %v5607_v0  ;;  %v2253_v47 = vrot.slane %v2152_v61, 1  ;;  %v2395_v37 = vmul.f32 %v5200_v39, %v1954_v43  ;;  %v2634_v11 = vmul.f32 %v5221_v49, %v1954_v43  ;;  %v2701_v5 = vmul.f32 %v5227_v60, %v1954_v43 }
 0x23b   : > { %8203 = vst [vmem:[#allocation76_spill] sm:$0xff] %v5610_v13  ;;  %v2943_v56 = vmul.f32 %v5236_v31, %v1954_v43  ;;  %v3182_v41 = vmul.f32 %v5286_v35, %v1954_v43  ;;  %v8207_v52 = vrot.slane %v5340_v53, 1  ;;  %v3248_v61 = vmul.f32 %v5280_v45, %v1954_v43 }
 0x23c   : > { %8204 = vst [vmem:[#allocation38_spill] sm:$0xff] %v5613_v34  ;;  %v2254_v28 = vsel %vm2241_vm2, %v8206_v18, %v2253_v47  ;;  %v2496_v55 = vrot.slane %v2395_v37, 2  ;;  %v2666_v59 = vadd.f32 %v2634_v11, %v5525_v32  ;;  %v2799_v4 = vrot.slane %v2701_v5, 1  ;;  %v8211_v32 = vld [vmem:[#allocation8_spill] sm:$0xff] }
 0x23d   : > { %8205 = vst [vmem:[#allocation11_spill] sm:$0xff] %v5616_v46  ;;  %v2256_v7 = vsel %vm2241_vm2, %v2253_v47, %v8207_v52  ;;  %v2358_v14 = vadd.f32 %v2254_v28, %v5310_v19  ;;  %v8208_v10 = vrot.slane %v5301_v58, 2  ;;  %v3041_v42 = vrot.slane %v2943_v56, 2 }
 0x23e   : > { %v2359_v54 = vadd.f32 %v2256_v7, %v2084_v6  ;;  %v3214_v18 = vadd.f32 %v3182_v41, %v5527_v29  ;;  %v3344_v8 = vrot.slane %v3248_v61, 1  ;;  %v8209_v52 = vrot.slane %v5304_v23, 1  ;;  %v8212_v6 = vld [vmem:[#allocation46_spill] sm:$0xff]  ;;  %v8214_v29 = vld [vmem:[#allocation5_spill] sm:$0xff] }
 0x23f   : > { %v2497_v38 = vsel %vm2484_vm3, %v8208_v10, %v2496_v55  ;;  %v8210_v47 = vrot.slane %v5357_v24, 1  ;;  %v3490_v7 = vmul.f32 %v5298_v27, %v1954_v43  ;;  %v8213_v10 = vrot.slane %v8212_v6, 2  ;;  %v8216_v23 = vld [vmem:[#allocation26_spill] sm:$0xff] }
 0x240   : > { %v2601_v53 = vadd.f32 %v2497_v38, %v2358_v14  ;;  %v2800_v37 = vsel %vm2241_vm2, %v8209_v52, %v2799_v4  ;;  %v8215_v41 = vrot.slane %v8214_v29, 1  ;;  %v8217_v14 = vrot.slane %v8216_v23, 1 }
 0x241   : > { %v2802_v19 = vsel %vm2241_vm2, %v2799_v4, %v8210_v47  ;;  %v2907_v5 = vadd.f32 %v2800_v37, %v8211_v32  ;;  %v3042_v56 = vsel %vm2484_vm3, %v8213_v10, %v3041_v42  ;;  %v3586_v4 = vrot.slane %v3490_v7, 2  ;;  %v8219_v47 = vld [vmem:[#allocation39_spill] sm:$0xff]  ;;  %v8221_v32 = vld [vmem:[#allocation49_spill] sm:$0xff] }
 0x242   : > { %v2908_v58 = vadd.f32 %v2802_v19, %v2666_v59  ;;  %v3345_v38 = vsel %vm2241_vm2, %v8215_v41, %v3344_v8  ;;  %v3347_v11 = vsel %vm2241_vm2, %v3344_v8, %v8217_v14  ;;  %v1908_v43 = vmul.f32 %v1854_v2, %v5530_v1  ;;  %v5662_v59 = vld [vmem:[%s7822_s4] ss:$0 sm:$0xff]  ;;  %v8223_v2 = vld [vmem:[#allocation71_spill] sm:$0xff]  ;;  %v8227_v14 = vld [vmem:[#allocation68_spill] sm:$0xff] }
 0x243   : > { %v3455_v24 = vadd.f32 %v3345_v38, %v5517_v26  ;;  %v5657_v28 = vmul.f32 %v5280_v45, %v2040_v63  ;;  %v3149_v61 = vadd.f32 %v3042_v56, %v2907_v5  ;;  %v3456_v52 = vadd.f32 %v3347_v11, %v3214_v18  ;;  %v8226_v38 = vld [vmem:[#allocation32_spill] sm:$0xff] }
 0x244   : > { %v1859_v37 = vmin.f32 %v1805_v25, 6.0  ;;  %v8220_v19 = vrot.slane %v8219_v47, 2  ;;  %v8222_v26 = vrot.slane %v8221_v32, 2  ;;  %v1962_v1 = vmul.f32 0.16666667, %v1908_v43  ;;  %v1402_v43 = vpop.permute.xlu1 %1401 }
 0x245   : > { %8218 = vst [vmem:[#allocation12_spill] sm:$0xff] %v5657_v28  ;;  %v8224_v6 = vrot.slane %v8223_v2, 2  ;;  %v5674_v29 = vmul.f32 %v5298_v27, %v2040_v63  ;;  %v1795_v25 = vmax.f32 %v5601_v17, 0.0  ;;  %v5681_v23 = vadd.f32 %v8226_v38, %v2601_v53 }
 0x246   : > { %v3587_v8 = vsel %vm2484_vm3, %v8220_v19, %v3586_v4  ;;  %v3589_v7 = vsel %vm2484_vm3, %v3586_v4, %v8222_v26  ;;  %v8228_v11 = vrot.slane %v8227_v14, 2  ;;  %v1913_v17 = vmul.f32 %v1859_v37, %v5557_v48 }
 0x247   : > { %v2499_v10 = vsel %vm2484_vm3, %v2496_v55, %v8224_v6  ;;  %8225 = vst [vmem:[#allocation54_spill] sm:$0xff] %v5674_v29  ;;  %v3697_v41 = vadd.f32 %v3587_v8, %v3455_v24  ;;  %v3698_v5 = vadd.f32 %v3589_v7, %v3456_v52  ;;  %v2038_v24 = vsel %vm2005_vm0, %v1962_v1, 0.0 }
 0x248   : > { %v5678_v56 = vadd.f32 %v2499_v10, %v2359_v54  ;;  %v3044_v4 = vsel %vm2484_vm3, %v3041_v42, %v8228_v11  ;;  %v1849_v8 = vmin.f32 %v1795_v25, 6.0  ;;  %v5697_v32 = vmul.f32 %v5193_v51, %v2038_v24  ;;  %v8236_v25 = vld [vmem:[#allocation55_spill] sm:$0xff] }
 0x249   : > { %v3733_v55 = vadd.f32 %v5662_v59, %v3697_v41  ;;  %v3734_v63 = vadd.f32 %v5662_v59, %v3698_v5  ;;  %v5700_v48 = vmul.f32 %v5181_v40, %v2038_v24  ;;  %v5703_v37 = vmul.f32 %v5200_v39, %v2038_v24 }
 0x24a   : > { %8229 = vst [vmem:[#allocation15_spill] sm:$0xff] %v5697_v32  ;;  %v5706_v26 = vmul.f32 %v5227_v60, %v2038_v24  ;;  %v5709_v2 = vmul.f32 %v5236_v31, %v2038_v24  ;;  %v1967_v6 = vmul.f32 0.16666667, %v1913_v17  ;;  %v5712_v10 = vmul.f32 %v5280_v45, %v2038_v24 }
 0x24b   : > { %v3765_v47 = vadd.f32 3.0, %v3733_v55  ;;  %v3766_v19 = vadd.f32 3.0, %v3734_v63  ;;  %8230 = vst [vmem:[#allocation81_spill] sm:$0xff] %v5700_v48  ;;  %v5715_v41 = vmul.f32 %v5298_v27, %v2038_v24  ;;  %v3150_v5 = vadd.f32 %v3044_v4, %v2908_v58  ;;  %v8246_v48 = vld [vmem:[#allocation72_spill] sm:$0xff] }
 0x24c   : > { %8231 = vst [vmem:[#allocation78_spill] sm:$0xff] %v5703_v37  ;;  %v5718_v38 = vadd.f32 %v8236_v25, %v3149_v61  ;;  %v5730_v42 = vmul.f32 %v5286_v35, %v2038_v24  ;;  %v1903_v58 = vmul.f32 %v1849_v8, %v5578_v62  ;;  %v1442_v25 = vpop.permute.xlu2 %1441 }
 0x24d   : > { %8232 = vst [vmem:[#allocation41_spill] sm:$0xff] %v5706_v26  ;;  %v3797_v7 = vmax.f32 %v3765_v47, 0.0  ;;  %v3798_v1 = vmax.f32 %v3766_v19, 0.0  ;;  %v5721_v47 = vmul.f32 %v5221_v49, %v2038_v24  ;;  %v5725_v19 = vsel %vm2016_vm1, %v1967_v6, 0.0  ;;  %v8242_v26 = vld [vmem:[#allocation6_spill] sm:$0xff] }
 0x24e   : > { %8233 = vst [vmem:[#allocation56_spill] sm:$0xff] %v5709_v2  ;;  %v5740_v54 = vmul.f32 %v5181_v40, %v5725_v19  ;;  %v5744_v62 = vmul.f32 %v5200_v39, %v5725_v19  ;;  %v5748_v24 = vmul.f32 %v5227_v60, %v5725_v19  ;;  %v5752_v8 = vmul.f32 %v5236_v31, %v5725_v19 }
 0x24f   : > { %8234 = vst [vmem:[#allocation83_spill] sm:$0xff] %v5712_v10  ;;  %v3829_v14 = vmin.f32 %v3797_v7, 6.0  ;;  %v3830_v11 = vmin.f32 %v3798_v1, 6.0  ;;  %v8240_v10 = vld [vmem:[#allocation7_spill] sm:$0xff]  ;;  %v8243_v37 = vrot.slane %v8242_v26, 1 }
 0x250   : > { %8235 = vst [vmem:[#allocation80_spill] sm:$0xff] %v5715_v41  ;;  %v8241_v2 = vrot.slane %v8240_v10, 1 }
 0x251   : > { %8237 = vst [vmem:[#allocation44_spill] sm:$0xff] %v5730_v42  ;;  %v3861_v61 = vmul.f32 %v3829_v14, %v3733_v55  ;;  %v3862_v4 = vmul.f32 %v3830_v11, %v3734_v63  ;;  %v1957_v14 = vmul.f32 0.16666667, %v1903_v58  ;;  %v1749_v11 = vadd.f32 3.0, %v5604_v3 }
 0x252   : > { %8238 = vst [vmem:[#allocation57_spill] sm:$0xff] %v5744_v62 }
 0x253   : > { %v3893_v55 = vmul.f32 0.16666667, %v3861_v61  ;;  %v3894_v63 = vmul.f32 0.16666667, %v3862_v4  ;;  %8239 = vst [vmem:[#allocation82_spill] sm:$0xff] %v5752_v8  ;;  %v1588_v61 = vmul.f32 %v5136_v36, %v1442_v25  ;;  %v1578_v4 = vmul.f32 %v5136_v36, %v1402_v43 }
 0x254   : > { %v2086_v18 = vmul.f32 %v5193_v51, %v1957_v14  ;;  %v2155_v17 = vmul.f32 %v5181_v40, %v1957_v14  ;;  %v2398_v58 = vmul.f32 %v5200_v39, %v1957_v14  ;;  %v2636_v25 = vmul.f32 %v5221_v49, %v1957_v14 }
 0x255   : > { %v3925_v52 = vpack.c.bf16 %v3893_v55, %v3893_v55  ;;  %v3926_v6 = vpack.c.bf16 %v3894_v63, %v3894_v63  ;;  %v3991_v1 = vsel %vm3990_vm4, %v3893_v55, 0.0  ;;  %v3992_v7 = vsel %vm3990_vm4, %v3894_v63, 0.0 }
 0x256   : > { %v5764_v53 = vadd.f32 %v3992_v7, %v3991_v1  ;;  %v2704_v43 = vmul.f32 %v5227_v60, %v1957_v14  ;;  %v2946_v46 = vmul.f32 %v5236_v31, %v1957_v14  ;;  %v3184_v55 = vmul.f32 %v5286_v35, %v1957_v14 }
 0x257   : > { %3958 = vst.msk [vmem:[%s5757_s14] sm:$0xf] %vm3957_vm5, %v3925_v52  ;;  %v2258_v7 = vrot.slane %v2155_v17, 1  ;;  %v2501_v1 = vrot.slane %v2398_v58, 2  ;;  %v3251_v63 = vmul.f32 %v5280_v45, %v1957_v14  ;;  %v3493_v29 = vmul.f32 %v5298_v27, %v1957_v14 }
 0x258   : > { %3959 = vst.msk [vmem:[%s5757_s14 + $0x4] sm:$0xf] %vm3957_vm5, %v3926_v6  ;;  %v2668_v41 = vadd.f32 %v2636_v25, %v5678_v56  ;;  %v2804_v13 = vrot.slane %v2704_v43, 1  ;;  %v3046_v52 = vrot.slane %v2946_v46, 2  ;;  %v3216_v28 = vadd.f32 %v3184_v55, %v3150_v5  ;;  %v8244_v6 = vld [vmem:[#allocation45_spill] sm:$0xff]  ;;  %v8247_v56 = vld [vmem:[#allocation75_spill] sm:$0xff] }
 0x259   : > { %v2259_v34 = vsel %vm2241_vm2, %v8241_v2, %v2258_v7  ;;  %v2261_v32 = vsel %vm2241_vm2, %v2258_v7, %v8243_v37  ;;  %v8245_v17 = vrot.slane %v8244_v6, 2  ;;  %v3349_v0 = vrot.slane %v3251_v63, 1  ;;  %v8249_v5 = vld [vmem:[#allocation73_spill] sm:$0xff] }
 0x25a   : > { %v2360_v14 = vadd.f32 %v2259_v34, %v8246_v48  ;;  %v2361_v42 = vadd.f32 %v2261_v32, %v2086_v18  ;;  %v8248_v25 = vrot.slane %v8247_v56, 1  ;;  %v8250_v10 = vrot.slane %v8249_v5, 1  ;;  %v8253_v32 = vld [vmem:[#allocation29_spill] sm:$0xff] }
 0x25b   : > { %v2502_v58 = vsel %vm2484_vm3, %v8245_v17, %v2501_v1  ;;  %v8251_v37 = vrot.slane %v5457_v50, 2  ;;  %v8252_v7 = vrot.slane %v5468_v15, 1  ;;  %v8254_v48 = vrot.slane %v8253_v32, 1  ;;  %v8257_v15 = vld [vmem:[#allocation52_spill] sm:$0xff] }
 0x25c   : > { %v2805_v46 = vsel %vm2241_vm2, %v8248_v25, %v2804_v13  ;;  %v2807_v2 = vsel %vm2241_vm2, %v2804_v13, %v8250_v10  ;;  %v2603_v18 = vadd.f32 %v2502_v58, %v2360_v14  ;;  %v3591_v17 = vrot.slane %v3493_v29, 2  ;;  %v8259_v14 = vld [vmem:[#allocation28_spill] sm:$0xff] }
 0x25d   : > { %v2909_v26 = vadd.f32 %v2805_v46, %v5681_v23  ;;  %v2910_v43 = vadd.f32 %v2807_v2, %v2668_v41  ;;  %v3047_v55 = vsel %vm2484_vm3, %v8251_v37, %v3046_v52  ;;  %v3350_v34 = vsel %vm2241_vm2, %v8252_v7, %v3349_v0  ;;  %v8255_v41 = vld [vmem:[#allocation16_spill] sm:$0xff]  ;;  %v8260_v2 = vld [vmem:[#allocation42_spill] sm:$0xff] }
 0x25e   : > { %v3352_v63 = vsel %vm2241_vm2, %v3349_v0, %v8254_v48  ;;  %v3457_v6 = vadd.f32 %v3350_v34, %v5718_v38  ;;  %v1803_v23 = vmax.f32 %v1749_v11, 0.0  ;;  %v1642_v25 = vadd.f32 %v1588_v61, %v8255_v41 }
 0x25f   : > { %v3151_v13 = vadd.f32 %v3047_v55, %v2909_v26  ;;  %v3458_v56 = vadd.f32 %v3352_v63, %v3216_v28  ;;  %v8256_v50 = vrot.slane %v5471_v9, 2  ;;  %v8258_v5 = vrot.slane %v8257_v15, 2  ;;  %v8262_v55 = vld [vmem:[#allocation70_spill] sm:$0xff]  ;;  %v1434_v63 = vpop.permute.xlu0 %1433  ;;  %v1414_v15 = vpop.permute.xlu1 %1413 }
 0x260   : > { %v1632_v10 = vadd.f32 %v1578_v4, %v8259_v14  ;;  %v8261_v0 = vrot.slane %v8260_v2, 2  ;;  %v1857_v28 = vmin.f32 %v1803_v23, 6.0  ;;  %v1700_v11 = vadd.f32 %v5150_v44, %v1642_v25 }
 0x261   : > { %v3592_v46 = vsel %vm2484_vm3, %v8256_v50, %v3591_v17  ;;  %v3594_v58 = vsel %vm2484_vm3, %v3591_v17, %v8258_v5  ;;  %v5823_v37 = vadd.f32 %v5585_v16, %v2603_v18  ;;  %v8263_v7 = vrot.slane %v8262_v55, 2 }
 0x262   : > { %v2504_v38 = vsel %vm2484_vm3, %v2501_v1, %v8261_v0  ;;  %v3699_v29 = vadd.f32 %v3592_v46, %v3457_v6  ;;  %v3700_v26 = vadd.f32 %v3594_v58, %v3458_v56  ;;  %v1690_v61 = vadd.f32 %v5150_v44, %v1632_v10 }
 0x263   : > { %v5820_v9 = vadd.f32 %v2504_v38, %v2361_v42  ;;  %v3049_v4 = vsel %vm2484_vm3, %v3046_v52, %v8263_v7  ;;  %v1911_v32 = vmul.f32 %v1857_v28, %v5604_v3  ;;  %v1754_v48 = vadd.f32 3.0, %v1700_v11  ;;  %v5863_v28 = vld [vmem:[%s7819_s1 + $0x3] ss:$0 sm:$0xff] }
 0x264   : > { %v3735_v34 = vadd.f32 %v5662_v59, %v3699_v29  ;;  %v3736_v1 = vadd.f32 %v5662_v59, %v3700_v26  ;;  %v5833_v44 = vmul.f32 %v5280_v45, %v5725_v19  ;;  %v1744_v42 = vadd.f32 3.0, %v1690_v61  ;;  %v8265_v29 = vld [vmem:[#allocation20_spill] sm:$0xff] }
 0x265   : > { %v5835_v6 = vadd.f32 %v3049_v4, %v2910_v43  ;;  %v5838_v16 = vadd.f32 %v5591_v12, %v3151_v13  ;;  %v1965_v17 = vmul.f32 0.16666667, %v1911_v32  ;;  %v1808_v56 = vmax.f32 %v1754_v48, 0.0  ;;  %v1454_v13 = vpop.permute.xlu2 %1453 }
 0x266   : > { %v3767_v18 = vadd.f32 3.0, %v3735_v34  ;;  %v3768_v52 = vadd.f32 3.0, %v3736_v1  ;;  %v5844_v41 = vmul.f32 %v5298_v27, %v5725_v19  ;;  %v1586_v25 = vmul.f32 %v5136_v36, %v1434_v63 }
 0x267   : > { %v2041_v12 = vsel %vm2005_vm0, %v1965_v17, 0.0  ;;  %v1862_v14 = vmin.f32 %v1808_v56, 6.0  ;;  %v1798_v10 = vmax.f32 %v1744_v42, 0.0  ;;  %v1591_v55 = vmul.f32 %v5863_v28, %v1454_v13 }
 0x268   : > { %8264 = vst [vmem:[#allocation47_spill] sm:$0xff] %v5844_v41  ;;  %v3799_v50 = vmax.f32 %v3767_v18, 0.0  ;;  %v3800_v46 = vmax.f32 %v3768_v52, 0.0  ;;  %v5853_v0 = vmul.f32 %v5181_v40, %v2041_v12  ;;  %v5856_v36 = vmul.f32 %v5200_v39, %v2041_v12 }
 0x269   : > { %v1640_v26 = vadd.f32 %v1586_v25, %v8265_v29  ;;  %v1581_v7 = vmul.f32 %v5863_v28, %v1414_v15  ;;  %v5868_v40 = vmul.f32 %v5193_v51, %v2041_v12  ;;  %v5871_v48 = vmul.f32 %v5221_v49, %v2041_v12 }
 0x26a   : > { %v3831_v2 = vmin.f32 %v3799_v50, 6.0  ;;  %v3832_v19 = vmin.f32 %v3800_v46, 6.0  ;;  %v5874_v63 = vmul.f32 %v5227_v60, %v2041_v12  ;;  %v5877_v42 = vmul.f32 %v5236_v31, %v2041_v12  ;;  %v5887_v46 = vld [vmem:[%s7820_s2] ss:$0 sm:$0xff] }
 0x26b   : > { %v1916_v18 = vmul.f32 %v1862_v14, %v1700_v11  ;;  %v1852_v52 = vmin.f32 %v1798_v10, 6.0  ;;  %v5882_v51 = vmul.f32 %v5286_v35, %v2041_v12  ;;  %v5890_v11 = vadd.f32 %v5887_v46, %v1640_v26 }
 0x26c   : > { %v3863_v4 = vmul.f32 %v3831_v2, %v3735_v34  ;;  %v3864_v32 = vmul.f32 %v3832_v19, %v3736_v1  ;;  %v5894_v10 = vmul.f32 %v5280_v45, %v2041_v12 }
 0x26d   : > { %v1970_v25 = vmul.f32 0.16666667, %v1916_v18  ;;  %v1906_v50 = vmul.f32 %v1852_v52, %v1690_v61  ;;  %v8266_v18 = vld [vmem:[#allocation61_spill] sm:$0xff] }
 0x26e   : > { %v3895_v17 = vmul.f32 0.16666667, %v3863_v4  ;;  %v3896_v56 = vmul.f32 0.16666667, %v3864_v32  ;;  %v5905_v32 = vmul.f32 %v5298_v27, %v2041_v12  ;;  %v1645_v52 = vadd.f32 %v1591_v55, %v8266_v18  ;;  %v5947_v18 = vld [vmem:[%s7821_s3 + $0x2] ss:$0 sm:$0xff] }
 0x26f   : > { %v2046_v19 = vsel %vm2016_vm1, %v1970_v25, 0.0  ;;  %v1960_v29 = vmul.f32 0.16666667, %v1906_v50  ;;  %v8268_v50 = vld [vmem:[#allocation59_spill] sm:$0xff] }
 0x270   : > { %v3927_v13 = vpack.c.bf16 %v3895_v17, %v3895_v17  ;;  %v3928_v15 = vpack.c.bf16 %v3896_v56, %v3896_v56  ;;  %v3994_v14 = vsel %vm3990_vm4, %v3895_v17, 0.0  ;;  %v3996_v26 = vsel %vm3990_vm4, %v3896_v56, 0.0  ;;  %v5915_v17 = vld [vmem:[%s7821_s3 + $0x1] ss:$0 sm:$0xff] }
 0x271   : > { %v3995_v2 = vadd.f32 %v3994_v14, %v5764_v53  ;;  %v5918_v25 = vmul.f32 %v5915_v17, %v2046_v19  ;;  %v1752_v56 = vadd.f32 3.0, %v5890_v11  ;;  %v5923_v12 = vmul.f32 %v5200_v39, %v2046_v19 }
 0x272   : > { %3960 = vst.msk [vmem:[%s5757_s14 + $0x8] sm:$0xf] %vm3957_vm5, %v3927_v13  ;;  %v1635_v13 = vadd.f32 %v1581_v7, %v8268_v50  ;;  %v5926_v55 = vmul.f32 %v5227_v60, %v2046_v19  ;;  %v5932_v14 = vmul.f32 %v5280_v45, %v2046_v19  ;;  %v2158_v7 = vmul.f32 %v5915_v17, %v1960_v29 }
 0x273   : > { %3961 = vst.msk [vmem:[%s5757_s14 + $0xc] sm:$0xf] %vm3957_vm5, %v3928_v15  ;;  %v5910_v53 = vadd.f32 %v3996_v26, %v3995_v2  ;;  %v5929_v15 = vmul.f32 %v5236_v31, %v2046_v19  ;;  %v5935_v2 = vmul.f32 %v5298_v27, %v2046_v19  ;;  %v5940_v26 = vld [vmem:[%s7821_s3] ss:$0 sm:$0xff]  ;;  %v2401_v50 = vmul.f32 %v5947_v18, %v1960_v29 }
 0x274   : > { %8267 = vst [vmem:[#allocation58_spill] sm:$0xff] %v5918_v25  ;;  %v2088_v39 = vmul.f32 %v5940_v26, %v1960_v29  ;;  %v2638_v5 = vmul.f32 %v5221_v49, %v1960_v29  ;;  %v2707_v19 = vmul.f32 %v5227_v60, %v1960_v29  ;;  %v2949_v3 = vmul.f32 %v5236_v31, %v1960_v29 }
 0x275   : > { %8269 = vst [vmem:[#allocation50_spill] sm:$0xff] %v5923_v12  ;;  %v3186_v38 = vmul.f32 %v5286_v35, %v1960_v29  ;;  %v2263_v58 = vrot.slane %v2158_v7, 1  ;;  %v2506_v4 = vrot.slane %v2401_v50, 2  ;;  %v3254_v43 = vmul.f32 %v5280_v45, %v1960_v29 }
 0x276   : > { %8270 = vst [vmem:[#allocation53_spill] sm:$0xff] %v5926_v55  ;;  %v3496_v61 = vmul.f32 %v5298_v27, %v1960_v29  ;;  %v2670_v1 = vadd.f32 %v2638_v5, %v5820_v9  ;;  %v2809_v23 = vrot.slane %v2707_v19, 1  ;;  %v3051_v34 = vrot.slane %v2949_v3, 2  ;;  %v8277_v5 = vld [vmem:[#allocation9_spill] sm:$0xff] }
 0x277   : > { %8271 = vst [vmem:[#allocation8_spill] sm:$0xff] %v5929_v15  ;;  %v3218_v8 = vadd.f32 %v3186_v38, %v5835_v6  ;;  %v8274_v49 = vrot.slane %v5560_v57, 1  ;;  %v8275_v31 = vrot.slane %v5476_v22, 1  ;;  %v8276_v7 = vrot.slane %v5563_v33, 2  ;;  %v8279_v38 = vld [vmem:[#allocation13_spill] sm:$0xff] }
 0x278   : > { %8272 = vst [vmem:[#allocation46_spill] sm:$0xff] %v5932_v14  ;;  %v3354_v50 = vrot.slane %v3254_v43, 1  ;;  %v8278_v3 = vrot.slane %v8277_v5, 1  ;;  %v8280_v57 = vrot.slane %v8279_v38, 1  ;;  %v8311_v55 = vld [vmem:[#allocation81_spill] sm:$0xff] }
 0x279   : > { %8273 = vst [vmem:[#allocation5_spill] sm:$0xff] %v5935_v2  ;;  %v2264_v60 = vsel %vm2241_vm2, %v8274_v49, %v2263_v58  ;;  %v2266_v35 = vsel %vm2241_vm2, %v2263_v58, %v8275_v31  ;;  %v2507_v45 = vsel %vm2484_vm3, %v8276_v7, %v2506_v4  ;;  %v8281_v58 = vld [vmem:[#allocation10_spill] sm:$0xff]  ;;  %v8283_v31 = vld [vmem:[#allocation51_spill] sm:$0xff] }
 0x27a   : > { %v2362_v27 = vadd.f32 %v2264_v60, %v5582_v20  ;;  %v2363_v9 = vadd.f32 %v2266_v35, %v2088_v39  ;;  %v2810_v6 = vsel %vm2241_vm2, %v8278_v3, %v2809_v23  ;;  %v2812_v29 = vsel %vm2241_vm2, %v2809_v23, %v8280_v57  ;;  %v8285_v60 = vld [vmem:[#allocation74_spill] sm:$0xff]  ;;  %v8306_v2 = vld [vmem:[#allocation3_spill] sm:$0xff] }
 0x27b   : > { %v2911_v22 = vadd.f32 %v2810_v6, %v5823_v37  ;;  %v2912_v19 = vadd.f32 %v2812_v29, %v2670_v1  ;;  %v8282_v49 = vrot.slane %v8281_v58, 2  ;;  %v8284_v43 = vrot.slane %v8283_v31, 1  ;;  %v8287_v6 = vld [vmem:[#allocation14_spill] sm:$0xff]  ;;  %v8289_v58 = vld [vmem:[#allocation35_spill] sm:$0xff]  ;;  %v8291_v31 = vld [vmem:[#allocation48_spill] sm:$0xff] }
 0x27c   : > { %v2605_v39 = vadd.f32 %v2507_v45, %v2362_v27  ;;  %v8286_v35 = vrot.slane %v8285_v60, 1  ;;  %v3596_v3 = vrot.slane %v3496_v61, 2  ;;  %v1806_v37 = vmax.f32 %v1752_v56, 0.0  ;;  %v8293_v60 = vld [vmem:[#allocation77_spill] sm:$0xff] }
 0x27d   : > { %v3052_v33 = vsel %vm2484_vm3, %v8282_v49, %v3051_v34  ;;  %v3355_v20 = vsel %vm2241_vm2, %v8284_v43, %v3354_v50  ;;  %v1703_v1 = vadd.f32 %v5887_v46, %v1645_v52  ;;  %v8288_v57 = vrot.slane %v8287_v6, 2  ;;  %v8295_v6 = vld [vmem:[#allocation44_spill] sm:$0xff] }
 0x27e   : > { %v3357_v7 = vsel %vm2241_vm2, %v3354_v50, %v8286_v35  ;;  %v3459_v5 = vadd.f32 %v3355_v20, %v5838_v16  ;;  %v3153_v23 = vadd.f32 %v3052_v33, %v2911_v22  ;;  %v8290_v49 = vrot.slane %v8289_v58, 2  ;;  %v1446_v33 = vpop.permute.xlu0 %1445 }
 0x27f   : > { %v3460_v38 = vadd.f32 %v3357_v7, %v3218_v8  ;;  %v3597_v29 = vsel %vm2484_vm3, %v8288_v57, %v3596_v3  ;;  %v1693_v27 = vadd.f32 %v5887_v46, %v1635_v13  ;;  %v8292_v50 = vrot.slane %v8291_v31, 2 }
 0x280   : > { %v3599_v45 = vsel %vm2484_vm3, %v3596_v3, %v8290_v49  ;;  %v3701_v61 = vadd.f32 %v3597_v29, %v3459_v5  ;;  %v1860_v8 = vmin.f32 %v1806_v37, 6.0  ;;  %v1757_v56 = vadd.f32 3.0, %v1703_v1 }
 0x281   : > { %v2509_v16 = vsel %vm2484_vm3, %v2506_v4, %v8292_v50  ;;  %v3702_v22 = vadd.f32 %v3599_v45, %v3460_v38  ;;  %v1747_v52 = vadd.f32 3.0, %v1693_v27  ;;  %v5999_v20 = vadd.f32 %v5721_v47, %v2605_v39 }
 0x282   : > { %v5996_v43 = vadd.f32 %v2509_v16, %v2363_v9  ;;  %v8294_v35 = vrot.slane %v8293_v60, 2  ;;  %v3737_v13 = vadd.f32 %v5662_v59, %v3701_v61  ;;  %v1914_v4 = vmul.f32 %v1860_v8, %v5890_v11  ;;  %v1466_v16 = vpop.permute.xlu2 %1465  ;;  %v1426_v61 = vpop.permute.xlu1 %1425  ;;  %v6070_v11 = vld [vmem:[%s7821_s3 + $0x8] ss:$0 sm:$0xff] }
 0x283   : > { %v3738_v3 = vadd.f32 %v5662_v59, %v3702_v22  ;;  %v1811_v5 = vmax.f32 %v1757_v56, 0.0  ;;  %v1801_v38 = vmax.f32 %v1747_v52, 0.0  ;;  %v6010_v9 = vadd.f32 %v8295_v6, %v3153_v23 }
 0x284   : > { %v3054_v7 = vsel %vm2484_vm3, %v3051_v34, %v8294_v35  ;;  %v1589_v47 = vmul.f32 %v5863_v28, %v1446_v33  ;;  %v3769_v39 = vadd.f32 3.0, %v3737_v13  ;;  %v1968_v29 = vmul.f32 0.16666667, %v1914_v4 }
 0x285   : > { %v6007_v37 = vadd.f32 %v3054_v7, %v2912_v19  ;;  %v3770_v57 = vadd.f32 3.0, %v3738_v3  ;;  %v1865_v58 = vmin.f32 %v1811_v5, 6.0  ;;  %v1855_v33 = vmin.f32 %v1801_v38, 6.0  ;;  %v8296_v7 = vld [vmem:[#allocation18_spill] sm:$0xff] }
 0x286   : > { %v3801_v31 = vmax.f32 %v3769_v39, 0.0  ;;  %v2044_v23 = vsel %vm2005_vm0, %v1968_v29, 0.0  ;;  %v1643_v4 = vadd.f32 %v1589_v47, %v8296_v7  ;;  %v1594_v39 = vmul.f32 %v5863_v28, %v1466_v16  ;;  %v6038_v38 = vld [vmem:[%s7821_s3 + $0x4] ss:$0 sm:$0xff] }
 0x287   : > { %v3802_v50 = vmax.f32 %v3770_v57, 0.0  ;;  %v1919_v56 = vmul.f32 %v1865_v58, %v1703_v1  ;;  %v6025_v5 = vmul.f32 %v5915_v17, %v2044_v23  ;;  %v6028_v6 = vmul.f32 %v5947_v18, %v2044_v23  ;;  %v6046_v58 = vld [vmem:[%s7821_s3 + $0x5] ss:$0 sm:$0xff] }
 0x288   : > { %v3833_v60 = vmin.f32 %v3801_v31, 6.0  ;;  %v1584_v57 = vmul.f32 %v5863_v28, %v1426_v61  ;;  %v6033_v1 = vmul.f32 %v5940_v26, %v2044_v23  ;;  %v6041_v47 = vmul.f32 %v6038_v38, %v2044_v23 }
 0x289   : > { %v3834_v35 = vmin.f32 %v3802_v50, 6.0  ;;  %8297 = vst [vmem:[#allocation26_spill] sm:$0xff] %v6025_v5  ;;  %v6049_v31 = vmul.f32 %v6046_v58, %v2044_v23  ;;  %v1973_v50 = vmul.f32 0.16666667, %v1919_v56  ;;  %v1909_v16 = vmul.f32 %v1855_v33, %v1693_v27  ;;  %v6080_v56 = vld [vmem:[%s7821_s3 + $0x6] ss:$0 sm:$0xff] }
 0x28a   : > { %8298 = vst [vmem:[#allocation39_spill] sm:$0xff] %v6028_v6  ;;  %v3865_v29 = vmul.f32 %v3833_v60, %v3737_v13  ;;  %v6054_v13 = vld [vmem:[%s7821_s3 + $0x7] ss:$0 sm:$0xff]  ;;  %v6073_v52 = vmul.f32 %v6070_v11, %v2044_v23  ;;  %v6083_v33 = vmul.f32 %v6080_v56, %v2044_v23  ;;  %v6099_v12 = vadd.f32 %v5887_v46, %v1643_v4  ;;  %v8313_v6 = vld [vmem:[#allocation79_spill] sm:$0xff] }
 0x28b   : > { %v3866_v22 = vmul.f32 %v3834_v35, %v3738_v3  ;;  %8299 = vst [vmem:[#allocation49_spill] sm:$0xff] %v6033_v1  ;;  %v6057_v3 = vmul.f32 %v6054_v13, %v2044_v23  ;;  %v6062_v35 = vld [vmem:[%s7821_s3 + $0x3] ss:$0 sm:$0xff]  ;;  %v1963_v27 = vmul.f32 0.16666667, %v1909_v16  ;;  %v8308_v16 = vld [vmem:[#allocation23_spill] sm:$0xff] }
 0x28c   : > { %8300 = vst [vmem:[#allocation71_spill] sm:$0xff] %v6041_v47  ;;  %v3897_v61 = vmul.f32 0.16666667, %v3865_v29  ;;  %v6065_v7 = vmul.f32 %v6062_v35, %v2044_v23  ;;  %v6087_v29 = vsel %vm2016_vm1, %v1973_v50, 0.0  ;;  %v8312_v47 = vrot.slane %v8311_v55, 1 }
 0x28d   : > { %8301 = vst [vmem:[#allocation32_spill] sm:$0xff] %v6049_v31  ;;  %v3898_v60 = vmul.f32 0.16666667, %v3866_v22  ;;  %v6117_v4 = vmul.f32 %v6038_v38, %v6087_v29  ;;  %v2710_v50 = vmul.f32 %v6038_v38, %v1963_v27  ;;  %v3188_v15 = vmul.f32 %v6080_v56, %v1963_v27 }
 0x28e   : > { %8302 = vst [vmem:[#allocation68_spill] sm:$0xff] %v6057_v3  ;;  %v3929_v8 = vpack.c.bf16 %v3897_v61, %v3897_v61  ;;  %v3998_v45 = vsel %vm3990_vm4, %v3897_v61, 0.0  ;;  %v1648_v61 = vadd.f32 %v1594_v39, %v8306_v2  ;;  %v6121_v2 = vmul.f32 %v6046_v58, %v6087_v29 }
 0x28f   : > { %8303 = vst [vmem:[#allocation55_spill] sm:$0xff] %v6065_v7  ;;  %v3930_v19 = vpack.c.bf16 %v3898_v60, %v3898_v60  ;;  %v3999_v22 = vadd.f32 %v3998_v45, %v5910_v53  ;;  %v4000_v23 = vsel %vm3990_vm4, %v3898_v60, 0.0  ;;  %v6108_v45 = vmul.f32 %v5915_v17, %v6087_v29  ;;  %v8315_v7 = vld [vmem:[#allocation15_spill] sm:$0xff] }
 0x290   : > { %8304 = vst [vmem:[#allocation7_spill] sm:$0xff] %v6073_v52  ;;  %v1638_v60 = vadd.f32 %v1584_v57, %v8308_v16  ;;  %v2161_v39 = vmul.f32 %v5915_v17, %v1963_v27  ;;  %v2952_v57 = vmul.f32 %v6046_v58, %v1963_v27  ;;  %v3257_v34 = vmul.f32 %v6054_v13, %v1963_v27 }
 0x291   : > { %8305 = vst [vmem:[#allocation6_spill] sm:$0xff] %v6083_v33  ;;  %v6104_v53 = vadd.f32 %v4000_v23, %v3999_v22  ;;  %v2404_v22 = vmul.f32 %v5947_v18, %v1963_v27  ;;  %v2640_v23 = vmul.f32 %v6062_v35, %v1963_v27  ;;  %v3499_v49 = vmul.f32 %v6070_v11, %v1963_v27 }
 0x292   : > { %3962 = vst.msk [vmem:[%s5757_s14 + $0x10] sm:$0xf] %vm3957_vm5, %v3929_v8  ;;  %v6112_v8 = vmul.f32 %v5947_v18, %v6087_v29  ;;  %v2268_v16 = vrot.slane %v2161_v39, 1  ;;  %v2814_v3 = vrot.slane %v2710_v50, 1  ;;  %v3056_v31 = vrot.slane %v2952_v57, 2  ;;  %v8318_v50 = vld [vmem:[#allocation41_spill] sm:$0xff] }
 0x293   : > { %3963 = vst.msk [vmem:[%s5757_s14 + $0x14] sm:$0xf] %vm3957_vm5, %v3930_v19  ;;  %v2090_v19 = vmul.f32 %v5940_v26, %v1963_v27  ;;  %v2511_v52 = vrot.slane %v2404_v22, 2  ;;  %v2672_v14 = vadd.f32 %v2640_v23, %v5996_v43  ;;  %v8314_v25 = vrot.slane %v8313_v6, 1  ;;  %v8316_v27 = vld [vmem:[#allocation78_spill] sm:$0xff] }
 0x294   : > { %8307 = vst [vmem:[#allocation45_spill] sm:$0xff] %v6112_v8  ;;  %v2269_v1 = vsel %vm2241_vm2, %v8312_v47, %v2268_v16  ;;  %v3220_v39 = vadd.f32 %v3188_v15, %v6007_v37  ;;  %v3359_v33 = vrot.slane %v3257_v34, 1  ;;  %v8317_v22 = vrot.slane %v8316_v27, 2  ;;  %v8320_v57 = vld [vmem:[#allocation38_spill] sm:$0xff]  ;;  %v8324_v34 = vld [vmem:[#allocation83_spill] sm:$0xff]  ;;  %v8326_v27 = vld [vmem:[#allocation12_spill] sm:$0xff] }
 0x295   : > { %8309 = vst [vmem:[#allocation72_spill] sm:$0xff] %v6117_v4  ;;  %v2271_v5 = vsel %vm2241_vm2, %v2268_v16, %v8314_v25  ;;  %v2364_v62 = vadd.f32 %v2269_v1, %v8315_v7  ;;  %v8319_v23 = vrot.slane %v8318_v50, 1  ;;  %v8321_v47 = vrot.slane %v8320_v57, 1  ;;  %v8322_v16 = vld [vmem:[#allocation56_spill] sm:$0xff] }
 0x296   : > { %8310 = vst [vmem:[#allocation75_spill] sm:$0xff] %v6121_v2  ;;  %v2365_v41 = vadd.f32 %v2271_v5, %v2090_v19  ;;  %v2512_v43 = vsel %vm2484_vm3, %v8317_v22, %v2511_v52  ;;  %v8323_v15 = vrot.slane %v8322_v16, 2  ;;  %v8325_v5 = vrot.slane %v8324_v34, 1 }
 0x297   : > { %v2815_v55 = vsel %vm2241_vm2, %v8319_v23, %v2814_v3  ;;  %v2817_v6 = vsel %vm2241_vm2, %v2814_v3, %v8321_v47  ;;  %v2607_v7 = vadd.f32 %v2512_v43, %v2364_v62  ;;  %v8327_v22 = vrot.slane %v8326_v27, 1  ;;  %v1458_v43 = vpop.permute.xlu0 %1457 }
 0x298   : > { %v2913_v25 = vadd.f32 %v2815_v55, %v5999_v20  ;;  %v3057_v37 = vsel %vm2484_vm3, %v8323_v15, %v3056_v31  ;;  %v3360_v1 = vsel %vm2241_vm2, %v8325_v5, %v3359_v33  ;;  %v2914_v19 = vadd.f32 %v2817_v6, %v2672_v14  ;;  %v8328_v15 = vld [vmem:[#allocation76_spill] sm:$0xff] }
 0x299   : > { %v3362_v50 = vsel %vm2241_vm2, %v3359_v33, %v8327_v22  ;;  %v3461_v23 = vadd.f32 %v3360_v1, %v6010_v9  ;;  %v3601_v47 = vrot.slane %v3499_v49, 2  ;;  %v1755_v20 = vadd.f32 3.0, %v6099_v12  ;;  %v8330_v33 = vld [vmem:[#allocation80_spill] sm:$0xff] }
 0x29a   : > { %v3155_v57 = vadd.f32 %v3057_v37, %v2913_v25  ;;  %v3462_v3 = vadd.f32 %v3362_v50, %v3220_v39  ;;  %v1706_v55 = vadd.f32 %v5887_v46, %v1648_v61  ;;  %v1696_v16 = vadd.f32 %v5887_v46, %v1638_v60  ;;  %v8332_v39 = vld [vmem:[#allocation54_spill] sm:$0xff] }
 0x29b   : > { %v8329_v34 = vrot.slane %v8328_v15, 2  ;;  %v6168_v14 = vadd.f32 %v5871_v48, %v2607_v7  ;;  %v8331_v6 = vrot.slane %v8330_v33, 2  ;;  %v8333_v49 = vrot.slane %v8332_v39, 2  ;;  %v8334_v48 = vld [vmem:[#allocation11_spill] sm:$0xff]  ;;  %v1438_v39 = vpop.permute.xlu1 %1437 }
 0x29c   : > { %v1809_v37 = vmax.f32 %v1755_v20, 0.0  ;;  %v1760_v1 = vadd.f32 3.0, %v1706_v55  ;;  %v1750_v27 = vadd.f32 3.0, %v1696_v16  ;;  %v8335_v7 = vrot.slane %v8334_v48, 2  ;;  %v8336_v33 = vld [vmem:[#allocation31_spill] sm:$0xff] }
 0x29d   : > { %v2514_v62 = vsel %vm2484_vm3, %v2511_v52, %v8329_v34  ;;  %v3602_v9 = vsel %vm2484_vm3, %v8331_v6, %v3601_v47  ;;  %v3604_v25 = vsel %vm2484_vm3, %v3601_v47, %v8333_v49  ;;  %v1478_v52 = vpop.permute.xlu2 %1477  ;;  %v6182_v15 = vadd.f32 %v5882_v51, %v3155_v57 }
 0x29e   : > { %v6176_v61 = vadd.f32 %v2514_v62, %v2365_v41  ;;  %v3703_v60 = vadd.f32 %v3602_v9, %v3461_v23  ;;  %v3704_v5 = vadd.f32 %v3604_v25, %v3462_v3  ;;  %v1863_v22 = vmin.f32 %v1809_v37, 6.0 }
 0x29f   : > { %v3059_v50 = vsel %vm2484_vm3, %v3056_v31, %v8335_v7  ;;  %v1592_v34 = vmul.f32 %v5863_v28, %v1458_v43  ;;  %v1814_v20 = vmax.f32 %v1760_v1, 0.0  ;;  %v1804_v23 = vmax.f32 %v1750_v27, 0.0  ;;  %v8339_v1 = vld [vmem:[#allocation63_spill] sm:$0xff] }
 0x2a0   : > { %v3739_v47 = vadd.f32 %v5662_v59, %v3703_v60  ;;  %v3740_v41 = vadd.f32 %v5662_v59, %v3704_v5  ;;  %v1917_v3 = vmul.f32 %v1863_v22, %v6099_v12  ;;  %v6188_v62 = vadd.f32 %v3059_v50, %v2914_v19 }
 0x2a1   : > { %v1646_v6 = vadd.f32 %v1592_v34, %v8336_v33  ;;  %v1597_v9 = vmul.f32 %v5863_v28, %v1478_v52  ;;  %v6194_v51 = vmul.f32 %v6054_v13, %v6087_v29  ;;  %v1868_v43 = vmin.f32 %v1814_v20, 6.0 }
 0x2a2   : > { %v3771_v31 = vadd.f32 3.0, %v3739_v47  ;;  %v3772_v57 = vadd.f32 3.0, %v3740_v41  ;;  %v6199_v25 = vmul.f32 %v6070_v11, %v6087_v29  ;;  %v1971_v12 = vmul.f32 0.16666667, %v1917_v3 }
 0x2a3   : > { %8337 = vst [vmem:[#allocation73_spill] sm:$0xff] %v6194_v51  ;;  %v1858_v19 = vmin.f32 %v1804_v23, 6.0  ;;  %v6202_v5 = vadd.f32 %v5887_v46, %v1646_v6  ;;  %v1651_v27 = vadd.f32 %v1597_v9, %v8339_v1  ;;  %v1587_v7 = vmul.f32 %v5863_v28, %v1438_v39 }
 0x2a4   : > { %8338 = vst [vmem:[#allocation29_spill] sm:$0xff] %v6199_v25  ;;  %v3803_v37 = vmax.f32 %v3771_v31, 0.0  ;;  %v3804_v60 = vmax.f32 %v3772_v57, 0.0  ;;  %v2047_v48 = vsel %vm2005_vm0, %v1971_v12, 0.0  ;;  %v1922_v20 = vmul.f32 %v1868_v43, %v1706_v55 }
 0x2a5   : > { %v6214_v33 = vmul.f32 %v5915_v17, %v2047_v48  ;;  %v1912_v6 = vmul.f32 %v1858_v19, %v1696_v16  ;;  %v6217_v57 = vadd.f32 3.0, %v6202_v5  ;;  %v6220_v39 = vadd.f32 %v5887_v46, %v1651_v27 }
 0x2a6   : > { %v3835_v50 = vmin.f32 %v3803_v37, 6.0  ;;  %v3836_v34 = vmin.f32 %v3804_v60, 6.0  ;;  %v6223_v12 = vmul.f32 %v5947_v18, %v2047_v48  ;;  %v6226_v55 = vmul.f32 %v6038_v38, %v2047_v48  ;;  %v8343_v37 = vld [vmem:[#allocation25_spill] sm:$0xff] }
 0x2a7   : > { %v6229_v43 = vmul.f32 %v6046_v58, %v2047_v48  ;;  %v6232_v60 = vadd.f32 %v1587_v7, %v8343_v37  ;;  %v1976_v19 = vmul.f32 0.16666667, %v1922_v20  ;;  %v6238_v1 = vmul.f32 %v5940_v26, %v2047_v48 }
 0x2a8   : > { %v3867_v9 = vmul.f32 %v3835_v50, %v3739_v47  ;;  %v3868_v31 = vmul.f32 %v3836_v34, %v3740_v41  ;;  %8340 = vst [vmem:[#allocation16_spill] sm:$0xff] %v6223_v12  ;;  %v6235_v41 = vmul.f32 %v6054_v13, %v2047_v48  ;;  %v6242_v50 = vmul.f32 %v6062_v35, %v2047_v48 }
 0x2a9   : > { %8341 = vst [vmem:[#allocation52_spill] sm:$0xff] %v6226_v55  ;;  %v1966_v34 = vmul.f32 0.16666667, %v1912_v6  ;;  %v6251_v52 = vmul.f32 %v6080_v56, %v2047_v48  ;;  %v6255_v3 = vsel %vm2016_vm1, %v1976_v19, 0.0  ;;  %v1763_v19 = vadd.f32 3.0, %v6220_v39 }
 0x2aa   : > { %8342 = vst [vmem:[#allocation28_spill] sm:$0xff] %v6229_v43  ;;  %v3899_v16 = vmul.f32 0.16666667, %v3867_v9  ;;  %v3900_v47 = vmul.f32 0.16666667, %v3868_v31  ;;  %v6246_v31 = vmul.f32 %v6070_v11, %v2047_v48  ;;  %v6277_v23 = vmul.f32 %v5947_v18, %v6255_v3 }
 0x2ab   : > { %8344 = vst [vmem:[#allocation42_spill] sm:$0xff] %v6235_v41  ;;  %v2164_v48 = vmul.f32 %v5915_v17, %v1966_v34  ;;  %v2642_v22 = vmul.f32 %v6062_v35, %v1966_v34  ;;  %v2955_v20 = vmul.f32 %v6046_v58, %v1966_v34  ;;  %v3190_v49 = vmul.f32 %v6080_v56, %v1966_v34 }
 0x2ac   : > { %8345 = vst [vmem:[#allocation70_spill] sm:$0xff] %v6238_v1  ;;  %v3931_v29 = vpack.c.bf16 %v3899_v16, %v3899_v16  ;;  %v3932_v7 = vpack.c.bf16 %v3900_v47, %v3900_v47  ;;  %v4002_v9 = vsel %vm3990_vm4, %v3899_v16, 0.0  ;;  %v4004_v6 = vsel %vm3990_vm4, %v3900_v47, 0.0 }
 0x2ad   : > { %8346 = vst [vmem:[#allocation20_spill] sm:$0xff] %v6246_v31  ;;  %v4003_v37 = vadd.f32 %v4002_v9, %v6104_v53  ;;  %v1812_v9 = vmax.f32 %v6217_v57, 0.0  ;;  %v6273_v47 = vmul.f32 %v5915_v17, %v6255_v3  ;;  %v6286_v57 = vmul.f32 %v6046_v58, %v6255_v3 }
 0x2ae   : > { %3964 = vst.msk [vmem:[%s5757_s14 + $0x18] sm:$0xf] %vm3957_vm5, %v3931_v29  ;;  %v2407_v29 = vmul.f32 %v5947_v18, %v1966_v34  ;;  %v2713_v16 = vmul.f32 %v6038_v38, %v1966_v34  ;;  %v8350_v27 = vrot.slane %v5853_v0, 1  ;;  %v8351_v8 = vrot.slane %v5740_v54, 1 }
 0x2af   : > { %3965 = vst.msk [vmem:[%s5757_s14 + $0x1c] sm:$0xf] %vm3957_vm5, %v3932_v7  ;;  %v6265_v53 = vadd.f32 %v4004_v6, %v4003_v37  ;;  %v2092_v7 = vmul.f32 %v5940_v26, %v1966_v34  ;;  %v6282_v37 = vmul.f32 %v6038_v38, %v6255_v3  ;;  %v2273_v6 = vrot.slane %v2164_v48, 1 }
 0x2b0   : > { %8347 = vst [vmem:[#allocation61_spill] sm:$0xff] %v6277_v23  ;;  %v2516_v31 = vrot.slane %v2407_v29, 2  ;;  %v3260_v48 = vmul.f32 %v6054_v13, %v1966_v34  ;;  %v2674_v43 = vadd.f32 %v2642_v22, %v6176_v61  ;;  %v2819_v4 = vrot.slane %v2713_v16, 1  ;;  %v8381_v23 = vld [vmem:[#allocation26_spill] sm:$0xff] }
 0x2b1   : > { %8348 = vst [vmem:[#allocation59_spill] sm:$0xff] %v6282_v37  ;;  %v2274_v2 = vsel %vm2241_vm2, %v8350_v27, %v2273_v6  ;;  %v2276_v25 = vsel %vm2241_vm2, %v2273_v6, %v8351_v8  ;;  %v8352_v55 = vrot.slane %v5856_v36, 2  ;;  %v3061_v0 = vrot.slane %v2955_v20, 2  ;;  %v8359_v20 = vld [vmem:[#allocation47_spill] sm:$0xff] }
 0x2b2   : > { %8349 = vst [vmem:[#allocation9_spill] sm:$0xff] %v6286_v57  ;;  %v2366_v51 = vadd.f32 %v2274_v2, %v5868_v40  ;;  %v2367_v41 = vadd.f32 %v2276_v25, %v2092_v7  ;;  %v3222_v27 = vadd.f32 %v3190_v49, %v6188_v62  ;;  %v3364_v12 = vrot.slane %v3260_v48, 1  ;;  %v8385_v37 = vld [vmem:[#allocation39_spill] sm:$0xff] }
 0x2b3   : > { %v2517_v1 = vsel %vm2484_vm3, %v8352_v55, %v2516_v31  ;;  %v8353_v8 = vrot.slane %v5874_v63, 1  ;;  %v8354_v6 = vrot.slane %v5748_v24, 1  ;;  %v3502_v2 = vmul.f32 %v6070_v11, %v1966_v34 }
 0x2b4   : > { %v2609_v54 = vadd.f32 %v2517_v1, %v2366_v51  ;;  %v8355_v25 = vrot.slane %v5877_v42, 2  ;;  %v8356_v62 = vrot.slane %v5894_v10, 1  ;;  %v8357_v63 = vrot.slane %v5833_v44, 1 }
 0x2b5   : > { %v2820_v29 = vsel %vm2241_vm2, %v8353_v8, %v2819_v4  ;;  %v2822_v40 = vsel %vm2241_vm2, %v2819_v4, %v8354_v6  ;;  %v3606_v4 = vrot.slane %v3502_v2, 2  ;;  %v1866_v55 = vmin.f32 %v1812_v9, 6.0 }
 0x2b6   : > { %v2915_v61 = vadd.f32 %v2820_v29, %v6168_v14  ;;  %v2916_v36 = vadd.f32 %v2822_v40, %v2674_v43  ;;  %v3062_v22 = vsel %vm2484_vm3, %v8355_v25, %v3061_v0  ;;  %v3365_v51 = vsel %vm2241_vm2, %v8356_v62, %v3364_v12  ;;  %v8364_v29 = vld [vmem:[#allocation55_spill] sm:$0xff]  ;;  %v8365_v40 = vld [vmem:[#allocation82_spill] sm:$0xff] }
 0x2b7   : > { %v3367_v49 = vsel %vm2241_vm2, %v3364_v12, %v8357_v63  ;;  %v3463_v24 = vadd.f32 %v3365_v51, %v6182_v15  ;;  %v1817_v14 = vmax.f32 %v1763_v19, 0.0  ;;  %v6326_v42 = vadd.f32 %v5887_v46, %v6232_v60  ;;  %v8361_v15 = vld [vmem:[#allocation57_spill] sm:$0xff]  ;;  %v8368_v51 = vld [vmem:[#allocation6_spill] sm:$0xff] }
 0x2b8   : > { %v3157_v1 = vadd.f32 %v3062_v22, %v2915_v61  ;;  %v3464_v34 = vadd.f32 %v3367_v49, %v3222_v27  ;;  %v8358_v43 = vrot.slane %v5905_v32, 2  ;;  %v8360_v16 = vrot.slane %v8359_v20, 2 }
 0x2b9   : > { %v1920_v12 = vmul.f32 %v1866_v55, %v6202_v5  ;;  %v8362_v7 = vrot.slane %v8361_v15, 2  ;;  %v6340_v19 = vmul.f32 %v6054_v13, %v6255_v3  ;;  %v1871_v27 = vmin.f32 %v1817_v14, 6.0 }
 0x2ba   : > { %v3607_v10 = vsel %vm2484_vm3, %v8358_v43, %v3606_v4  ;;  %v3609_v44 = vsel %vm2484_vm3, %v3606_v4, %v8360_v16  ;;  %v6345_v6 = vadd.f32 %v8364_v29, %v2609_v54  ;;  %v8366_v2 = vrot.slane %v8365_v40, 2  ;;  %v1490_v29 = vpop.permute.xlu2 %1489 }
 0x2bb   : > { %v2519_v9 = vsel %vm2484_vm3, %v2516_v31, %v8362_v7  ;;  %8363 = vst [vmem:[#allocation13_spill] sm:$0xff] %v6340_v19  ;;  %v3705_v60 = vadd.f32 %v3607_v10, %v3463_v24  ;;  %v3706_v48 = vadd.f32 %v3609_v44, %v3464_v34  ;;  %v1974_v32 = vmul.f32 0.16666667, %v1920_v12  ;;  %v8383_v19 = vld [vmem:[#allocation58_spill] sm:$0xff] }
 0x2bc   : > { %v6342_v8 = vadd.f32 %v2519_v9, %v2367_v41  ;;  %v3064_v5 = vsel %vm2484_vm3, %v3061_v0, %v8366_v2  ;;  %v6352_v31 = vmul.f32 %v6070_v11, %v6255_v3  ;;  %v1753_v22 = vadd.f32 3.0, %v6326_v42  ;;  %v1470_v0 = vpop.permute.xlu0 %1469 }
 0x2bd   : > { %v3741_v61 = vadd.f32 %v5662_v59, %v3705_v60  ;;  %v3742_v25 = vadd.f32 %v5662_v59, %v3706_v48  ;;  %v2050_v54 = vsel %vm2005_vm0, %v1974_v32, 0.0  ;;  %v6360_v62 = vadd.f32 %v3064_v5, %v2916_v36 }
 0x2be   : > { %8367 = vst [vmem:[#allocation10_spill] sm:$0xff] %v6352_v31  ;;  %v6363_v63 = vadd.f32 %v8368_v51, %v3157_v1  ;;  %v1925_v4 = vmul.f32 %v1871_v27, %v6220_v39  ;;  %v6371_v14 = vmul.f32 %v5915_v17, %v2050_v54  ;;  %v1807_v10 = vmax.f32 %v1753_v22, 0.0 }
 0x2bf   : > { %v3773_v49 = vadd.f32 3.0, %v3741_v61  ;;  %v3774_v24 = vadd.f32 3.0, %v3742_v25  ;;  %v6375_v20 = vmul.f32 %v5947_v18, %v2050_v54  ;;  %v6378_v16 = vmul.f32 %v6038_v38, %v2050_v54 }
 0x2c0   : > { %v6381_v39 = vmul.f32 %v6046_v58, %v2050_v54  ;;  %v1595_v44 = vmul.f32 %v5863_v28, %v1470_v0  ;;  %v6385_v7 = vmul.f32 %v5940_v26, %v2050_v54  ;;  %v1979_v9 = vmul.f32 0.16666667, %v1925_v4 }
 0x2c1   : > { %v3805_v1 = vmax.f32 %v3773_v49, 0.0  ;;  %v3806_v43 = vmax.f32 %v3774_v24, 0.0  ;;  %8369 = vst [vmem:[#allocation51_spill] sm:$0xff] %v6378_v16  ;;  %v6389_v48 = vmul.f32 %v6062_v35, %v2050_v54  ;;  %v6392_v27 = vmul.f32 %v6054_v13, %v2050_v54 }
 0x2c2   : > { %8370 = vst [vmem:[#allocation74_spill] sm:$0xff] %v6381_v39  ;;  %v6395_v32 = vmul.f32 %v6070_v11, %v2050_v54  ;;  %v6398_v5 = vmul.f32 %v6080_v56, %v2050_v54  ;;  %v2055_v22 = vsel %vm2016_vm1, %v1979_v9, 0.0  ;;  %v1861_v24 = vmin.f32 %v1807_v10, 6.0  ;;  %v1450_v9 = vpop.permute.xlu1 %1449 }
 0x2c3   : > { %v3837_v12 = vmin.f32 %v3805_v1, 6.0  ;;  %v3838_v15 = vmin.f32 %v3806_v43, 6.0  ;;  %8371 = vst [vmem:[#allocation14_spill] sm:$0xff] %v6392_v27  ;;  %v8373_v43 = vld [vmem:[#allocation62_spill] sm:$0xff]  ;;  %v6422_v36 = vmul.f32 %v6046_v58, %v2055_v22  ;;  %v8382_v31 = vrot.slane %v8381_v23, 1 }
 0x2c4   : > { %8372 = vst [vmem:[#allocation35_spill] sm:$0xff] %v6395_v32  ;;  %v1649_v55 = vadd.f32 %v1595_v44, %v8373_v43  ;;  %v1482_v10 = vpop.permute.xlu0 %1481  ;;  %v6417_v43 = vmul.f32 %v6038_v38, %v2055_v22  ;;  %v1915_v54 = vmul.f32 %v1861_v24, %v6326_v42  ;;  %v6441_v42 = vmul.f32 %v6070_v11, %v2055_v22 }
 0x2c5   : > { %v3869_v40 = vmul.f32 %v3837_v12, %v3741_v61  ;;  %v3870_v2 = vmul.f32 %v3838_v15, %v3742_v25  ;;  %v1600_v61 = vmul.f32 %v5863_v28, %v1490_v29  ;;  %v6410_v12 = vmul.f32 %v5915_v17, %v2055_v22  ;;  %8375 = vst [vmem:[#allocation77_spill] sm:$0xff] %v6422_v36  ;;  %v8376_v25 = vld [vmem:[#allocation2_spill] sm:$0xff] }
 0x2c6   : > { %v6413_v15 = vmul.f32 %v5947_v18, %v2055_v22  ;;  %v6428_v34 = vadd.f32 %v5887_v46, %v1649_v55  ;;  %v1598_v59 = vmul.f32 %v5863_v28, %v1482_v10  ;;  %8378 = vst [vmem:[#allocation18_spill] sm:$0xff] %v6441_v42  ;;  %v1969_v24 = vmul.f32 0.16666667, %v1915_v54 }
 0x2c7   : > { %v3901_v4 = vmul.f32 0.16666667, %v3869_v40  ;;  %v3902_v1 = vmul.f32 0.16666667, %v3870_v2  ;;  %v1654_v49 = vadd.f32 %v1600_v61, %v8376_v25  ;;  %v8379_v61 = vld [vmem:[#allocation60_spill] sm:$0xff]  ;;  %v8384_v27 = vrot.slane %v8383_v19, 1 }
 0x2c8   : > { %8374 = vst [vmem:[#allocation48_spill] sm:$0xff] %v6413_v15  ;;  %v1761_v55 = vadd.f32 3.0, %v6428_v34  ;;  %v2716_v54 = vmul.f32 %v6038_v38, %v1969_v24  ;;  %v3263_v0 = vmul.f32 %v6054_v13, %v1969_v24  ;;  %v8415_v36 = vrot.slane %v6108_v45, 1 }
 0x2c9   : > { %v3933_v40 = vpack.c.bf16 %v3901_v4, %v3901_v4  ;;  %v3934_v2 = vpack.c.bf16 %v3902_v1, %v3902_v1  ;;  %v4006_v44 = vsel %vm3990_vm4, %v3901_v4, 0.0  ;;  %v4008_v3 = vsel %vm3990_vm4, %v3902_v1, 0.0 }
 0x2ca   : > { %v4007_v29 = vadd.f32 %v4006_v44, %v6265_v53  ;;  %v1590_v4 = vmul.f32 %v5863_v28, %v1450_v9  ;;  %v6438_v1 = vmul.f32 %v6054_v13, %v2055_v22  ;;  %v8380_v9 = vld [vmem:[#allocation21_spill] sm:$0xff]  ;;  %v2410_v44 = vmul.f32 %v5947_v18, %v1969_v24 }
 0x2cb   : > { %3966 = vst.msk [vmem:[%s5757_s14 + $0x20] sm:$0xf] %vm3957_vm5, %v3933_v40  ;;  %v6445_v40 = vadd.f32 %v5887_v46, %v1654_v49  ;;  %v6449_v10 = vadd.f32 %v1598_v59, %v8380_v9  ;;  %v2644_v22 = vmul.f32 %v6062_v35, %v1969_v24  ;;  %v3192_v49 = vmul.f32 %v6080_v56, %v1969_v24 }
 0x2cc   : > { %3967 = vst.msk [vmem:[%s5757_s14 + $0x24] sm:$0xf] %vm3957_vm5, %v3934_v2  ;;  %v6435_v53 = vadd.f32 %v4008_v3, %v4007_v29  ;;  %v1644_v25 = vadd.f32 %v1590_v4, %v8379_v61  ;;  %v2094_v3 = vmul.f32 %v5940_v26, %v1969_v24  ;;  %v2167_v2 = vmul.f32 %v5915_v17, %v1969_v24 }
 0x2cd   : > { %8377 = vst [vmem:[#allocation44_spill] sm:$0xff] %v6438_v1  ;;  %v2958_v29 = vmul.f32 %v6046_v58, %v1969_v24  ;;  %v2521_v61 = vrot.slane %v2410_v44, 2  ;;  %v2676_v59 = vadd.f32 %v2644_v22, %v6342_v8  ;;  %v3505_v9 = vmul.f32 %v6070_v11, %v1969_v24  ;;  %v8387_v22 = vld [vmem:[#allocation49_spill] sm:$0xff] }
 0x2ce   : > { %v2278_v4 = vrot.slane %v2167_v2, 1  ;;  %v2824_v51 = vrot.slane %v2716_v54, 1  ;;  %v3224_v60 = vadd.f32 %v3192_v49, %v6360_v62  ;;  %v3369_v57 = vrot.slane %v3263_v0, 1  ;;  %v8390_v0 = vld [vmem:[#allocation53_spill] sm:$0xff] }
 0x2cf   : > { %v3066_v41 = vrot.slane %v2958_v29, 2  ;;  %v8386_v2 = vrot.slane %v8385_v37, 2  ;;  %v3611_v8 = vrot.slane %v3505_v9, 2  ;;  %v8388_v29 = vld [vmem:[#allocation71_spill] sm:$0xff]  ;;  %v8391_v23 = vrot.slane %v8390_v0, 1 }
 0x2d0   : > { %v2279_v32 = vsel %vm2241_vm2, %v8382_v31, %v2278_v4  ;;  %v2281_v39 = vsel %vm2241_vm2, %v2278_v4, %v8384_v27  ;;  %v8389_v16 = vrot.slane %v8388_v29, 1  ;;  %v8392_v27 = vld [vmem:[#allocation32_spill] sm:$0xff]  ;;  %v8398_v0 = vld [vmem:[#allocation7_spill] sm:$0xff] }
 0x2d1   : > { %v2522_v44 = vsel %vm2484_vm3, %v8386_v2, %v2521_v61  ;;  %v2368_v24 = vadd.f32 %v2279_v32, %v8387_v22  ;;  %v2369_v54 = vadd.f32 %v2281_v39, %v2094_v3  ;;  %v2827_v31 = vsel %vm2241_vm2, %v2824_v51, %v8391_v23  ;;  %v8394_v2 = vld [vmem:[#allocation68_spill] sm:$0xff]  ;;  %v8396_v3 = vld [vmem:[#allocation46_spill] sm:$0xff]  ;;  %v8400_v23 = vld [vmem:[#allocation5_spill] sm:$0xff] }
 0x2d2   : > { %v2825_v62 = vsel %vm2241_vm2, %v8389_v16, %v2824_v51  ;;  %v2918_v49 = vadd.f32 %v2827_v31, %v2676_v59  ;;  %v8393_v4 = vrot.slane %v8392_v27, 2  ;;  %v8395_v9 = vrot.slane %v8394_v2, 1 }
 0x2d3   : > { %v2917_v19 = vadd.f32 %v2825_v62, %v6345_v6  ;;  %v2611_v39 = vadd.f32 %v2522_v44, %v2368_v24  ;;  %v8397_v22 = vrot.slane %v8396_v3, 1  ;;  %v8399_v51 = vrot.slane %v8398_v0, 2 }
 0x2d4   : > { %v3067_v37 = vsel %vm2484_vm3, %v8393_v4, %v3066_v41  ;;  %v3370_v32 = vsel %vm2241_vm2, %v8395_v9, %v3369_v57  ;;  %v8401_v31 = vrot.slane %v8400_v23, 2  ;;  %v1815_v4 = vmax.f32 %v1761_v55, 0.0  ;;  %v8402_v9 = vld [vmem:[#allocation50_spill] sm:$0xff] }
 0x2d5   : > { %v3372_v16 = vsel %vm2241_vm2, %v3369_v57, %v8397_v22  ;;  %v3465_v29 = vadd.f32 %v3370_v32, %v6363_v63  ;;  %v3612_v6 = vsel %vm2484_vm3, %v8399_v51, %v3611_v8  ;;  %v3159_v59 = vadd.f32 %v3067_v37, %v2917_v19  ;;  %v6508_v55 = vld [vmem:[%s7822_s4] ss:$0 sm:$0xff]  ;;  %v8404_v37 = vld [vmem:[#allocation8_spill] sm:$0xff]  ;;  %v1462_v51 = vpop.permute.xlu1 %1461 }
 0x2d6   : > { %v3466_v62 = vadd.f32 %v3372_v16, %v3224_v60  ;;  %v3614_v27 = vsel %vm2484_vm3, %v3611_v8, %v8401_v31  ;;  %v1766_v44 = vadd.f32 3.0, %v6445_v40  ;;  %v1702_v24 = vadd.f32 %v5887_v46, %v1644_v25 }
 0x2d7   : > { %v3707_v2 = vadd.f32 %v3612_v6, %v3465_v29  ;;  %v8403_v57 = vrot.slane %v8402_v9, 2  ;;  %v1869_v3 = vmin.f32 %v1815_v4, 6.0  ;;  %v6503_v60 = vadd.f32 %v6242_v50, %v2611_v39  ;;  %v1502_v39 = vpop.permute.xlu2 %1501 }
 0x2d8   : > { %v3708_v32 = vadd.f32 %v3614_v27, %v3466_v62  ;;  %v1820_v19 = vmax.f32 %v1766_v44, 0.0  ;;  %v1756_v25 = vadd.f32 3.0, %v1702_v24  ;;  %v8405_v16 = vrot.slane %v8404_v37, 2 }
 0x2d9   : > { %v2524_v63 = vsel %vm2484_vm3, %v2521_v61, %v8403_v57  ;;  %v3743_v8 = vadd.f32 %v6508_v55, %v3707_v2  ;;  %v6519_v50 = vadd.f32 %v6251_v52, %v3159_v59  ;;  %v6525_v2 = vadd.f32 %v5887_v46, %v6449_v10 }
 0x2da   : > { %v6500_v22 = vadd.f32 %v2524_v63, %v2369_v54  ;;  %v3069_v61 = vsel %vm2484_vm3, %v3066_v41, %v8405_v16  ;;  %v3744_v29 = vadd.f32 %v6508_v55, %v3708_v32  ;;  %v1923_v54 = vmul.f32 %v1869_v3, %v6428_v34 }
 0x2db   : > { %v6516_v0 = vadd.f32 %v3069_v61, %v2918_v49  ;;  %v3775_v23 = vadd.f32 3.0, %v3743_v8  ;;  %v1874_v31 = vmin.f32 %v1820_v19, 6.0  ;;  %v1810_v41 = vmax.f32 %v1756_v25, 0.0 }
 0x2dc   : > { %v3776_v27 = vadd.f32 3.0, %v3744_v29  ;;  %v1977_v4 = vmul.f32 0.16666667, %v1923_v54  ;;  %v1603_v52 = vmul.f32 %v5863_v28, %v1502_v39  ;;  %v1593_v59 = vmul.f32 %v5863_v28, %v1462_v51  ;;  %v8406_v39 = vld [vmem:[#allocation64_spill] sm:$0xff] }
 0x2dd   : > { %v3807_v49 = vmax.f32 %v3775_v23, 0.0  ;;  %v1928_v19 = vmul.f32 %v1874_v31, %v6445_v40  ;;  %v1864_v28 = vmin.f32 %v1810_v41, 6.0  ;;  %v6543_v16 = vadd.f32 3.0, %v6525_v2  ;;  %v8407_v23 = vld [vmem:[#allocation34_spill] sm:$0xff] }
 0x2de   : > { %v3808_v57 = vmax.f32 %v3776_v27, 0.0  ;;  %v2053_v63 = vsel %vm2005_vm0, %v1977_v4, 0.0  ;;  %v1657_v51 = vadd.f32 %v1603_v52, %v8406_v39  ;;  %v6550_v27 = vadd.f32 %v1593_v59, %v8407_v23 }
 0x2df   : > { %v3839_v3 = vmin.f32 %v3807_v49, 6.0  ;;  %v6536_v10 = vmul.f32 %v5915_v17, %v2053_v63  ;;  %v6540_v37 = vmul.f32 %v5947_v18, %v2053_v63  ;;  %v6546_v54 = vmul.f32 %v5940_v26, %v2053_v63 }
 0x2e0   : > { %v3840_v25 = vmin.f32 %v3808_v57, 6.0  ;;  %v6553_v40 = vmul.f32 %v6062_v35, %v2053_v63  ;;  %v6556_v31 = vmul.f32 %v6038_v38, %v2053_v63  ;;  %v6559_v41 = vmul.f32 %v6046_v58, %v2053_v63 }
 0x2e1   : > { %v3871_v61 = vmul.f32 %v3839_v3, %v3743_v8  ;;  %v6563_v57 = vmul.f32 %v6054_v13, %v2053_v63  ;;  %v1982_v52 = vmul.f32 0.16666667, %v1928_v19  ;;  %v6567_v3 = vmul.f32 %v6070_v11, %v2053_v63 }
 0x2e2   : > { %v3872_v4 = vmul.f32 %v3840_v25, %v3744_v29  ;;  %v1918_v25 = vmul.f32 %v1864_v28, %v1702_v24  ;;  %v6595_v9 = vadd.f32 %v5887_v46, %v1657_v51  ;;  %v8414_v8 = vrot.slane %v6214_v33, 1 }
 0x2e3   : > { %v3903_v49 = vmul.f32 0.16666667, %v3871_v61  ;;  %8408 = vst [vmem:[#allocation3_spill] sm:$0xff] %v6567_v3  ;;  %v6571_v61 = vmul.f32 %v6080_v56, %v2053_v63  ;;  %v6575_v44 = vsel %vm2016_vm1, %v1982_v52, 0.0 }
 0x2e4   : > { %v3904_v59 = vmul.f32 0.16666667, %v3872_v4  ;;  %v6581_v32 = vmul.f32 %v5915_v17, %v6575_v44 }
 0x2e5   : > { %v3935_v39 = vpack.c.bf16 %v3903_v49, %v3903_v49  ;;  %v4010_v23 = vsel %vm3990_vm4, %v3903_v49, 0.0  ;;  %v1818_v49 = vmax.f32 %v6543_v16, 0.0  ;;  %v6607_v16 = vmul.f32 %v6046_v58, %v6575_v44 }
 0x2e6   : > { %v3936_v62 = vpack.c.bf16 %v3904_v59, %v3904_v59  ;;  %v4011_v19 = vadd.f32 %v4010_v23, %v6435_v53  ;;  %8409 = vst [vmem:[#allocation23_spill] sm:$0xff] %v6581_v32  ;;  %v4012_v24 = vsel %vm3990_vm4, %v3904_v59, 0.0  ;;  %v1972_v23 = vmul.f32 0.16666667, %v1918_v25 }
 0x2e7   : > { %3968 = vst.msk [vmem:[%s5757_s14 + $0x28] sm:$0xf] %vm3957_vm5, %v3935_v39  ;;  %v6599_v39 = vmul.f32 %v5947_v18, %v6575_v44  ;;  %v6603_v59 = vmul.f32 %v6038_v38, %v6575_v44 }
 0x2e8   : > { %3969 = vst.msk [vmem:[%s5757_s14 + $0x2c] sm:$0xf] %vm3957_vm5, %v3936_v62  ;;  %v6591_v52 = vadd.f32 %v4012_v24, %v4011_v19  ;;  %v6611_v62 = vmul.f32 %v6054_v13, %v6575_v44  ;;  %v2096_v46 = vmul.f32 %v5940_v26, %v1972_v23  ;;  %v2170_v51 = vmul.f32 %v5915_v17, %v1972_v23 }
 0x2e9   : > { %8410 = vst [vmem:[#allocation81_spill] sm:$0xff] %v6599_v39  ;;  %v2413_v19 = vmul.f32 %v5947_v18, %v1972_v23  ;;  %v2646_v24 = vmul.f32 %v6062_v35, %v1972_v23  ;;  %v2719_v53 = vmul.f32 %v6038_v38, %v1972_v23  ;;  %v2961_v28 = vmul.f32 %v6046_v58, %v1972_v23 }
 0x2ea   : > { %8411 = vst [vmem:[#allocation79_spill] sm:$0xff] %v6603_v59  ;;  %v3194_v63 = vmul.f32 %v6080_v56, %v1972_v23  ;;  %v2283_v34 = vrot.slane %v2170_v51, 1  ;;  %v3266_v29 = vmul.f32 %v6054_v13, %v1972_v23  ;;  %v3508_v25 = vmul.f32 %v6070_v11, %v1972_v23  ;;  %v8416_v51 = vld [vmem:[#allocation16_spill] sm:$0xff]  ;;  %v8418_v23 = vld [vmem:[#allocation70_spill] sm:$0xff] }
 0x2eb   : > { %8412 = vst [vmem:[#allocation15_spill] sm:$0xff] %v6607_v16  ;;  %v2526_v4 = vrot.slane %v2413_v19, 2  ;;  %v2678_v26 = vadd.f32 %v2646_v24, %v6500_v22  ;;  %v2829_v6 = vrot.slane %v2719_v53, 1  ;;  %v3071_v17 = vrot.slane %v2961_v28, 2  ;;  %v8419_v53 = vld [vmem:[#allocation52_spill] sm:$0xff] }
 0x2ec   : > { %8413 = vst [vmem:[#allocation78_spill] sm:$0xff] %v6611_v62  ;;  %v3226_v18 = vadd.f32 %v3194_v63, %v6516_v0  ;;  %v2284_v32 = vsel %vm2241_vm2, %v8414_v8, %v2283_v34  ;;  %v2286_v15 = vsel %vm2241_vm2, %v2283_v34, %v8415_v36  ;;  %v8417_v19 = vrot.slane %v8416_v51, 2  ;;  %v8421_v63 = vld [vmem:[#allocation72_spill] sm:$0xff] }
 0x2ed   : > { %v3374_v3 = vrot.slane %v3266_v29, 1  ;;  %v2370_v1 = vadd.f32 %v2284_v32, %v8418_v23  ;;  %v2371_v22 = vadd.f32 %v2286_v15, %v2096_v46  ;;  %v8420_v28 = vrot.slane %v8419_v53, 1  ;;  %v8423_v36 = vld [vmem:[#allocation28_spill] sm:$0xff]  ;;  %v8427_v46 = vld [vmem:[#allocation73_spill] sm:$0xff] }
 0x2ee   : > { %v2527_v42 = vsel %vm2484_vm3, %v8417_v19, %v2526_v4  ;;  %v8422_v33 = vrot.slane %v8421_v63, 1  ;;  %v8424_v34 = vrot.slane %v8423_v36, 2  ;;  %v8425_v19 = vld [vmem:[#allocation42_spill] sm:$0xff]  ;;  %v8428_v23 = vrot.slane %v8427_v46, 1 }
 0x2ef   : > { %v2830_v0 = vsel %vm2241_vm2, %v8420_v28, %v2829_v6  ;;  %v8426_v29 = vrot.slane %v8425_v19, 1  ;;  %v2613_v15 = vadd.f32 %v2527_v42, %v2370_v1  ;;  %v3616_v63 = vrot.slane %v3508_v25, 2  ;;  %v6662_v42 = vld [vmem:[%s7820_s2] ss:$0 sm:$0xff] }
 0x2f0   : > { %v2832_v8 = vsel %vm2241_vm2, %v2829_v6, %v8422_v33  ;;  %v2919_v45 = vadd.f32 %v2830_v0, %v6503_v60  ;;  %v3072_v51 = vsel %vm2484_vm3, %v8424_v34, %v3071_v17  ;;  %v3377_v53 = vsel %vm2241_vm2, %v3374_v3, %v8428_v23  ;;  %v8429_v0 = vld [vmem:[#allocation20_spill] sm:$0xff]  ;;  %v8431_v34 = vld [vmem:[#allocation29_spill] sm:$0xff] }
 0x2f1   : > { %v2920_v24 = vadd.f32 %v2832_v8, %v2678_v26  ;;  %v3375_v32 = vsel %vm2241_vm2, %v8426_v29, %v3374_v3  ;;  %v3468_v33 = vadd.f32 %v3377_v53, %v3226_v18  ;;  %v1872_v60 = vmin.f32 %v1818_v49, 6.0  ;;  %v8433_v3 = vld [vmem:[#allocation45_spill] sm:$0xff]  ;;  %v8435_v53 = vld [vmem:[#allocation75_spill] sm:$0xff] }
 0x2f2   : > { %v3467_v28 = vadd.f32 %v3375_v32, %v6519_v50  ;;  %v3161_v6 = vadd.f32 %v3072_v51, %v2919_v45  ;;  %v1769_v26 = vadd.f32 3.0, %v6595_v9  ;;  %v8430_v8 = vrot.slane %v8429_v0, 2 }
 0x2f3   : > { %v8432_v19 = vrot.slane %v8431_v34, 2  ;;  %v6666_v50 = vadd.f32 %v6662_v42, %v6550_v27  ;;  %v8434_v49 = vrot.slane %v8433_v3, 2  ;;  %v1926_v51 = vmul.f32 %v1872_v60, %v6525_v2 }
 0x2f4   : > { %v3617_v36 = vsel %vm2484_vm3, %v8430_v8, %v3616_v63  ;;  %v1823_v29 = vmax.f32 %v1769_v26, 0.0  ;;  %v6676_v23 = vadd.f32 %v6389_v48, %v2613_v15  ;;  %v6686_v60 = vmul.f32 %v6070_v11, %v6575_v44  ;;  %v6700_v44 = vld [vmem:[%s7821_s3 + $0x1] ss:$0 sm:$0xff] }
 0x2f5   : > { %v3619_v1 = vsel %vm2484_vm3, %v3616_v63, %v8432_v19  ;;  %v2529_v25 = vsel %vm2484_vm3, %v2526_v4, %v8434_v49  ;;  %v3709_v18 = vadd.f32 %v3617_v36, %v3467_v28  ;;  %v1759_v32 = vadd.f32 3.0, %v6666_v50  ;;  %v1494_v36 = vpop.permute.xlu0 %1493  ;;  %v6710_v49 = vld [vmem:[%s7821_s3 + $0x2] ss:$0 sm:$0xff] }
 0x2f6   : > { %v3710_v45 = vadd.f32 %v3619_v1, %v3468_v33  ;;  %v6673_v46 = vadd.f32 %v2529_v25, %v2371_v22  ;;  %v8436_v63 = vrot.slane %v8435_v53, 2  ;;  %v1980_v28 = vmul.f32 0.16666667, %v1926_v51  ;;  %8437 = vst [vmem:[#allocation41_spill] sm:$0xff] %v6686_v60  ;;  %v6725_v51 = vld [vmem:[%s7819_s1 + $0x3] ss:$0 sm:$0xff] }
 0x2f7   : > { %v3745_v0 = vadd.f32 %v6508_v55, %v3709_v18  ;;  %v1877_v33 = vmin.f32 %v1823_v29, 6.0  ;;  %v6691_v48 = vadd.f32 %v6398_v5, %v3161_v6  ;;  %v1813_v6 = vmax.f32 %v1759_v32, 0.0  ;;  %v1514_v18 = vpop.permute.xlu2 %1513 }
 0x2f8   : > { %v3074_v27 = vsel %vm2484_vm3, %v3071_v17, %v8436_v63  ;;  %v3746_v4 = vadd.f32 %v6508_v55, %v3710_v45  ;;  %v2056_v8 = vsel %vm2005_vm0, %v1980_v28, 0.0  ;;  %v1601_v29 = vmul.f32 %v6725_v51, %v1494_v36  ;;  %v6731_v63 = vld [vmem:[%s7821_s3] ss:$0 sm:$0xff] }
 0x2f9   : > { %v6688_v22 = vadd.f32 %v3074_v27, %v2920_v24  ;;  %v3777_v17 = vadd.f32 3.0, %v3745_v0  ;;  %v6703_v24 = vmul.f32 %v6700_v44, %v2056_v8  ;;  %v1931_v5 = vmul.f32 %v1877_v33, %v6595_v9 }
 0x2fa   : > { %v3778_v26 = vadd.f32 3.0, %v3746_v4  ;;  %v6713_v25 = vmul.f32 %v6710_v49, %v2056_v8  ;;  %v6717_v45 = vmul.f32 %v6038_v38, %v2056_v8  ;;  %v6720_v9 = vmul.f32 %v6046_v58, %v2056_v8 }
 0x2fb   : > { %8438 = vst [vmem:[#allocation38_spill] sm:$0xff] %v6703_v24  ;;  %v3809_v1 = vmax.f32 %v3777_v17, 0.0  ;;  %v6734_v27 = vmul.f32 %v6731_v63, %v2056_v8  ;;  %v6737_v28 = vmul.f32 %v6054_v13, %v2056_v8  ;;  %v6741_v17 = vmul.f32 %v6062_v35, %v2056_v8 }
 0x2fc   : > { %v3810_v3 = vmax.f32 %v3778_v26, 0.0  ;;  %8439 = vst [vmem:[#allocation56_spill] sm:$0xff] %v6713_v25  ;;  %v1985_v26 = vmul.f32 0.16666667, %v1931_v5  ;;  %v1867_v36 = vmin.f32 %v1813_v6, 6.0  ;;  %v6745_v2 = vmul.f32 %v6080_v56, %v2056_v8  ;;  %v1474_v5 = vpop.permute.xlu1 %1473 }
 0x2fd   : > { %8440 = vst [vmem:[#allocation83_spill] sm:$0xff] %v6717_v45  ;;  %v3841_v32 = vmin.f32 %v3809_v1, 6.0  ;;  %v6750_v16 = vmul.f32 %v6070_v11, %v2056_v8  ;;  %v1606_v15 = vmul.f32 %v6725_v51, %v1514_v18  ;;  %v8454_v45 = vrot.slane %v6371_v14, 1 }
 0x2fe   : > { %8441 = vst [vmem:[#allocation12_spill] sm:$0xff] %v6720_v9  ;;  %v3842_v53 = vmin.f32 %v3810_v3, 6.0  ;;  %v2061_v35 = vsel %vm2016_vm1, %v1985_v26, 0.0  ;;  %v1921_v8 = vmul.f32 %v1867_v36, %v6666_v50  ;;  %v1506_v50 = vpop.permute.xlu0 %1505 }
 0x2ff   : > { %8442 = vst [vmem:[#allocation76_spill] sm:$0xff] %v6734_v27  ;;  %v3873_v1 = vmul.f32 %v3841_v32, %v3745_v0  ;;  %v8445_v32 = vld [vmem:[#allocation27_spill] sm:$0xff]  ;;  %v6757_v34 = vmul.f32 %v6700_v44, %v2061_v35  ;;  %v6760_v19 = vmul.f32 %v6710_v49, %v2061_v35  ;;  %v6772_v39 = vmul.f32 %v6046_v58, %v2061_v35 }
 0x300   : > { %8443 = vst [vmem:[#allocation80_spill] sm:$0xff] %v6737_v28  ;;  %v3874_v3 = vmul.f32 %v3842_v53, %v3746_v4  ;;  %v1655_v53 = vadd.f32 %v1601_v29, %v8445_v32  ;;  %v6769_v32 = vmul.f32 %v6038_v38, %v2061_v35  ;;  %v6778_v36 = vmul.f32 %v6054_v13, %v2061_v35  ;;  %v8453_v29 = vld [vmem:[#allocation17_spill] sm:$0xff] }
 0x301   : > { %8444 = vst [vmem:[#allocation54_spill] sm:$0xff] %v6750_v16  ;;  %v3905_v6 = vmul.f32 0.16666667, %v3873_v1  ;;  %v6830_v16 = vld [vmem:[%s7821_s3 + $0x8] ss:$0 sm:$0xff] }
 0x302   : > { %v3906_v0 = vmul.f32 0.16666667, %v3874_v3  ;;  %8446 = vst [vmem:[#allocation11_spill] sm:$0xff] %v6757_v34  ;;  %v1596_v3 = vmul.f32 %v6725_v51, %v1474_v5  ;;  %v6781_v5 = vmul.f32 %v6070_v11, %v2061_v35  ;;  %v6796_v11 = vmul.f32 %v6725_v51, %v1506_v50 }
 0x303   : > { %8447 = vst [vmem:[#allocation31_spill] sm:$0xff] %v6760_v19  ;;  %v3937_v26 = vpack.c.bf16 %v3905_v6, %v3905_v6  ;;  %v4014_v1 = vsel %vm3990_vm4, %v3905_v6, 0.0 }
 0x304   : > { %v3938_v33 = vpack.c.bf16 %v3906_v0, %v3906_v0  ;;  %v4015_v4 = vadd.f32 %v4014_v1, %v6591_v52  ;;  %8448 = vst [vmem:[#allocation63_spill] sm:$0xff] %v6769_v32  ;;  %v4016_v18 = vsel %vm3990_vm4, %v3906_v0, 0.0  ;;  %v6784_v52 = vadd.f32 %v6662_v42, %v1655_v53  ;;  %v8452_v1 = vld [vmem:[#allocation43_spill] sm:$0xff]  ;;  %v6804_v53 = vld [vmem:[%s7821_s3 + $0x3] ss:$0 sm:$0xff] }
 0x305   : > { %8449 = vst [vmem:[#allocation25_spill] sm:$0xff] %v6772_v39  ;;  %v1660_v13 = vadd.f32 %v1606_v15, %v8452_v1  ;;  %v1650_v60 = vadd.f32 %v1596_v3, %v8453_v29  ;;  %v6810_v15 = vld [vmem:[%s7821_s3 + $0x4] ss:$0 sm:$0xff]  ;;  %v6816_v29 = vld [vmem:[%s7821_s3 + $0x5] ss:$0 sm:$0xff] }
 0x306   : > { %3970 = vst.msk [vmem:[%s5757_s14 + $0x30] sm:$0xf] %vm3957_vm5, %v3937_v26  ;;  %v6788_v38 = vadd.f32 %v4016_v18, %v4015_v4  ;;  %v1975_v26 = vmul.f32 0.16666667, %v1921_v8  ;;  %v1767_v0 = vadd.f32 3.0, %v6784_v52 }
 0x307   : > { %8450 = vst [vmem:[#allocation47_spill] sm:$0xff] %v6778_v36  ;;  %v6823_v1 = vld [vmem:[%s7821_s3 + $0x7] ss:$0 sm:$0xff] }
 0x308   : > { %8451 = vst [vmem:[#allocation57_spill] sm:$0xff] %v6781_v5  ;;  %v2098_v35 = vmul.f32 %v6731_v63, %v1975_v26  ;;  %v2416_v4 = vmul.f32 %v6710_v49, %v1975_v26  ;;  %v2648_v8 = vmul.f32 %v6804_v53, %v1975_v26  ;;  %v2722_v3 = vmul.f32 %v6810_v15, %v1975_v26 }
 0x309   : > { %3971 = vst.msk [vmem:[%s5757_s14 + $0x34] sm:$0xf] %vm3957_vm5, %v3938_v33  ;;  %v2173_v33 = vmul.f32 %v6700_v44, %v1975_v26  ;;  %v2964_v50 = vmul.f32 %v6816_v29, %v1975_v26  ;;  %v3196_v18 = vmul.f32 %v6080_v56, %v1975_v26  ;;  %v3269_v6 = vmul.f32 %v6823_v1, %v1975_v26 }
 0x30a   : > { %v2531_v19 = vrot.slane %v2416_v4, 2  ;;  %v2680_v34 = vadd.f32 %v2648_v8, %v6673_v46  ;;  %v3511_v62 = vmul.f32 %v6830_v16, %v1975_v26  ;;  %v2834_v28 = vrot.slane %v2722_v3, 1 }
 0x30b   : > { %v2288_v58 = vrot.slane %v2173_v33, 1  ;;  %v3076_v56 = vrot.slane %v2964_v50, 2  ;;  %v3228_v9 = vadd.f32 %v3196_v18, %v6688_v22  ;;  %v3379_v59 = vrot.slane %v3269_v6, 1  ;;  %v8457_v50 = vld [vmem:[#allocation51_spill] sm:$0xff] }
 0x30c   : > { %v8455_v33 = vrot.slane %v6273_v47, 1  ;;  %v8456_v4 = vrot.slane %v6375_v20, 2  ;;  %v3621_v25 = vrot.slane %v3511_v62, 2  ;;  %v8458_v24 = vrot.slane %v8457_v50, 1  ;;  %v8459_v6 = vld [vmem:[#allocation59_spill] sm:$0xff] }
 0x30d   : > { %v2289_v27 = vsel %vm2241_vm2, %v8454_v45, %v2288_v58  ;;  %v8460_v14 = vrot.slane %v8459_v6, 1  ;;  %v8467_v6 = vld [vmem:[#allocation35_spill] sm:$0xff] }
 0x30e   : > { %v2291_v46 = vsel %vm2241_vm2, %v2288_v58, %v8455_v33  ;;  %v2532_v8 = vsel %vm2484_vm3, %v8456_v4, %v2531_v19  ;;  %v2372_v26 = vadd.f32 %v2289_v27, %v6385_v7  ;;  %v2835_v22 = vsel %vm2241_vm2, %v8458_v24, %v2834_v28  ;;  %v8461_v58 = vld [vmem:[#allocation74_spill] sm:$0xff] }
 0x30f   : > { %v2373_v3 = vadd.f32 %v2291_v46, %v2098_v35  ;;  %v2837_v45 = vsel %vm2241_vm2, %v2834_v28, %v8460_v14  ;;  %v2921_v47 = vadd.f32 %v2835_v22, %v6676_v23  ;;  %v8462_v33 = vrot.slane %v8461_v58, 2  ;;  %v8463_v4 = vld [vmem:[#allocation14_spill] sm:$0xff]  ;;  %v8465_v35 = vld [vmem:[#allocation13_spill] sm:$0xff] }
 0x310   : > { %v2922_v18 = vadd.f32 %v2837_v45, %v2680_v34  ;;  %v8464_v62 = vrot.slane %v8463_v4, 1  ;;  %v2615_v27 = vadd.f32 %v2532_v8, %v2372_v26  ;;  %v8466_v46 = vrot.slane %v8465_v35, 1  ;;  %v8469_v14 = vld [vmem:[#allocation10_spill] sm:$0xff] }
 0x311   : > { %v3077_v20 = vsel %vm2484_vm3, %v8462_v33, %v3076_v56  ;;  %v8468_v28 = vrot.slane %v8467_v6, 2  ;;  %v8470_v45 = vrot.slane %v8469_v14, 2  ;;  %v1821_v33 = vmax.f32 %v1767_v0, 0.0 }
 0x312   : > { %v3380_v7 = vsel %vm2241_vm2, %v8464_v62, %v3379_v59  ;;  %v3382_v24 = vsel %vm2241_vm2, %v3379_v59, %v8466_v46  ;;  %v3163_v34 = vadd.f32 %v3077_v20, %v2921_v47  ;;  %v1718_v8 = vadd.f32 %v6662_v42, %v1660_v13  ;;  %v8471_v62 = vld [vmem:[#allocation61_spill] sm:$0xff] }
 0x313   : > { %v3469_v50 = vadd.f32 %v3380_v7, %v6691_v48  ;;  %v3622_v23 = vsel %vm2484_vm3, %v8468_v28, %v3621_v25  ;;  %v3470_v22 = vadd.f32 %v3382_v24, %v3228_v9  ;;  %v3624_v58 = vsel %vm2484_vm3, %v3621_v25, %v8470_v45  ;;  %v8473_v20 = vld [vmem:[#allocation9_spill] sm:$0xff] }
 0x314   : > { %v1708_v26 = vadd.f32 %v6662_v42, %v1650_v60  ;;  %v8472_v59 = vrot.slane %v8471_v62, 2  ;;  %v1875_v35 = vmin.f32 %v1821_v33, 6.0  ;;  %v6875_v9 = vadd.f32 %v6553_v40, %v2615_v27  ;;  %v1526_v60 = vpop.permute.xlu2 %1525 }
 0x315   : > { %v3711_v4 = vadd.f32 %v3622_v23, %v3469_v50  ;;  %v3712_v7 = vadd.f32 %v3624_v58, %v3470_v22  ;;  %v1772_v25 = vadd.f32 3.0, %v1718_v8  ;;  %v8474_v24 = vrot.slane %v8473_v20, 2  ;;  %v1486_v50 = vpop.permute.xlu1 %1485  ;;  %v8475_v22 = vld [vmem:[#allocation37_spill] sm:$0xff] }
 0x316   : > { %v2534_v48 = vsel %vm2484_vm3, %v2531_v19, %v8472_v59  ;;  %v1762_v0 = vadd.f32 3.0, %v1708_v26  ;;  %v1929_v19 = vmul.f32 %v1875_v35, %v6784_v52  ;;  %v1658_v14 = vadd.f32 %v6796_v11, %v8475_v22 }
 0x317   : > { %v6872_v46 = vadd.f32 %v2534_v48, %v2373_v3  ;;  %v3747_v47 = vadd.f32 %v6508_v55, %v3711_v4  ;;  %v3079_v13 = vsel %vm2484_vm3, %v3076_v56, %v8474_v24  ;;  %v3748_v6 = vadd.f32 %v6508_v55, %v3712_v7  ;;  %v8476_v24 = vld [vmem:[#allocation36_spill] sm:$0xff] }
 0x318   : > { %v6883_v28 = vadd.f32 %v3079_v13, %v2922_v18  ;;  %v6886_v3 = vadd.f32 %v6571_v61, %v3163_v34  ;;  %v1826_v27 = vmax.f32 %v1772_v25, 0.0  ;;  %v1816_v23 = vmax.f32 %v1762_v0, 0.0 }
 0x319   : > { %v3779_v40 = vadd.f32 3.0, %v3747_v47  ;;  %v3780_v45 = vadd.f32 3.0, %v3748_v6  ;;  %v1983_v58 = vmul.f32 0.16666667, %v1929_v19  ;;  %v1609_v56 = vmul.f32 %v6725_v51, %v1526_v60  ;;  %v8477_v60 = vld [vmem:[#allocation30_spill] sm:$0xff] }
 0x31a   : > { %v1599_v33 = vmul.f32 %v6725_v51, %v1486_v50  ;;  %v1880_v11 = vmin.f32 %v1826_v27, 6.0  ;;  %v1870_v25 = vmin.f32 %v1816_v23, 6.0  ;;  %v6905_v20 = vadd.f32 %v6662_v42, %v1658_v14 }
 0x31b   : > { %v3811_v61 = vmax.f32 %v3779_v40, 0.0  ;;  %v3812_v62 = vmax.f32 %v3780_v45, 0.0  ;;  %v2059_v59 = vsel %vm2005_vm0, %v1983_v58, 0.0  ;;  %v1663_v13 = vadd.f32 %v1609_v56, %v8476_v24 }
 0x31c   : > { %v6899_v7 = vmul.f32 %v6700_v44, %v2059_v59  ;;  %v6902_v35 = vmul.f32 %v6710_v49, %v2059_v59  ;;  %v1653_v50 = vadd.f32 %v1599_v33, %v8477_v60  ;;  %v6910_v40 = vmul.f32 %v6731_v63, %v2059_v59 }
 0x31d   : > { %v3843_v48 = vmin.f32 %v3811_v61, 6.0  ;;  %v3844_v0 = vmin.f32 %v3812_v62, 6.0  ;;  %v6913_v27 = vmul.f32 %v6804_v53, %v2059_v59  ;;  %v6916_v22 = vmul.f32 %v6810_v15, %v2059_v59 }
 0x31e   : > { %v6921_v58 = vmul.f32 %v6816_v29, %v2059_v59  ;;  %v1934_v33 = vmul.f32 %v1880_v11, %v1718_v8  ;;  %v1924_v61 = vmul.f32 %v1870_v25, %v1708_v26  ;;  %v1770_v24 = vadd.f32 3.0, %v6905_v20 }
 0x31f   : > { %v3875_v19 = vmul.f32 %v3843_v48, %v3747_v47  ;;  %8478 = vst [vmem:[#allocation55_spill] sm:$0xff] %v6916_v22  ;;  %v3876_v45 = vmul.f32 %v3844_v0, %v3748_v6  ;;  %v6924_v47 = vmul.f32 %v6823_v1, %v2059_v59  ;;  %v6929_v48 = vld [vmem:[%s7821_s3 + $0x6] ss:$0 sm:$0xff]  ;;  %v6935_v0 = vmul.f32 %v6830_v16, %v2059_v59 }
 0x320   : > { %8479 = vst [vmem:[#allocation82_spill] sm:$0xff] %v6921_v58  ;;  %v6932_v6 = vmul.f32 %v6929_v48, %v2059_v59  ;;  %v1988_v8 = vmul.f32 0.16666667, %v1934_v33  ;;  %v6940_v26 = vadd.f32 %v6662_v42, %v1663_v13  ;;  %v1978_v52 = vmul.f32 0.16666667, %v1924_v61 }
 0x321   : > { %v3907_v56 = vmul.f32 0.16666667, %v3875_v19  ;;  %8480 = vst [vmem:[#allocation6_spill] sm:$0xff] %v6924_v47  ;;  %v3908_v62 = vmul.f32 0.16666667, %v3876_v45  ;;  %v8489_v58 = vrot.slane %v6540_v37, 2 }
 0x322   : > { %8481 = vst [vmem:[#allocation62_spill] sm:$0xff] %v6935_v0  ;;  %v2100_v34 = vmul.f32 %v6731_v63, %v1978_v52  ;;  %v2650_v45 = vmul.f32 %v6804_v53, %v1978_v52  ;;  %v2725_v14 = vmul.f32 %v6810_v15, %v1978_v52  ;;  %v2967_v23 = vmul.f32 %v6816_v29, %v1978_v52 }
 0x323   : > { %v3939_v60 = vpack.c.bf16 %v3907_v56, %v3907_v56  ;;  %v4018_v19 = vsel %vm3990_vm4, %v3907_v56, 0.0  ;;  %v3940_v11 = vpack.c.bf16 %v3908_v62, %v3908_v62  ;;  %v4020_v59 = vsel %vm3990_vm4, %v3908_v62, 0.0 }
 0x324   : > { %v4019_v25 = vadd.f32 %v4018_v19, %v6788_v38  ;;  %v2064_v56 = vsel %vm2016_vm1, %v1988_v8, 0.0  ;;  %v1775_v19 = vadd.f32 3.0, %v6940_v26  ;;  %v6967_v8 = vadd.f32 %v6662_v42, %v1653_v50 }
 0x325   : > { %3972 = vst.msk [vmem:[%s5757_s14 + $0x38] sm:$0xf] %vm3957_vm5, %v3939_v60  ;;  %v6957_v33 = vmul.f32 %v6700_v44, %v2064_v56  ;;  %v6960_v61 = vmul.f32 %v6710_v49, %v2064_v56  ;;  %v6963_v62 = vmul.f32 %v6810_v15, %v2064_v56  ;;  %v1824_v60 = vmax.f32 %v1770_v24, 0.0 }
 0x326   : > { %3973 = vst.msk [vmem:[%s5757_s14 + $0x3c] sm:$0xf] %vm3957_vm5, %v3940_v11  ;;  %v6953_v13 = vadd.f32 %v4020_v59, %v4019_v25  ;;  %v6970_v11 = vmul.f32 %v6816_v29, %v2064_v56  ;;  %v6973_v25 = vmul.f32 %v6823_v1, %v2064_v56  ;;  %v6976_v59 = vmul.f32 %v6830_v16, %v2064_v56 }
 0x327   : > { %8482 = vst [vmem:[#allocation2_spill] sm:$0xff] %v6957_v33  ;;  %v2176_v38 = vmul.f32 %v6700_v44, %v1978_v52  ;;  %v2419_v50 = vmul.f32 %v6710_v49, %v1978_v52  ;;  %v3198_v56 = vmul.f32 %v6929_v48, %v1978_v52  ;;  %v3272_v5 = vmul.f32 %v6823_v1, %v1978_v52 }
 0x328   : > { %8483 = vst [vmem:[#allocation60_spill] sm:$0xff] %v6960_v61  ;;  %v3514_v18 = vmul.f32 %v6830_v16, %v1978_v52  ;;  %v8487_v24 = vrot.slane %v6536_v10, 1  ;;  %v8488_v33 = vrot.slane %v6410_v12, 1  ;;  %v2682_v0 = vadd.f32 %v2650_v45, %v6872_v46  ;;  %v8494_v45 = vld [vmem:[#allocation44_spill] sm:$0xff] }
 0x329   : > { %8484 = vst [vmem:[#allocation21_spill] sm:$0xff] %v6970_v11  ;;  %v2293_v4 = vrot.slane %v2176_v38, 1  ;;  %v2536_v39 = vrot.slane %v2419_v50, 2  ;;  %v2839_v36 = vrot.slane %v2725_v14, 1  ;;  %v3081_v22 = vrot.slane %v2967_v23, 2 }
 0x32a   : > { %8485 = vst [vmem:[#allocation26_spill] sm:$0xff] %v6973_v25  ;;  %v8490_v52 = vrot.slane %v6556_v31, 1  ;;  %v3384_v46 = vrot.slane %v3272_v5, 1  ;;  %v8492_v37 = vrot.slane %v6559_v41, 2  ;;  %v8493_v23 = vrot.slane %v6563_v57, 1 }
 0x32b   : > { %8486 = vst [vmem:[#allocation58_spill] sm:$0xff] %v6976_v59  ;;  %v2294_v61 = vsel %vm2241_vm2, %v8487_v24, %v2293_v4  ;;  %v2296_v38 = vsel %vm2241_vm2, %v2293_v4, %v8488_v33  ;;  %v2537_v32 = vsel %vm2484_vm3, %v8489_v58, %v2536_v39  ;;  %v8491_v24 = vrot.slane %v6417_v43, 1 }
 0x32c   : > { %v2374_v47 = vadd.f32 %v2294_v61, %v6546_v54  ;;  %v2375_v50 = vadd.f32 %v2296_v38, %v2100_v34  ;;  %v2840_v10 = vsel %vm2241_vm2, %v8490_v52, %v2839_v36  ;;  %v3230_v4 = vadd.f32 %v3198_v56, %v6883_v28  ;;  %v8498_v56 = vld [vmem:[#allocation18_spill] sm:$0xff] }
 0x32d   : > { %v2842_v12 = vsel %vm2241_vm2, %v2839_v36, %v8491_v24  ;;  %v2923_v54 = vadd.f32 %v2840_v10, %v6875_v9  ;;  %v3082_v58 = vsel %vm2484_vm3, %v8492_v37, %v3081_v22  ;;  %v3385_v31 = vsel %vm2241_vm2, %v8493_v23, %v3384_v46 }
 0x32e   : > { %v2617_v14 = vadd.f32 %v2537_v32, %v2374_v47  ;;  %v2924_v34 = vadd.f32 %v2842_v12, %v2682_v0  ;;  %v8495_v33 = vrot.slane %v8494_v45, 1  ;;  %v3626_v36 = vrot.slane %v3514_v18, 2  ;;  %v8496_v47 = vld [vmem:[#allocation3_spill] sm:$0xff]  ;;  %v8500_v12 = vld [vmem:[#allocation48_spill] sm:$0xff] }
 0x32f   : > { %v1878_v61 = vmin.f32 %v1824_v60, 6.0  ;;  %v3165_v28 = vadd.f32 %v3082_v58, %v2923_v54  ;;  %v3471_v32 = vadd.f32 %v3385_v31, %v6886_v3  ;;  %v1829_v9 = vmax.f32 %v1775_v19, 0.0  ;;  %v8502_v31 = vld [vmem:[#allocation77_spill] sm:$0xff]  ;;  %v8514_v19 = vld [vmem:[#allocation66_spill] sm:$0xff] }
 0x330   : > { %v3387_v43 = vsel %vm2241_vm2, %v3384_v46, %v8495_v33  ;;  %v8497_v0 = vrot.slane %v8496_v47, 2  ;;  %v8499_v38 = vrot.slane %v8498_v56, 2  ;;  %v1765_v10 = vadd.f32 3.0, %v6967_v8 }
 0x331   : > { %v3472_v5 = vadd.f32 %v3387_v43, %v3230_v4  ;;  %v1932_v52 = vmul.f32 %v1878_v61, %v6905_v20  ;;  %v1883_v60 = vmin.f32 %v1829_v9, 6.0  ;;  %v8501_v46 = vrot.slane %v8500_v12, 2 }
 0x332   : > { %v3627_v41 = vsel %vm2484_vm3, %v8497_v0, %v3626_v36  ;;  %v3629_v57 = vsel %vm2484_vm3, %v3626_v36, %v8499_v38  ;;  %v7033_v37 = vadd.f32 %v6741_v17, %v2617_v14  ;;  %v1819_v23 = vmax.f32 %v1765_v10, 0.0  ;;  %v1518_v17 = vpop.permute.xlu0 %1517 }
 0x333   : > { %v3713_v24 = vadd.f32 %v3627_v41, %v3471_v32  ;;  %v3714_v18 = vadd.f32 %v3629_v57, %v3472_v5  ;;  %v2539_v3 = vsel %vm2484_vm3, %v2536_v39, %v8501_v46  ;;  %v1986_v4 = vmul.f32 0.16666667, %v1932_v52 }
 0x334   : > { %v7030_v54 = vadd.f32 %v2539_v3, %v2375_v50  ;;  %v8503_v45 = vrot.slane %v8502_v31, 2  ;;  %v7046_v50 = vadd.f32 %v6745_v2, %v3165_v28  ;;  %v1937_v5 = vmul.f32 %v1883_v60, %v6940_v26 }
 0x335   : > { %v3749_v58 = vadd.f32 %v6508_v55, %v3713_v24  ;;  %v3750_v20 = vadd.f32 %v6508_v55, %v3714_v18  ;;  %v2062_v39 = vsel %vm2005_vm0, %v1986_v4, 0.0  ;;  %v1873_v41 = vmin.f32 %v1819_v23, 6.0  ;;  %v1538_v4 = vpop.permute.xlu2 %1537 }
 0x336   : > { %v3084_v33 = vsel %vm2484_vm3, %v3081_v22, %v8503_v45  ;;  %v7049_v32 = vmul.f32 %v6700_v44, %v2062_v39  ;;  %v7054_v9 = vmul.f32 %v6710_v49, %v2062_v39  ;;  %v7057_v47 = vmul.f32 %v6810_v15, %v2062_v39  ;;  %v8513_v45 = vld [vmem:[#allocation65_spill] sm:$0xff] }
 0x337   : > { %v7043_v36 = vadd.f32 %v3084_v33, %v2924_v34  ;;  %v3781_v14 = vadd.f32 3.0, %v3749_v58  ;;  %v3782_v61 = vadd.f32 3.0, %v3750_v20  ;;  %v7060_v34 = vmul.f32 %v6816_v29, %v2062_v39 }
 0x338   : > { %v7064_v56 = vmul.f32 %v6731_v63, %v2062_v39  ;;  %v7068_v38 = vmul.f32 %v6804_v53, %v2062_v39  ;;  %v7071_v57 = vmul.f32 %v6823_v1, %v2062_v39  ;;  %v7074_v24 = vmul.f32 %v6929_v48, %v2062_v39 }
 0x339   : > { %v3813_v28 = vmax.f32 %v3781_v14, 0.0  ;;  %v3814_v0 = vmax.f32 %v3782_v61, 0.0  ;;  %v1991_v18 = vmul.f32 0.16666667, %v1937_v5  ;;  %v7080_v3 = vmul.f32 %v6830_v16, %v2062_v39 }
 0x33a   : > { %v1927_v39 = vmul.f32 %v1873_v41, %v6967_v8  ;;  %v1498_v8 = vpop.permute.xlu1 %1497  ;;  %v1530_v41 = vpop.permute.xlu0 %1529 }
 0x33b   : > { %v3845_v52 = vmin.f32 %v3813_v28, 6.0  ;;  %v3846_v10 = vmin.f32 %v3814_v0, 6.0  ;;  %8504 = vst [vmem:[#allocation39_spill] sm:$0xff] %v7080_v3  ;;  %v2067_v33 = vsel %vm2016_vm1, %v1991_v18, 0.0  ;;  %v1602_v60 = vmul.f32 %v6725_v51, %v1498_v8  ;;  %v8519_v3 = vld [vmem:[#allocation56_spill] sm:$0xff] }
 0x33c   : > { %v7086_v14 = vmul.f32 %v6700_v44, %v2067_v33  ;;  %v7089_v61 = vmul.f32 %v6710_v49, %v2067_v33  ;;  %v7092_v5 = vmul.f32 %v6810_v15, %v2067_v33  ;;  %v7104_v18 = vmul.f32 %v6823_v1, %v2067_v33 }
 0x33d   : > { %v3877_v23 = vmul.f32 %v3845_v52, %v3749_v58  ;;  %v3878_v31 = vmul.f32 %v3846_v10, %v3750_v20  ;;  %v1607_v58 = vmul.f32 %v6725_v51, %v1518_v17  ;;  %v1612_v20 = vmul.f32 %v6725_v51, %v1538_v4 }
 0x33e   : > { %8505 = vst [vmem:[#allocation49_spill] sm:$0xff] %v7086_v14  ;;  %v7101_v10 = vmul.f32 %v6816_v29, %v2067_v33  ;;  %v7107_v43 = vmul.f32 %v6830_v16, %v2067_v33  ;;  %v1981_v33 = vmul.f32 0.16666667, %v1927_v39 }
 0x33f   : > { %8506 = vst [vmem:[#allocation71_spill] sm:$0xff] %v7089_v61  ;;  %v3909_v28 = vmul.f32 0.16666667, %v3877_v23  ;;  %v7095_v0 = vmul.f32 0.16666667, %v3878_v31  ;;  %v1661_v46 = vadd.f32 %v1607_v58, %v8513_v45  ;;  %v1666_v12 = vadd.f32 %v1612_v20, %v8514_v19 }
 0x340   : > { %8507 = vst [vmem:[#allocation53_spill] sm:$0xff] %v7092_v5  ;;  %v2422_v52 = vmul.f32 %v6710_v49, %v1981_v33  ;;  %v2652_v39 = vmul.f32 %v6804_v53, %v1981_v33  ;;  %v2970_v45 = vmul.f32 %v6816_v29, %v1981_v33  ;;  %v3200_v19 = vmul.f32 %v6929_v48, %v1981_v33  ;;  %v8517_v5 = vld [vmem:[#allocation23_spill] sm:$0xff] }
 0x341   : > { %8508 = vst [vmem:[#allocation32_spill] sm:$0xff] %v7095_v0  ;;  %v3941_v23 = vpack.c.bf16 %v3909_v28, %v3909_v28  ;;  %v3942_v17 = vpack.c.bf16 %v7095_v0, %v7095_v0  ;;  %v4022_v4 = vsel %vm3990_vm4, %v3909_v28, 0.0  ;;  %v1610_v28 = vmul.f32 %v6725_v51, %v1530_v41  ;;  %v8515_v0 = vld [vmem:[#allocation38_spill] sm:$0xff] }
 0x342   : > { %8509 = vst [vmem:[#allocation68_spill] sm:$0xff] %v7101_v10  ;;  %v7114_v2 = vadd.f32 %v4022_v4, %v6953_v13  ;;  %v2102_v13 = vmul.f32 %v6731_v63, %v1981_v33  ;;  %v2179_v4 = vmul.f32 %v6700_v44, %v1981_v33  ;;  %v3275_v58 = vmul.f32 %v6823_v1, %v1981_v33  ;;  %v8556_v10 = vld [vmem:[#allocation11_spill] sm:$0xff] }
 0x343   : > { %8510 = vst [vmem:[#allocation46_spill] sm:$0xff] %v7104_v18  ;;  %v2541_v8 = vrot.slane %v2422_v52, 2  ;;  %v2684_v41 = vadd.f32 %v2652_v39, %v7030_v54  ;;  %v3086_v22 = vrot.slane %v2970_v45, 2  ;;  %v3232_v26 = vadd.f32 %v3200_v19, %v7043_v36  ;;  %v8521_v39 = vld [vmem:[#allocation76_spill] sm:$0xff]  ;;  %v8522_v45 = vld [vmem:[#allocation83_spill] sm:$0xff] }
 0x344   : > { %8511 = vst [vmem:[#allocation7_spill] sm:$0xff] %v7107_v43  ;;  %v2298_v20 = vrot.slane %v2179_v4, 1  ;;  %v8516_v61 = vrot.slane %v8515_v0, 1  ;;  %v8518_v11 = vrot.slane %v8517_v5, 1  ;;  %v8520_v4 = vrot.slane %v8519_v3, 2  ;;  %v8524_v19 = vld [vmem:[#allocation79_spill] sm:$0xff] }
 0x345   : > { %8512 = vst [vmem:[#allocation5_spill] sm:$0xff] %v7114_v2  ;;  %v3389_v2 = vrot.slane %v3275_v58, 1  ;;  %v8523_v25 = vrot.slane %v8522_v45, 1  ;;  %v8525_v0 = vrot.slane %v8524_v19, 1  ;;  %v8532_v19 = vld [vmem:[#allocation54_spill] sm:$0xff]  ;;  %v8557_v43 = vrot.slane %v8556_v10, 1 }
 0x346   : > { %3974 = vst.msk [vmem:[%s5757_s14 + $0x40] sm:$0xf] %vm3957_vm5, %v3941_v23  ;;  %v2728_v23 = vmul.f32 %v6810_v15, %v1981_v33  ;;  %v2299_v14 = vsel %vm2241_vm2, %v8516_v61, %v2298_v20  ;;  %v2301_v59 = vsel %vm2241_vm2, %v2298_v20, %v8518_v11  ;;  %v2542_v52 = vsel %vm2484_vm3, %v8520_v4, %v2541_v8  ;;  %v8526_v11 = vld [vmem:[#allocation12_spill] sm:$0xff] }
 0x347   : > { %3975 = vst.msk [vmem:[%s5757_s14 + $0x44] sm:$0xf] %vm3957_vm5, %v3942_v17  ;;  %v3517_v17 = vmul.f32 %v6830_v16, %v1981_v33  ;;  %v2376_v33 = vadd.f32 %v2299_v14, %v8521_v39  ;;  %v8527_v20 = vrot.slane %v8526_v11, 2  ;;  %v8528_v4 = vld [vmem:[#allocation80_spill] sm:$0xff] }
 0x348   : > { %v2844_v31 = vrot.slane %v2728_v23, 1  ;;  %v2377_v23 = vadd.f32 %v2301_v59, %v2102_v13  ;;  %v8530_v13 = vld [vmem:[#allocation78_spill] sm:$0xff] }
 0x349   : > { %v3631_v54 = vrot.slane %v3517_v17, 2  ;;  %v3087_v3 = vsel %vm2484_vm3, %v8527_v20, %v3086_v22  ;;  %v8529_v17 = vrot.slane %v8528_v4, 1  ;;  %v2619_v59 = vadd.f32 %v2542_v52, %v2376_v33  ;;  %v8536_v33 = vld [vmem:[#allocation19_spill] sm:$0xff] }
 0x34a   : > { %v2845_v36 = vsel %vm2241_vm2, %v8523_v25, %v2844_v31  ;;  %v2847_v61 = vsel %vm2241_vm2, %v2844_v31, %v8525_v0  ;;  %v8531_v39 = vrot.slane %v8530_v13, 1  ;;  %v8533_v31 = vrot.slane %v8532_v19, 2  ;;  %v8534_v0 = vld [vmem:[#allocation41_spill] sm:$0xff] }
 0x34b   : > { %v2925_v5 = vadd.f32 %v2845_v36, %v7033_v37  ;;  %v2926_v58 = vadd.f32 %v2847_v61, %v2684_v41  ;;  %v3390_v14 = vsel %vm2241_vm2, %v8529_v17, %v3389_v2  ;;  %v8535_v61 = vrot.slane %v8534_v0, 2  ;;  %v8541_v0 = vld [vmem:[#allocation40_spill] sm:$0xff] }
 0x34c   : > { %v3392_v25 = vsel %vm2241_vm2, %v3389_v2, %v8531_v39  ;;  %v3473_v45 = vadd.f32 %v3390_v14, %v7046_v50  ;;  %v3632_v37 = vsel %vm2484_vm3, %v8533_v31, %v3631_v54  ;;  %v1719_v20 = vadd.f32 %v6662_v42, %v1661_v46  ;;  %v8537_v2 = vld [vmem:[#allocation81_spill] sm:$0xff] }
 0x34d   : > { %v3167_v41 = vadd.f32 %v3087_v3, %v2925_v5  ;;  %v3474_v36 = vadd.f32 %v3392_v25, %v3232_v26  ;;  %v3634_v11 = vsel %vm2484_vm3, %v3631_v54, %v8535_v61  ;;  %v1724_v52 = vadd.f32 %v6662_v42, %v1666_v12  ;;  %v8539_v3 = vld [vmem:[#allocation15_spill] sm:$0xff]  ;;  %v1550_v25 = vpop.permute.xlu2 %1549 }
 0x34e   : > { %v3715_v4 = vadd.f32 %v3632_v37, %v3473_v45  ;;  %v1656_v17 = vadd.f32 %v1602_v60, %v8536_v33  ;;  %v8538_v13 = vrot.slane %v8537_v2, 2  ;;  %v1773_v39 = vadd.f32 3.0, %v1719_v20  ;;  %v1510_v45 = vpop.permute.xlu1 %1509 }
 0x34f   : > { %v3716_v14 = vadd.f32 %v3634_v11, %v3474_v36  ;;  %v7179_v26 = vadd.f32 %v6913_v27, %v2619_v59  ;;  %v1778_v5 = vadd.f32 3.0, %v1724_v52  ;;  %v8540_v12 = vrot.slane %v8539_v3, 2 }
 0x350   : > { %v2544_v50 = vsel %vm2484_vm3, %v2541_v8, %v8538_v13  ;;  %v3751_v54 = vadd.f32 %v6508_v55, %v3715_v4  ;;  %v1714_v46 = vadd.f32 %v6662_v42, %v1656_v17  ;;  %v1827_v31 = vmax.f32 %v1773_v39, 0.0 }
 0x351   : > { %v7176_v19 = vadd.f32 %v2544_v50, %v2377_v23  ;;  %v3089_v60 = vsel %vm2484_vm3, %v3086_v22, %v8540_v12  ;;  %v3752_v8 = vadd.f32 %v6508_v55, %v3716_v14  ;;  %v7190_v23 = vadd.f32 %v6932_v6, %v3167_v41  ;;  %v8542_v41 = vld [vmem:[#allocation24_spill] sm:$0xff]  ;;  %v8543_v14 = vld [vmem:[#allocation33_spill] sm:$0xff] }
 0x352   : > { %v7187_v37 = vadd.f32 %v3089_v60, %v2926_v58  ;;  %v3783_v27 = vadd.f32 3.0, %v3751_v54  ;;  %v1832_v59 = vmax.f32 %v1778_v5, 0.0  ;;  %v1768_v36 = vadd.f32 3.0, %v1714_v46 }
 0x353   : > { %v1664_v61 = vadd.f32 %v1610_v28, %v8541_v0  ;;  %v3784_v11 = vadd.f32 3.0, %v3752_v8  ;;  %v1881_v4 = vmin.f32 %v1827_v31, 6.0  ;;  %v1615_v33 = vmul.f32 %v6725_v51, %v1550_v25 }
 0x354   : > { %v1605_v22 = vmul.f32 %v6725_v51, %v1510_v45  ;;  %v3815_v17 = vmax.f32 %v3783_v27, 0.0  ;;  %v1886_v2 = vmin.f32 %v1832_v59, 6.0  ;;  %v1822_v55 = vmax.f32 %v1768_v36, 0.0 }
 0x355   : > { %v7196_v58 = vadd.f32 %v6662_v42, %v1664_v61  ;;  %v3816_v13 = vmax.f32 %v3784_v11, 0.0  ;;  %v1935_v6 = vmul.f32 %v1881_v4, %v1719_v20  ;;  %v1669_v50 = vadd.f32 %v1615_v33, %v8542_v41 }
 0x356   : > { %v1659_v39 = vadd.f32 %v1605_v22, %v8543_v14  ;;  %v3847_v5 = vmin.f32 %v3815_v17, 6.0  ;;  %v1940_v28 = vmul.f32 %v1886_v2, %v1724_v52  ;;  %v1876_v3 = vmin.f32 %v1822_v55, 6.0  ;;  %v7295_v20 = vpop.permute.xlu1 %1521 }
 0x357   : > { %v1776_v12 = vadd.f32 3.0, %v7196_v58  ;;  %v3848_v60 = vmin.f32 %v3816_v13, 6.0  ;;  %v1989_v25 = vmul.f32 0.16666667, %v1935_v6  ;;  %v7202_v45 = vadd.f32 %v6662_v42, %v1669_v50 }
 0x358   : > { %v7205_v31 = vadd.f32 %v6662_v42, %v1659_v39  ;;  %v3879_v36 = vmul.f32 %v3847_v5, %v3751_v54  ;;  %v1994_v61 = vmul.f32 0.16666667, %v1940_v28  ;;  %v1930_v11 = vmul.f32 %v1876_v3, %v1714_v46 }
 0x359   : > { %v3880_v0 = vmul.f32 %v3848_v60, %v3752_v8  ;;  %v2065_v52 = vsel %vm2005_vm0, %v1989_v25, 0.0  ;;  %v1830_v22 = vmax.f32 %v1776_v12, 0.0  ;;  %v7226_v8 = vadd.f32 3.0, %v7202_v45 }
 0x35a   : > { %v7212_v4 = vmul.f32 0.16666667, %v3879_v36  ;;  %v7215_v33 = vmul.f32 %v6700_v44, %v2065_v52  ;;  %v7218_v42 = vmul.f32 %v6710_v49, %v2065_v52  ;;  %v7223_v54 = vmul.f32 %v6810_v15, %v2065_v52 }
 0x35b   : > { %v7220_v17 = vmul.f32 0.16666667, %v3880_v0  ;;  %v7229_v46 = vadd.f32 3.0, %v7205_v31  ;;  %v7234_v55 = vmul.f32 %v6731_v63, %v2065_v52  ;;  %v7237_v13 = vmul.f32 %v6804_v53, %v2065_v52 }
 0x35c   : > { %8544 = vst [vmem:[#allocation50_spill] sm:$0xff] %v7212_v4  ;;  %v3943_v2 = vpack.c.bf16 %v7212_v4, %v7212_v4  ;;  %v7240_v6 = vmul.f32 %v6816_v29, %v2065_v52  ;;  %v7247_v39 = vmul.f32 %v6823_v1, %v2065_v52  ;;  %v7252_v5 = vmul.f32 %v6929_v48, %v2065_v52 }
 0x35d   : > { %8545 = vst [vmem:[#allocation8_spill] sm:$0xff] %v7215_v33  ;;  %v3944_v41 = vpack.c.bf16 %v7220_v17, %v7220_v17  ;;  %v7255_v28 = vmul.f32 %v6830_v16, %v2065_v52  ;;  %v2070_v3 = vsel %vm2016_vm1, %v1994_v61, 0.0  ;;  %v1984_v12 = vmul.f32 0.16666667, %v1930_v11 }
 0x35e   : > { %8546 = vst [vmem:[#allocation64_spill] sm:$0xff] %v7218_v42  ;;  %v7263_v25 = vmul.f32 %v6700_v44, %v2070_v3  ;;  %v7266_v36 = vmul.f32 %v6710_v49, %v2070_v3  ;;  %v7269_v0 = vmul.f32 %v6810_v15, %v2070_v3  ;;  %v1884_v11 = vmin.f32 %v1830_v22, 6.0 }
 0x35f   : > { %8547 = vst [vmem:[#allocation34_spill] sm:$0xff] %v7220_v17  ;;  %v7276_v14 = vmul.f32 %v6816_v29, %v2070_v3  ;;  %v7279_v50 = vmul.f32 %v6823_v1, %v2070_v3  ;;  %v7282_v27 = vmul.f32 %v6830_v16, %v2070_v3  ;;  %v2182_v61 = vmul.f32 %v6700_v44, %v1984_v12 }
 0x360   : > { %8548 = vst [vmem:[#allocation16_spill] sm:$0xff] %v7234_v55  ;;  %v2425_v22 = vmul.f32 %v6710_v49, %v1984_v12  ;;  %v2731_v52 = vmul.f32 %v6810_v15, %v1984_v12  ;;  %v2973_v60 = vmul.f32 %v6816_v29, %v1984_v12  ;;  %v3202_v3 = vmul.f32 %v6929_v48, %v1984_v12 }
 0x361   : > { %8549 = vst [vmem:[#allocation70_spill] sm:$0xff] %v7247_v39  ;;  %v2303_v17 = vrot.slane %v2182_v61, 1  ;;  %v3278_v4 = vmul.f32 %v6823_v1, %v1984_v12  ;;  %v3520_v59 = vmul.f32 %v6830_v16, %v1984_v12 }
 0x362   : > { %3976 = vst.msk [vmem:[%s5757_s14 + $0x48] sm:$0xf] %vm3957_vm5, %v3943_v2  ;;  %v2104_v2 = vmul.f32 %v6731_v63, %v1984_v12  ;;  %v2849_v42 = vrot.slane %v2731_v52, 1  ;;  %v3091_v55 = vrot.slane %v2973_v60, 2  ;;  %v8559_v52 = vld [vmem:[#allocation55_spill] sm:$0xff] }
 0x363   : > { %8550 = vst [vmem:[#allocation52_spill] sm:$0xff] %v7255_v28  ;;  %v2306_v61 = vsel %vm2241_vm2, %v2303_v17, %v8557_v43  ;;  %v3234_v28 = vadd.f32 %v3202_v3, %v7187_v37  ;;  %v3394_v18 = vrot.slane %v3278_v4, 1  ;;  %v8560_v60 = vrot.slane %v8559_v52, 1 }
 0x364   : > { %3977 = vst.msk [vmem:[%s5757_s14 + $0x4c] sm:$0xf] %vm3957_vm5, %v3944_v41  ;;  %v2654_v41 = vmul.f32 %v6804_v53, %v1984_v12  ;;  %v2379_v39 = vadd.f32 %v2306_v61, %v2104_v2  ;;  %v8567_v61 = vld [vmem:[#allocation47_spill] sm:$0xff] }
 0x365   : > { %8551 = vst [vmem:[#allocation72_spill] sm:$0xff] %v7263_v25  ;;  %v8555_v25 = vrot.slane %v6899_v7, 1  ;;  %v2850_v7 = vsel %vm2241_vm2, %v8560_v60, %v2849_v42 }
 0x366   : > { %8552 = vst [vmem:[#allocation28_spill] sm:$0xff] %v7266_v36  ;;  %v2686_v36 = vadd.f32 %v2654_v41, %v7176_v19  ;;  %v8561_v41 = vld [vmem:[#allocation63_spill] sm:$0xff]  ;;  %v2927_v43 = vadd.f32 %v2850_v7, %v7179_v26  ;;  %v1938_v26 = vmul.f32 %v1884_v11, %v7196_v58  ;;  %v1835_v7 = vmax.f32 %v7226_v8, 0.0  ;;  %v1534_v8 = vpop.permute.xlu1 %1533 }
 0x367   : > { %8553 = vst [vmem:[#allocation42_spill] sm:$0xff] %v7269_v0  ;;  %v2546_v0 = vrot.slane %v2425_v22, 2  ;;  %v2304_v33 = vsel %vm2241_vm2, %v8555_v25, %v2303_v17  ;;  %v8558_v22 = vrot.slane %v6902_v35, 2  ;;  %v8562_v25 = vrot.slane %v8561_v41, 1  ;;  %v8563_v17 = vld [vmem:[#allocation82_spill] sm:$0xff] }
 0x368   : > { %8554 = vst [vmem:[#allocation73_spill] sm:$0xff] %v7282_v27  ;;  %v2378_v12 = vadd.f32 %v2304_v33, %v6910_v40  ;;  %v8564_v37 = vrot.slane %v8563_v17, 2  ;;  %v8565_v40 = vld [vmem:[#allocation6_spill] sm:$0xff]  ;;  %v1825_v17 = vmax.f32 %v7229_v46, 0.0  ;;  %v1992_v58 = vmul.f32 0.16666667, %v1938_v26 }
 0x369   : > { %v2547_v19 = vsel %vm2484_vm3, %v8558_v22, %v2546_v0  ;;  %v2852_v10 = vsel %vm2241_vm2, %v2849_v42, %v8562_v25  ;;  %v8566_v33 = vrot.slane %v8565_v40, 1  ;;  %v8568_v22 = vrot.slane %v8567_v61, 1 }
 0x36a   : > { %v3092_v4 = vsel %vm2484_vm3, %v8564_v37, %v3091_v55  ;;  %v2621_v2 = vadd.f32 %v2547_v19, %v2378_v12  ;;  %v2928_v3 = vadd.f32 %v2852_v10, %v2686_v36  ;;  %v3636_v25 = vrot.slane %v3520_v59, 2  ;;  %v8569_v37 = vld [vmem:[#allocation31_spill] sm:$0xff]  ;;  %v8571_v19 = vld [vmem:[#allocation62_spill] sm:$0xff]  ;;  %v8573_v10 = vld [vmem:[#allocation57_spill] sm:$0xff] }
 0x36b   : > { %v3395_v35 = vsel %vm2241_vm2, %v8566_v33, %v3394_v18  ;;  %v3397_v52 = vsel %vm2241_vm2, %v3394_v18, %v8568_v22  ;;  %v3169_v41 = vadd.f32 %v3092_v4, %v2927_v43  ;;  %v8570_v40 = vrot.slane %v8569_v37, 2 }
 0x36c   : > { %v3475_v60 = vadd.f32 %v3395_v35, %v7190_v23  ;;  %v3476_v42 = vadd.f32 %v3397_v52, %v3234_v28  ;;  %v7333_v36 = vadd.f32 %v7068_v38, %v2621_v2  ;;  %v8572_v18 = vrot.slane %v8571_v19, 2  ;;  %v1542_v38 = vpop.permute.xlu0 %1541  ;;  %v8575_v2 = vld [vmem:[#allocation25_spill] sm:$0xff]  ;;  %v7357_v52 = vld [vmem:[%s7822_s4] ss:$0 sm:$0xff] }
 0x36d   : > { %v2549_v12 = vsel %vm2484_vm3, %v2546_v0, %v8570_v40  ;;  %v8574_v28 = vrot.slane %v8573_v10, 2  ;;  %v2068_v35 = vsel %vm2005_vm0, %v1992_v58, 0.0  ;;  %v8576_v61 = vrot.slane %v8575_v2, 2 }
 0x36e   : > { %v3637_v23 = vsel %vm2484_vm3, %v8572_v18, %v3636_v25  ;;  %v7341_v11 = vadd.f32 %v2549_v12, %v2379_v39  ;;  %v7352_v39 = vadd.f32 %v7074_v24, %v3169_v41  ;;  %v1889_v26 = vmin.f32 %v1835_v7, 6.0  ;;  %v1546_v43 = vpop.permute.xlu1 %1545 }
 0x36f   : > { %v3639_v59 = vsel %vm2484_vm3, %v3636_v25, %v8574_v28  ;;  %v3717_v0 = vadd.f32 %v3637_v23, %v3475_v60  ;;  %v3094_v22 = vsel %vm2484_vm3, %v3091_v55, %v8576_v61  ;;  %v7364_v25 = vmul.f32 %v6700_v44, %v2068_v35  ;;  %v8577_v61 = vld [vmem:[#allocation67_spill] sm:$0xff] }
 0x370   : > { %v3718_v4 = vadd.f32 %v3639_v59, %v3476_v42  ;;  %v7367_v37 = vmul.f32 %v6710_v49, %v2068_v35  ;;  %v7370_v24 = vmul.f32 %v6810_v15, %v2068_v35  ;;  %v1879_v55 = vmin.f32 %v1825_v17, 6.0 }
 0x371   : > { %v3753_v60 = vadd.f32 %v7357_v52, %v3717_v0  ;;  %v1613_v41 = vmul.f32 %v6725_v51, %v1542_v38  ;;  %v7374_v12 = vmul.f32 %v6731_v63, %v2068_v35  ;;  %v7377_v19 = vmul.f32 %v6804_v53, %v2068_v35 }
 0x372   : > { %v7361_v42 = vadd.f32 %v7357_v52, %v3718_v4  ;;  %v7380_v18 = vmul.f32 %v6816_v29, %v2068_v35  ;;  %v7387_v10 = vmul.f32 %v6929_v48, %v2068_v35  ;;  %v7390_v17 = vmul.f32 %v6823_v1, %v2068_v35  ;;  %v8581_v4 = vld [vmem:[#allocation2_spill] sm:$0xff] }
 0x373   : > { %v3785_v40 = vadd.f32 3.0, %v3753_v60  ;;  %v7394_v58 = vmul.f32 %v6830_v16, %v2068_v35  ;;  %v1943_v0 = vmul.f32 %v1889_v26, %v7202_v45  ;;  %v1933_v38 = vmul.f32 %v1879_v55, %v7205_v31 }
 0x374   : > { %v7383_v7 = vadd.f32 3.0, %v7361_v42  ;;  %v3170_v2 = vadd.f32 %v3094_v22, %v2928_v3  ;;  %v1667_v33 = vadd.f32 %v1613_v41, %v8577_v61  ;;  %v7411_v3 = vld [vmem:[%s7820_s2] ss:$0 sm:$0xff]  ;;  %v7418_v55 = vmul.f32 %v6725_v51, %v1546_v43 }
 0x375   : > { %v3817_v28 = vmax.f32 %v3785_v40, 0.0  ;;  %v1997_v27 = vmul.f32 0.16666667, %v1943_v0  ;;  %v1608_v40 = vmul.f32 %v6725_v51, %v7295_v20  ;;  %v1987_v26 = vmul.f32 0.16666667, %v1933_v38 }
 0x376   : > { %v7414_v22 = vadd.f32 %v7411_v3, %v1667_v33  ;;  %v1611_v20 = vmul.f32 %v6725_v51, %v1534_v8  ;;  %v8580_v43 = vrot.slane %v7049_v32, 1 }
 0x377   : > { %v3849_v46 = vmin.f32 %v3817_v28, 6.0  ;;  %v2073_v31 = vsel %vm2016_vm1, %v1997_v27, 0.0  ;;  %v8579_v27 = vld [vmem:[#allocation22_spill] sm:$0xff]  ;;  %v2185_v33 = vmul.f32 %v6700_v44, %v1987_v26  ;;  %v2428_v8 = vmul.f32 %v6710_v49, %v1987_v26 }
 0x378   : > { %v7423_v28 = vmul.f32 %v6810_v15, %v2073_v31  ;;  %v7426_v21 = vmul.f32 %v6816_v29, %v2073_v31  ;;  %v1662_v0 = vadd.f32 %v1608_v40, %v8579_v27  ;;  %v7430_v38 = vmul.f32 %v6823_v1, %v2073_v31 }
 0x379   : > { %v7420_v41 = vmul.f32 %v3849_v46, %v3753_v60  ;;  %v2656_v51 = vmul.f32 %v6804_v53, %v1987_v26  ;;  %v7438_v60 = vmul.f32 %v6830_v16, %v2073_v31  ;;  %v2106_v61 = vmul.f32 %v6731_v63, %v1987_v26 }
 0x37a   : > { %v2308_v45 = vrot.slane %v2185_v33, 1  ;;  %v2551_v40 = vrot.slane %v2428_v8, 2  ;;  %v2734_v23 = vmul.f32 %v6810_v15, %v1987_v26  ;;  %v2976_v44 = vmul.f32 %v6816_v29, %v1987_v26 }
 0x37b   : > { %8578 = vst [vmem:[#allocation20_spill] sm:$0xff] %v7420_v41  ;;  %v2688_v27 = vadd.f32 %v2656_v51, %v7341_v11  ;;  %v3204_v49 = vmul.f32 %v6929_v48, %v1987_v26  ;;  %v3281_v53 = vmul.f32 %v6823_v1, %v1987_v26  ;;  %v3523_v46 = vmul.f32 %v6830_v16, %v1987_v26 }
 0x37c   : > { %v2309_v31 = vsel %vm2241_vm2, %v8580_v43, %v2308_v45  ;;  %v8582_v63 = vrot.slane %v8581_v4, 1  ;;  %v8583_v11 = vrot.slane %v7054_v9, 2  ;;  %v2854_v8 = vrot.slane %v2734_v23, 1 }
 0x37d   : > { %v2380_v29 = vadd.f32 %v2309_v31, %v7064_v56  ;;  %v3096_v59 = vrot.slane %v2976_v44, 2  ;;  %v3236_v35 = vadd.f32 %v3204_v49, %v3170_v2  ;;  %v8584_v26 = vrot.slane %v7057_v47, 1  ;;  %v8590_v49 = vld [vmem:[#allocation39_spill] sm:$0xff] }
 0x37e   : > { %v2311_v33 = vsel %vm2241_vm2, %v2308_v45, %v8582_v63  ;;  %v2552_v15 = vsel %vm2484_vm3, %v8583_v11, %v2551_v40  ;;  %v8585_v43 = vrot.slane %v6963_v62, 1  ;;  %v3399_v41 = vrot.slane %v3281_v53, 1  ;;  %v8592_v53 = vld [vmem:[#allocation58_spill] sm:$0xff] }
 0x37f   : > { %v2381_v51 = vadd.f32 %v2311_v33, %v2106_v61  ;;  %v2855_v32 = vsel %vm2241_vm2, %v8584_v26, %v2854_v8  ;;  %v3641_v45 = vrot.slane %v3523_v46, 2  ;;  %v2623_v63 = vadd.f32 %v2552_v15, %v2380_v29  ;;  %v8588_v61 = vld [vmem:[#allocation26_spill] sm:$0xff]  ;;  %v8594_v29 = vld [vmem:[#allocation60_spill] sm:$0xff] }
 0x380   : > { %v2857_v4 = vsel %vm2241_vm2, %v2854_v8, %v8585_v43  ;;  %v2929_v9 = vadd.f32 %v2855_v32, %v7333_v36  ;;  %v8586_v23 = vrot.slane %v7060_v34, 2  ;;  %v8587_v2 = vrot.slane %v7071_v57, 1  ;;  %v8596_v43 = vld [vmem:[#allocation21_spill] sm:$0xff] }
 0x381   : > { %v2930_v11 = vadd.f32 %v2857_v4, %v2688_v27  ;;  %v8589_v44 = vrot.slane %v8588_v61, 1  ;;  %v8591_v31 = vrot.slane %v8590_v49, 2  ;;  %v8593_v33 = vrot.slane %v8592_v53, 2  ;;  %v8601_v49 = vld [vmem:[#allocation69_spill] sm:$0xff] }
 0x382   : > { %v3097_v56 = vsel %vm2484_vm3, %v8586_v23, %v3096_v59  ;;  %v3400_v47 = vsel %vm2241_vm2, %v8587_v2, %v3399_v41  ;;  %v1779_v57 = vadd.f32 3.0, %v7414_v22  ;;  %v1720_v8 = vadd.f32 %v7411_v3, %v1662_v0  ;;  %v8598_v0 = vld [vmem:[#allocation4_spill] sm:$0xff] }
 0x383   : > { %v3402_v62 = vsel %vm2241_vm2, %v3399_v41, %v8589_v44  ;;  %v3642_v46 = vsel %vm2484_vm3, %v8591_v31, %v3641_v45  ;;  %v3644_v36 = vsel %vm2484_vm3, %v3641_v45, %v8593_v33  ;;  %v3171_v27 = vadd.f32 %v3097_v56, %v2929_v9 }
 0x384   : > { %v3477_v34 = vadd.f32 %v3400_v47, %v7352_v39  ;;  %v3478_v15 = vadd.f32 %v3402_v62, %v3236_v35  ;;  %v8595_v26 = vrot.slane %v8594_v29, 2  ;;  %v7486_v32 = vadd.f32 %v7237_v13, %v2623_v63 }
 0x385   : > { %v8597_v4 = vrot.slane %v8596_v43, 2  ;;  %v1833_v56 = vmax.f32 %v1779_v57, 0.0  ;;  %v1774_v35 = vadd.f32 3.0, %v1720_v8  ;;  %v7492_v47 = vadd.f32 %v7252_v5, %v3171_v27 }
 0x386   : > { %v2554_v41 = vsel %vm2484_vm3, %v2551_v40, %v8595_v26  ;;  %v3719_v45 = vadd.f32 %v3642_v46, %v3477_v34  ;;  %v3720_v9 = vadd.f32 %v3644_v36, %v3478_v15  ;;  %v1665_v61 = vadd.f32 %v1611_v20, %v8598_v0  ;;  %v7569_v0 = vld [vmem:[%s7821_s3 + $0x8] ss:$0 sm:$0xff] }
 0x387   : > { %v3099_v23 = vsel %vm2484_vm3, %v3096_v59, %v8597_v4  ;;  %v2624_v39 = vadd.f32 %v2554_v41, %v2381_v51  ;;  %v1887_v63 = vmin.f32 %v1833_v56, 6.0  ;;  %v7500_v44 = vmul.f32 0.0, %v6823_v1  ;;  %v7561_v56 = vld [vmem:[%s7821_s3 + $0x7] ss:$0 sm:$0xff] }
 0x388   : > { %v3172_v2 = vadd.f32 %v3099_v23, %v2930_v11  ;;  %v7497_v13 = vadd.f32 %v7357_v52, %v3719_v45  ;;  %v1828_v62 = vmax.f32 %v1774_v35, 0.0  ;;  %v1723_v51 = vadd.f32 %v7411_v3, %v1665_v61 }
 0x389   : > { %v7505_v11 = vmul.f32 0.0, %v6830_v16  ;;  %v1941_v5 = vmul.f32 %v1887_v63, %v7414_v22  ;;  %v7509_v20 = vmul.f32 0.0, %v6929_v48  ;;  %v1668_v31 = vadd.f32 %v7418_v55, %v8601_v49 }
 0x38a   : > { %8599 = vst [vmem:[#allocation29_spill] sm:$0xff] %v7497_v13  ;;  %v7514_v46 = vadd.f32 %v7357_v52, %v3720_v9  ;;  %v1882_v1 = vmin.f32 %v1828_v62, 6.0  ;;  %v1777_v53 = vadd.f32 3.0, %v1723_v51  ;;  %v3787_v36 = vadd.f32 3.0, %v7497_v13 }
 0x38b   : > { %8600 = vst [vmem:[#allocation45_spill] sm:$0xff] %v7505_v11  ;;  %v1995_v27 = vmul.f32 0.16666667, %v1941_v5  ;;  %v1726_v16 = vadd.f32 %v7411_v3, %v1668_v31  ;;  %v8603_v34 = vmax.f32 %v7383_v7, 0.0  ;;  %v7534_v3 = vld [vmem:[%s7821_s3 + $0x3] ss:$0 sm:$0xff] }
 0x38c   : > { %8602 = vst [vmem:[#allocation75_spill] sm:$0xff] %v7514_v46  ;;  %v7520_v22 = vadd.f32 3.0, %v7514_v46  ;;  %v1936_v57 = vmul.f32 %v1882_v1, %v1720_v8  ;;  %v1831_v55 = vmax.f32 %v1777_v53, 0.0  ;;  %v3819_v26 = vmax.f32 %v3787_v36, 0.0  ;;  %v7542_v8 = vld [vmem:[%s7821_s3 + $0x4] ss:$0 sm:$0xff] }
 0x38d   : > { %v3850_v15 = vmin.f32 %v8603_v34, 6.0  ;;  %v2071_v41 = vsel %vm2005_vm0, %v1995_v27, 0.0  ;;  %v1780_v43 = vadd.f32 3.0, %v1726_v16  ;;  %v8606_v53 = vrot.slane %v7223_v54, 1  ;;  %v8607_v5 = vld [vmem:[#allocation53_spill] sm:$0xff]  ;;  %v8612_v54 = vld [vmem:[#allocation46_spill] sm:$0xff] }
 0x38e   : > { %v7537_v7 = vmul.f32 %v7534_v3, %v2071_v41  ;;  %v7545_v30 = vmul.f32 %v7542_v8, %v2071_v41  ;;  %v7556_v9 = vmul.f32 %v6929_v48, %v2071_v41  ;;  %v7564_v35 = vmul.f32 %v7561_v56, %v2071_v41 }
 0x38f   : > { %v7529_v23 = vmul.f32 %v3850_v15, %v7361_v42  ;;  %v7550_v42 = vld [vmem:[%s7821_s3 + $0x5] ss:$0 sm:$0xff]  ;;  %v7572_v61 = vmul.f32 %v7569_v0, %v2071_v41  ;;  %v1990_v63 = vmul.f32 0.16666667, %v1936_v57  ;;  %v1885_v62 = vmin.f32 %v1831_v55, 6.0 }
 0x390   : > { %v7553_v45 = vmul.f32 %v7550_v42, %v2071_v41  ;;  %v1834_v31 = vmax.f32 %v1780_v43, 0.0  ;;  %v7576_v1 = vmin.f32 %v3819_v26, 6.0 }
 0x391   : > { %8604 = vst [vmem:[#allocation27_spill] sm:$0xff] %v7529_v23  ;;  %v2658_v27 = vmul.f32 %v7534_v3, %v1990_v63  ;;  %v2737_v34 = vmul.f32 %v7542_v8, %v1990_v63  ;;  %v2979_v15 = vmul.f32 %v7550_v42, %v1990_v63  ;;  %v3206_v57 = vmul.f32 %v6929_v48, %v1990_v63 }
 0x392   : > { %8605 = vst [vmem:[#allocation43_spill] sm:$0xff] %v7576_v1  ;;  %v3284_v55 = vmul.f32 %v7561_v56, %v1990_v63  ;;  %v3526_v41 = vmul.f32 %v7569_v0, %v1990_v63  ;;  %v1939_v26 = vmul.f32 %v1885_v62, %v1723_v51  ;;  %v1888_v59 = vmin.f32 %v1834_v31, 6.0 }
 0x393   : > { %v2690_v29 = vadd.f32 %v2658_v27, %v2624_v39  ;;  %v2859_v43 = vrot.slane %v2737_v34, 1  ;;  %v3101_v4 = vrot.slane %v2979_v15, 2  ;;  %v3238_v33 = vadd.f32 %v3206_v57, %v3172_v2  ;;  %v8610_v2 = vld [vmem:[#allocation70_spill] sm:$0xff] }
 0x394   : > { %v3404_v40 = vrot.slane %v3284_v55, 1  ;;  %v3646_v36 = vrot.slane %v3526_v41, 2  ;;  %v8608_v23 = vrot.slane %v8607_v5, 1  ;;  %v1993_v1 = vmul.f32 0.16666667, %v1939_v26 }
 0x395   : > { %v2860_v49 = vsel %vm2241_vm2, %v8606_v53, %v2859_v43  ;;  %v1942_v13 = vmul.f32 %v1888_v59, %v1726_v16  ;;  %v8609_v51 = vrot.slane %v7240_v6, 2  ;;  %v8611_v31 = vrot.slane %v8610_v2, 1  ;;  %v8629_v2 = vld [vmem:[#allocation64_spill] sm:$0xff] }
 0x396   : > { %v2862_v46 = vsel %vm2241_vm2, %v2859_v43, %v8608_v23  ;;  %v2931_v11 = vadd.f32 %v2860_v49, %v7486_v32  ;;  %v8613_v34 = vrot.slane %v8612_v54, 1  ;;  %v8614_v23 = vld [vmem:[#allocation52_spill] sm:$0xff]  ;;  %v8616_v32 = vld [vmem:[#allocation7_spill] sm:$0xff]  ;;  %v7620_v43 = vmul.f32 %v7561_v56, %v1993_v1 }
 0x397   : > { %v2932_v39 = vadd.f32 %v2862_v46, %v2690_v29  ;;  %v3102_v62 = vsel %vm2484_vm3, %v8609_v51, %v3101_v4  ;;  %v3405_v27 = vsel %vm2241_vm2, %v8611_v31, %v3404_v40  ;;  %v8615_v15 = vrot.slane %v8614_v23, 2  ;;  %v8618_v49 = vld [vmem:[#allocation68_spill] sm:$0xff] }
 0x398   : > { %v3407_v53 = vsel %vm2241_vm2, %v3404_v40, %v8613_v34  ;;  %v3479_v5 = vadd.f32 %v3405_v27, %v7492_v47  ;;  %v8617_v46 = vrot.slane %v8616_v32, 2  ;;  %v3173_v16 = vadd.f32 %v3102_v62, %v2931_v11  ;;  %v4240_v11 = vld [vmem:[%s7821_s3] ss:$0 sm:$0xff]  ;;  %v4242_v27 = vld [vmem:[%s7821_s3 + $0x2] ss:$0 sm:$0xff] }
 0x399   : > { %v3647_v59 = vsel %vm2484_vm3, %v8615_v15, %v3646_v36  ;;  %v7611_v29 = vadd.f32 %v3407_v53, %v3238_v33  ;;  %v8619_v57 = vrot.slane %v8618_v49, 2  ;;  %v3208_v40 = vmul.f32 %v6929_v48, %v1993_v1  ;;  %v4241_v48 = vld [vmem:[%s7821_s3 + $0x1] ss:$0 sm:$0xff] }
 0x39a   : > { %v7609_v6 = vsel %vm2484_vm3, %v3646_v36, %v8617_v46  ;;  %v7617_v41 = vadd.f32 %v3647_v59, %v3479_v5  ;;  %v7623_v26 = vmul.f32 %v7569_v0, %v1993_v1  ;;  %v7625_v36 = vmul.f32 0.16666667, %v1942_v13  ;;  %v8621_v46 = vld [vmem:[#allocation8_spill] sm:$0xff] }
 0x39b   : > { %v3104_v55 = vsel %vm2484_vm3, %v3101_v4, %v8619_v57  ;;  %v2108_v33 = vmul.f32 %v4240_v11, %v1990_v63  ;;  %v2110_v51 = vmul.f32 %v4240_v11, %v1993_v1  ;;  %v2188_v4 = vmul.f32 %v4241_v48, %v1990_v63 }
 0x39c   : > { %v3174_v47 = vadd.f32 %v3104_v55, %v2932_v39  ;;  %v3409_v62 = vrot.slane %v7620_v43, 1  ;;  %v2191_v31 = vmul.f32 %v4241_v48, %v1993_v1  ;;  %v2431_v54 = vmul.f32 %v4242_v27, %v1990_v63  ;;  %v8623_v55 = vld [vmem:[#allocation49_spill] sm:$0xff]  ;;  %v8626_v48 = vld [vmem:[#allocation72_spill] sm:$0xff] }
 0x39d   : > { %v2313_v13 = vrot.slane %v2188_v4, 1  ;;  %v2434_v34 = vmul.f32 %v4242_v27, %v1993_v1  ;;  %v2660_v53 = vmul.f32 %v7534_v3, %v1993_v1  ;;  %v8620_v5 = vrot.slane %v7390_v17, 1 }
 0x39e   : > { %v7633_v39 = vadd.f32 %v3208_v40, %v3174_v47  ;;  %v2318_v15 = vrot.slane %v2191_v31, 1  ;;  %v2662_v59 = vmul.f32 %v7534_v3, %v7625_v36  ;;  %v2740_v32 = vmul.f32 %v7542_v8, %v1993_v1  ;;  %v8628_v31 = vld [vmem:[#allocation16_spill] sm:$0xff] }
 0x39f   : > { %v3410_v23 = vsel %vm2241_vm2, %v8620_v5, %v3409_v62  ;;  %v8622_v49 = vrot.slane %v8621_v46, 1  ;;  %v8624_v40 = vrot.slane %v8623_v55, 1  ;;  %v2556_v47 = vrot.slane %v2431_v54, 2  ;;  %v8631_v54 = vld [vmem:[#allocation71_spill] sm:$0xff] }
 0x3a0   : > { %v2561_v43 = vrot.slane %v2434_v34, 2  ;;  %v8625_v17 = vrot.slane %v7364_v25, 1  ;;  %v8627_v4 = vrot.slane %v8626_v48, 1  ;;  %v8630_v55 = vrot.slane %v8629_v2, 2  ;;  %v8634_v48 = vld [vmem:[#allocation28_spill] sm:$0xff] }
 0x3a1   : > { %v2314_v57 = vsel %vm2241_vm2, %v8622_v49, %v2313_v13  ;;  %v2316_v63 = vsel %vm2241_vm2, %v2313_v13, %v8624_v40  ;;  %v8632_v34 = vrot.slane %v8631_v54, 2  ;;  %v8633_v40 = vrot.slane %v7367_v37, 2 }
 0x3a2   : > { %v2319_v11 = vsel %vm2241_vm2, %v8625_v17, %v2318_v15  ;;  %v2321_v3 = vsel %vm2241_vm2, %v2318_v15, %v8627_v4  ;;  %v2382_v27 = vadd.f32 %v2314_v57, %v8628_v31  ;;  %v2383_v5 = vadd.f32 %v2316_v63, %v2108_v33 }
 0x3a3   : > { %v2384_v46 = vadd.f32 %v2319_v11, %v7374_v12  ;;  %v2385_v49 = vadd.f32 %v2321_v3, %v2110_v51  ;;  %v2557_v13 = vsel %vm2484_vm3, %v8630_v55, %v2556_v47  ;;  %v2559_v25 = vsel %vm2484_vm3, %v2556_v47, %v8632_v34 }
 0x3a4   : > { %v2562_v17 = vsel %vm2484_vm3, %v8633_v40, %v2561_v43  ;;  %v8635_v15 = vrot.slane %v8634_v48, 2  ;;  %v2625_v33 = vadd.f32 %v2557_v13, %v2382_v27  ;;  %v2626_v63 = vadd.f32 %v2559_v25, %v2383_v5  ;;  %v8637_v5 = vld [vmem:[#allocation42_spill] sm:$0xff] }
 0x3a5   : > { %v2627_v12 = vadd.f32 %v2562_v17, %v2384_v46  ;;  %v2743_v2 = vmul.f32 %v7542_v8, %v7625_v36  ;;  %v2864_v11 = vrot.slane %v2740_v32, 1  ;;  %v2982_v47 = vmul.f32 %v7550_v42, %v1993_v1 }
 0x3a6   : > { %v2564_v57 = vsel %vm2484_vm3, %v2561_v43, %v8635_v15  ;;  %v2691_v4 = vadd.f32 %v7377_v19, %v2625_v33  ;;  %v2692_v3 = vadd.f32 %v2660_v53, %v2626_v63  ;;  %v2985_v37 = vmul.f32 %v7550_v42, %v7625_v36  ;;  %v4243_v42 = vld [vmem:[%s7821_s3 + $0x6] ss:$0 sm:$0xff] }
 0x3a7   : > { %v2628_v51 = vadd.f32 %v2564_v57, %v2385_v49  ;;  %v2693_v31 = vadd.f32 %v7537_v7, %v2627_v12  ;;  %v8636_v43 = vrot.slane %v7370_v24, 1  ;;  %v8638_v46 = vrot.slane %v8637_v5, 1 }
 0x3a8   : > { %v2869_v32 = vrot.slane %v2743_v2, 1  ;;  %v3106_v53 = vrot.slane %v2982_v47, 2  ;;  %v3111_v13 = vrot.slane %v2985_v37, 2  ;;  %v3210_v7 = vmul.f32 %v4243_v42, %v7625_v36 }
 0x3a9   : > { %v2694_v55 = vadd.f32 %v2662_v59, %v2628_v51  ;;  %v2865_v27 = vsel %vm2241_vm2, %v8636_v43, %v2864_v11  ;;  %v2867_v8 = vsel %vm2241_vm2, %v2864_v11, %v8638_v46  ;;  %v3239_v1 = vadd.f32 %v7387_v10, %v3173_v16 }
 0x3aa   : > { %v2933_v49 = vadd.f32 %v2865_v27, %v2691_v4  ;;  %v2934_v19 = vadd.f32 %v2867_v8, %v2692_v3  ;;  %v3290_v24 = vmul.f32 %v7561_v56, %v7625_v36  ;;  %v8639_v59 = vrot.slane %v7545_v30, 1  ;;  %v8650_v27 = vld [vmem:[#allocation73_spill] sm:$0xff] }
 0x3ab   : > { %v8640_v34 = vrot.slane %v7423_v28, 1  ;;  %v8641_v40 = vrot.slane %v7380_v18, 2  ;;  %v8642_v48 = vrot.slane %v7276_v14, 2  ;;  %v8643_v56 = vrot.slane %v7553_v45, 2 }
 0x3ac   : > { %v2870_v54 = vsel %vm2241_vm2, %v8639_v59, %v2869_v32  ;;  %v8644_v57 = vrot.slane %v7426_v21, 2  ;;  %v8645_v18 = vrot.slane %v7279_v50, 1  ;;  %v3414_v51 = vrot.slane %v3290_v24, 1 }
 0x3ad   : > { %v2872_v25 = vsel %vm2241_vm2, %v2869_v32, %v8640_v34  ;;  %v3107_v17 = vsel %vm2484_vm3, %v8641_v40, %v3106_v53  ;;  %v3109_v15 = vsel %vm2484_vm3, %v3106_v53, %v8642_v48  ;;  %v2935_v10 = vadd.f32 %v2870_v54, %v2693_v31 }
 0x3ae   : > { %v2936_v16 = vadd.f32 %v2872_v25, %v2694_v55  ;;  %v3112_v30 = vsel %vm2484_vm3, %v8643_v56, %v3111_v13  ;;  %v3114_v28 = vsel %vm2484_vm3, %v3111_v13, %v8644_v57  ;;  %v3175_v33 = vadd.f32 %v3107_v17, %v2933_v49 }
 0x3af   : > { %v3176_v63 = vadd.f32 %v3109_v15, %v2934_v19  ;;  %v3412_v12 = vsel %vm2241_vm2, %v3409_v62, %v8645_v18  ;;  %v3177_v14 = vadd.f32 %v3112_v30, %v2935_v10  ;;  %v3481_v11 = vadd.f32 %v3410_v23, %v3239_v1  ;;  %v8658_v1 = vld [vmem:[#allocation45_spill] sm:$0xff] }
 0x3b0   : > { %v3178_v2 = vadd.f32 %v3114_v28, %v2936_v16  ;;  %v3482_v4 = vadd.f32 %v3412_v12, %v7633_v39  ;;  %v3241_v45 = vadd.f32 %v7556_v9, %v3175_v33  ;;  %v8646_v47 = vrot.slane %v7564_v35, 1 }
 0x3b1   : > { %v3242_v3 = vadd.f32 %v3210_v7, %v3176_v63  ;;  %v8647_v37 = vrot.slane %v7430_v38, 1  ;;  %v3243_v50 = vadd.f32 %v7509_v20, %v3177_v14  ;;  %v3532_v23 = vmul.f32 %v7569_v0, %v7625_v36 }
 0x3b2   : > { %v3415_v21 = vsel %vm2241_vm2, %v8646_v47, %v3414_v51  ;;  %v3244_v62 = vadd.f32 %v7509_v20, %v3178_v2  ;;  %v8648_v39 = vrot.slane %v7623_v26, 2  ;;  %v8649_v9 = vrot.slane %v7394_v58, 2 }
 0x3b3   : > { %v3417_v31 = vsel %vm2241_vm2, %v3414_v51, %v8647_v37  ;;  %v3483_v35 = vadd.f32 %v3415_v21, %v3241_v45  ;;  %v8651_v5 = vrot.slane %v8650_v27, 2  ;;  %v3722_v20 = vadd.f32 %v7609_v6, %v7611_v29 }
 0x3b4   : > { %v3652_v55 = vsel %vm2484_vm3, %v8649_v9, %v8648_v39  ;;  %v3484_v43 = vadd.f32 %v3417_v31, %v3242_v3  ;;  %v8652_v38 = vmov %v8648_v39  ;;  %v8653_v8 = vrot.slane %v7500_v44, 1  ;;  %v8662_v31 = vld [vmem:[#allocation43_spill] sm:$0xff] }
 0x3b5   : > { %v3654_v46 = vsel %vm2484_vm3, %v8652_v38, %v8651_v5  ;;  %v3656_v58 = vrot.slane %v3532_v23, 2  ;;  %v3723_v49 = vadd.f32 %v3652_v55, %v3481_v11  ;;  %v3757_v53 = vadd.f32 %v7357_v52, %v7617_v41 }
 0x3b6   : > { %v3485_v0 = vadd.f32 %v8653_v8, %v3243_v50  ;;  %v8654_v36 = vmov %v8653_v8  ;;  %v3724_v19 = vadd.f32 %v3654_v46, %v3482_v4  ;;  %v3758_v13 = vadd.f32 %v7357_v52, %v3722_v20 }
 0x3b7   : > { %v3486_v32 = vadd.f32 %v8654_v36, %v3244_v62  ;;  %v8655_v26 = vmax.f32 %v7520_v22, 0.0  ;;  %v8656_v7 = vrot.slane %v7572_v61, 2  ;;  %v8657_v29 = vrot.slane %v7438_v60, 2  ;;  %v8663_v62 = vld [vmem:[#allocation75_spill] sm:$0xff] }
 0x3b8   : > { %v8659_v24 = vrot.slane %v8658_v1, 2  ;;  %v3759_v40 = vadd.f32 %v7357_v52, %v3723_v49  ;;  %v3760_v22 = vadd.f32 %v7357_v52, %v3724_v19  ;;  %v3789_v48 = vadd.f32 3.0, %v3757_v53 }
 0x3b9   : > { %v3852_v42 = vmin.f32 %v8655_v26, 6.0  ;;  %v3657_v6 = vsel %vm2484_vm3, %v8656_v7, %v3656_v58  ;;  %v3659_v44 = vsel %vm2484_vm3, %v3656_v58, %v8657_v29  ;;  %v3790_v60 = vadd.f32 3.0, %v3758_v13 }
 0x3ba   : > { %v3727_v59 = vadd.f32 %v8659_v24, %v3485_v0  ;;  %v8660_v54 = vmov %v8659_v24  ;;  %v3725_v41 = vadd.f32 %v3657_v6, %v3483_v35  ;;  %v3726_v25 = vadd.f32 %v3659_v44, %v3484_v43  ;;  %v8664_v43 = vld [vmem:[#allocation32_spill] sm:$0xff] }
 0x3bb   : > { %v3728_v34 = vadd.f32 %v8660_v54, %v3486_v32  ;;  %v3791_v16 = vadd.f32 3.0, %v3759_v40  ;;  %v3792_v56 = vadd.f32 3.0, %v3760_v22  ;;  %v3821_v28 = vmax.f32 %v3789_v48, 0.0  ;;  %v8665_v0 = vld [vmem:[#allocation20_spill] sm:$0xff]  ;;  %v8666_v32 = vld [vmem:[#allocation27_spill] sm:$0xff] }
 0x3bc   : > { %v3763_v61 = vadd.f32 %v7357_v52, %v3727_v59  ;;  %v3761_v15 = vadd.f32 %v7357_v52, %v3725_v41  ;;  %v3762_v10 = vadd.f32 %v7357_v52, %v3726_v25  ;;  %v3822_v33 = vmax.f32 %v3790_v60, 0.0 }
 0x3bd   : > { %v3764_v17 = vadd.f32 %v7357_v52, %v3728_v34  ;;  %v3823_v12 = vmax.f32 %v3791_v16, 0.0  ;;  %v3824_v51 = vmax.f32 %v3792_v56, 0.0  ;;  %v3853_v11 = vmin.f32 %v3821_v28, 6.0  ;;  %v8661_v52 = vld [vmem:[#allocation29_spill] sm:$0xff]  ;;  %v8669_v56 = vld [vmem:[#allocation34_spill] sm:$0xff] }
 0x3be   : > { %v3795_v30 = vadd.f32 3.0, %v3763_v61  ;;  %v3793_v63 = vadd.f32 3.0, %v3761_v15  ;;  %v3794_v18 = vadd.f32 3.0, %v3762_v10  ;;  %v3854_v4 = vmin.f32 %v3822_v33, 6.0 }
 0x3bf   : > { %v3796_v57 = vadd.f32 3.0, %v3764_v17  ;;  %v3855_v47 = vmin.f32 %v3823_v12, 6.0  ;;  %v3856_v21 = vmin.f32 %v3824_v51, 6.0  ;;  %v3883_v50 = vmul.f32 %v8662_v31, %v8661_v52 }
 0x3c0   : > { %v3827_v14 = vmax.f32 %v3795_v30, 0.0  ;;  %v3825_v45 = vmax.f32 %v3793_v63, 0.0  ;;  %v3826_v3 = vmax.f32 %v3794_v18, 0.0  ;;  %v3884_v23 = vmul.f32 %v3852_v42, %v8663_v62  ;;  %v8667_v42 = vld [vmem:[#allocation5_spill] sm:$0xff] }
 0x3c1   : > { %v3828_v2 = vmax.f32 %v3796_v57, 0.0  ;;  %v3885_v55 = vmul.f32 %v3853_v11, %v3757_v53  ;;  %v3886_v35 = vmul.f32 %v3854_v4, %v3758_v13  ;;  %v4024_v27 = vsel %vm3990_vm4, %v8664_v43, 0.0 }
 0x3c2   : > { %v3859_v37 = vmin.f32 %v3827_v14, 6.0  ;;  %v3857_v39 = vmin.f32 %v3825_v45, 6.0  ;;  %v3858_v9 = vmin.f32 %v3826_v3, 6.0  ;;  %v3887_v38 = vmul.f32 %v3855_v47, %v3759_v40 }
 0x3c3   : > { %v3860_v5 = vmin.f32 %v3828_v2, 6.0  ;;  %v3888_v46 = vmul.f32 %v3856_v21, %v3760_v22  ;;  %v3913_v36 = vmul.f32 0.16666667, %v8665_v0  ;;  %v3914_v58 = vmul.f32 0.16666667, %v8666_v32 }
 0x3c4   : > { %v3889_v20 = vmul.f32 %v3857_v39, %v3761_v15  ;;  %v3890_v8 = vmul.f32 %v3858_v9, %v3762_v10  ;;  %v3915_v49 = vmul.f32 0.16666667, %v3883_v50  ;;  %v3916_v19 = vmul.f32 0.16666667, %v3884_v23 }
 0x3c5   : > { %v3917_v26 = vmul.f32 0.16666667, %v3885_v55  ;;  %v4025_v53 = vadd.f32 %v4024_v27, %v8667_v42  ;;  %v3891_v13 = vmul.f32 %v3859_v37, %v3763_v61  ;;  %v3918_v7 = vmul.f32 0.16666667, %v3886_v35 }
 0x3c6   : > { %v3919_v6 = vmul.f32 0.16666667, %v3887_v38  ;;  %v3945_v29 = vpack.c.bf16 %v3913_v36, %v3913_v36  ;;  %v3892_v44 = vmul.f32 %v3860_v5, %v3764_v17  ;;  %v3920_v1 = vmul.f32 0.16666667, %v3888_v46  ;;  %v8668_v17 = vld [vmem:[#allocation50_spill] sm:$0xff] }
 0x3c7   : > { %v3946_v24 = vpack.c.bf16 %v3914_v58, %v3914_v58  ;;  %v3921_v59 = vmul.f32 0.16666667, %v3889_v20  ;;  %v3947_v54 = vpack.c.bf16 %v3915_v49, %v3915_v49  ;;  %v3948_v34 = vpack.c.bf16 %v3916_v19, %v3916_v19 }
 0x3c8   : > { %v3949_v41 = vpack.c.bf16 %v3917_v26, %v3917_v26  ;;  %3978 = vst.msk [vmem:[%s5757_s14 + $0x50] sm:$0xf] %vm3957_vm5, %v3945_v29  ;;  %v3922_v25 = vmul.f32 0.16666667, %v3890_v8  ;;  %v3950_v40 = vpack.c.bf16 %v3918_v7, %v3918_v7  ;;  %v3923_v22 = vmul.f32 0.16666667, %v3891_v13 }
 0x3c9   : > { %3979 = vst.msk [vmem:[%s5757_s14 + $0x54] sm:$0xf] %vm3957_vm5, %v3946_v24  ;;  %v3951_v61 = vpack.c.bf16 %v3919_v6, %v3919_v6  ;;  %v4026_v48 = vsel %vm3990_vm4, %v8668_v17, 0.0  ;;  %v3924_v60 = vmul.f32 0.16666667, %v3892_v44  ;;  %v3952_v15 = vpack.c.bf16 %v3920_v1, %v3920_v1 }
 0x3ca   : > { %3980 = vst.msk [vmem:[%s5757_s14 + $0x58] sm:$0xf] %vm3957_vm5, %v3947_v54  ;;  %v4027_v10 = vadd.f32 %v4026_v48, %v4025_v53  ;;  %v3953_v16 = vpack.c.bf16 %v3921_v59, %v3921_v59  ;;  %v4028_v30 = vsel %vm3990_vm4, %v8669_v56, 0.0  ;;  %v4030_v57 = vsel %vm3990_vm4, %v3913_v36, 0.0 }
 0x3cb   : > { %3981 = vst.msk [vmem:[%s5757_s14 + $0x5c] sm:$0xf] %vm3957_vm5, %v3948_v34  ;;  %v3954_v28 = vpack.c.bf16 %v3922_v25, %v3922_v25  ;;  %v3955_v63 = vpack.c.bf16 %v3923_v22, %v3923_v22  ;;  %v3956_v18 = vpack.c.bf16 %v3924_v60, %v3924_v60  ;;  %v4032_v51 = vsel %vm3990_vm4, %v3914_v58, 0.0 }
 0x3cc   : > { %3982 = vst.msk [vmem:[%s5757_s14 + $0x60] sm:$0xf] %vm3957_vm5, %v3949_v41  ;;  %v4029_v33 = vadd.f32 %v4028_v30, %v4027_v10  ;;  %v4034_v14 = vsel %vm3990_vm4, %v3915_v49, 0.0  ;;  %v4036_v4 = vsel %vm3990_vm4, %v3916_v19, 0.0  ;;  %v4038_v45 = vsel %vm3990_vm4, %v3917_v26, 0.0 }
 0x3cd   : > { %3983 = vst.msk [vmem:[%s5757_s14 + $0x64] sm:$0xf] %vm3957_vm5, %v3950_v40  ;;  %v4040_v21 = vsel %vm3990_vm4, %v3918_v7, 0.0  ;;  %v4042_v37 = vsel %vm3990_vm4, %v3919_v6, 0.0  ;;  %v4044_v50 = vsel %vm3990_vm4, %v3920_v1, 0.0  ;;  %v4046_v62 = vsel %vm3990_vm4, %v3921_v59, 0.0 }
 0x3ce   : > { %3984 = vst.msk [vmem:[%s5757_s14 + $0x68] sm:$0xf] %vm3957_vm5, %v3951_v61  ;;  %v4031_v12 = vadd.f32 %v4030_v57, %v4029_v33  ;;  %v4048_v9 = vsel %vm3990_vm4, %v3922_v25, 0.0  ;;  %v4050_v55 = vsel %vm3990_vm4, %v3923_v22, 0.0  ;;  %v4052_v27 = vsel %vm3990_vm4, %v3924_v60, 0.0 }
 0x3cf   : > { %3985 = vst.msk [vmem:[%s5757_s14 + $0x6c] sm:$0xf] %vm3957_vm5, %v3952_v15 }
 0x3d0   : > { %3986 = vst.msk [vmem:[%s5757_s14 + $0x70] sm:$0xf] %vm3957_vm5, %v3953_v16  ;;  %v4033_v2 = vadd.f32 %v4032_v51, %v4031_v12 }
 0x3d1   : > { %3987 = vst.msk [vmem:[%s5757_s14 + $0x74] sm:$0xf] %vm3957_vm5, %v3954_v28 }
 0x3d2   : > { %3988 = vst.msk [vmem:[%s5757_s14 + $0x78] sm:$0xf] %vm3957_vm5, %v3955_v63  ;;  %v4035_v11 = vadd.f32 %v4034_v14, %v4033_v2 }
 0x3d3   : > { %3989 = vst.msk [vmem:[%s5757_s14 + $0x7c] sm:$0xf] %vm3957_vm5, %v3956_v18 }
 0x3d4   : > { %v4037_v3 = vadd.f32 %v4036_v4, %v4035_v11 }
 0x3d6   : > { %v4039_v47 = vadd.f32 %v4038_v45, %v4037_v3 }
 0x3d8   : > { %v4041_v52 = vadd.f32 %v4040_v21, %v4039_v47 }
 0x3da   : > { %v4043_v31 = vadd.f32 %v4042_v37, %v4041_v52 }
 0x3dc   : > { %v4045_v23 = vadd.f32 %v4044_v50, %v4043_v31 }
 0x3de   : > { %v4047_v39 = vadd.f32 %v4046_v62, %v4045_v23 }
 0x3e0   : > { %v4049_v35 = vadd.f32 %v4048_v9, %v4047_v39 }
 0x3e2   : > { %v4051_v43 = vadd.f32 %v4050_v55, %v4049_v35 }
 0x3e4   : > { %v4053_v5 = vadd.f32 %v4052_v27, %v4051_v43 }
 0x3e6   : > { %v4054_v38 = vrot.slane %v4053_v5, 4 }
 0x3e8   : > { %v4055_v46 = vadd.f32 %v4054_v38, %v4053_v5 }
 0x3ea   : > { %v4056_v20 = vrot.slane %v4055_v46, 2 }
 0x3ec   : > { %v4057_v8 = vadd.f32 %v4056_v20, %v4055_v46 }
 0x3ee   : > { %v4058_v0 = vrot.slane %v4057_v8, 1 }
 0x3f0   : > { %v4059_v36 = vadd.f32 %v4058_v0, %v4057_v8 }
 0x3f2   : > { %4061 = vst.msk [vmem:[%s260_s23] sm:$0x1] %vm4060_vm6, %v4059_v36 }
 0x3f3 PF: > { %s17_s21 = sadd.s32 1, %s4250_s21  }
 0x3f4   : > { %p14_p4 = scmp.ge.s32.totalorder %s17_s21, 4  }
 0x3f6   :  { %16 = sbr.rel (!%p14_p4) target bundleno = 1 (0x1), region = 82 }

</bundles_post_ra>
